<compile_context>
chip_gen: v7x
topology: tpu7x:2x2x1
jax: 0.10.0
libtpu: 0.0.40
codegen_flags: <defaults>
</compile_context>

<pallas_src>
import functools

import jax
import jax.numpy as jnp
from jax.experimental import pallas as pl
from jax.experimental.pallas import tpu as pltpu


# Set to (pltpu.CORE_PARALLEL,) on v7x to genuinely shard the two LSTM
# directions across the chip's two TensorCores; plain "parallel" is safe on
# all generations (v5e/v6e run the 2-step grid serially on one TC).
_DIR_SEMANTICS = ("parallel",)


# ---------------------------------------------------------------------------
# Shared LSTM recurrence (statically unrolled, static indices)
# ---------------------------------------------------------------------------
def _lstm_cell_steps(gx, whh, time_order, B, H):
    """Run the LSTM recurrence over `time_order` (a static Python index list).

    gx : (T*B, 4H) f32  precomputed x @ Wih + bias, gate order [i, f, o, g].
    whh: (H, 4H)   bf16.
    Returns (T*B, H) f32 hidden states ordered by *time* index.
    """
    f32, bf16 = jnp.float32, jnp.bfloat16
    h = jnp.zeros((B, H), f32)
    c = jnp.zeros((B, H), f32)
    hs = [None] * len(time_order)
    for t in time_order:                         # static unroll, static slices
        g = gx[t * B:(t + 1) * B] + jnp.dot(h.astype(bf16), whh,
                                            preferred_element_type=f32)
        sig = jax.nn.sigmoid(g[:, :3 * H])       # one EUP push covers i, f, o
        i_g = sig[:, :H]
        f_g = sig[:, H:2 * H]
        o_g = sig[:, 2 * H:3 * H]
        g_g = jnp.tanh(g[:, 3 * H:])             # one EUP push for g
        c = f_g * c + i_g * g_g
        h = o_g * jnp.tanh(c)
        hs[t] = h                                # placed at its time index
    return jnp.concatenate(hs, axis=0)           # (T*B, H)


# ---------------------------------------------------------------------------
# Kernel 1: bidirectional LSTM pair (char pair, LM pair) — grid=(2,) over dirs
# ---------------------------------------------------------------------------
def _bilstm_kernel(x_ref, wih_ref, whh_ref, b_ref, o_ref, *, T, B, H):
    """One LSTM direction per grid step; both directions walk time forward
    (the backward char/LM inputs are already time-reversed by the caller).

    x_ref   : (1, T*B, In) f32
    wih_ref : (1, In, 4H)  bf16
    whh_ref : (1, H, 4H)   bf16
    b_ref   : (1, 1, 4H)   f32   (b_ih + b_hh)
    o_ref   : (1, T*B, H)  f32   (single writeback at the end)
    """
    f32, bf16 = jnp.float32, jnp.bfloat16
    # Hoisted time-parallel input projection: one well-filled MXU matmul.
    gx = jnp.dot(x_ref[0].astype(bf16), wih_ref[0],
                 preferred_element_type=f32) + b_ref[0]
    o_ref[0] = _lstm_cell_steps(gx, whh_ref[0], list(range(T)), B, H)


def bilstm_pair(x, wih, whh, bias, *, T, B):
    """x: (2, T*B, In).  Returns (2, T*B, H) f32 hidden states."""
    _, M, In = x.shape
    H = whh.shape[1]
    return pl.pallas_call(
        functools.partial(_bilstm_kernel, T=T, B=B, H=H),
        out_shape=jax.ShapeDtypeStruct((2, M, H), jnp.float32),
        grid=(2,),
        in_specs=[
            pl.BlockSpec((1, M, In), lambda d: (d, 0, 0)),
            pl.BlockSpec((1, In, 4 * H), lambda d: (d, 0, 0)),
            pl.BlockSpec((1, H, 4 * H), lambda d: (d, 0, 0)),
            pl.BlockSpec((1, 1, 4 * H), lambda d: (d, 0, 0)),
        ],
        out_specs=pl.BlockSpec((1, M, H), lambda d: (d, 0, 0)),
        compiler_params=pltpu.CompilerParams(dimension_semantics=_DIR_SEMANTICS),
    )(x, wih, whh, bias)


# ---------------------------------------------------------------------------
# Kernel 2: fused rnn_in build + bidirectional word LSTM + CRF half-projection
# ---------------------------------------------------------------------------
def _word_lstm_crf_kernel(fc_ref, bc_ref, flm_ref, blm_ref, we_ref,
                          wcf_ref, wcb_ref, cb_ref, wlf_ref, wlb_ref, lb_ref,
                          wih_ref, whh_ref, b_ref, crfw_ref, o_ref,
                          *, T, B, H):
    """Per grid step (direction d): build rnn_in (recomputed per direction,
    only a few KiB), run one word-LSTM direction (backward direction walks a
    statically reversed time order), project through this direction's half of
    the CRF weight.  Output: (1, T*B, Y2) partial CRF potentials.
    """
    f32, bf16 = jnp.float32, jnp.bfloat16
    d = pl.program_id(0)

    # rnn_in = concat(char_seq(cat(fc,bc)), relu(lm_seq(cat(flm,blm))), w_e)
    # with the torch concats folded into split weight halves + value concat.
    c_part = (jnp.dot(fc_ref[...].astype(bf16), wcf_ref[...],
                      preferred_element_type=f32)
              + jnp.dot(bc_ref[...].astype(bf16), wcb_ref[...],
                        preferred_element_type=f32)
              + cb_ref[...])
    lm_part = jnp.maximum(
        jnp.dot(flm_ref[...].astype(bf16), wlf_ref[...],
                preferred_element_type=f32)
        + jnp.dot(blm_ref[...].astype(bf16), wlb_ref[...],
                  preferred_element_type=f32)
        + lb_ref[...], 0.0)                                     # ReLU
    rnn_in = jnp.concatenate([c_part, lm_part, we_ref[...]], axis=1)  # (T*B,3w)

    # Hoisted input projection for this direction.
    gx = jnp.dot(rnn_in.astype(bf16), wih_ref[0],
                 preferred_element_type=f32) + b_ref[0]
    whh = whh_ref[0]
    crfw = crfw_ref[0]

    def run(time_order):
        h_all = _lstm_cell_steps(gx, whh, time_order, B, H)     # time-ordered
        o_ref[0] = jnp.dot(h_all.astype(bf16), crfw,
                           preferred_element_type=f32)

    @pl.when(d == 0)                 # forward direction: t = 0 .. T-1
    def _():
        run(list(range(T)))

    @pl.when(d == 1)                 # backward direction: statically reversed
    def _():
        run(list(range(T - 1, -1, -1)))


def word_lstm_crf(fc, bc, flm, blm, we, wcf, wcb, cb, wlf, wlb, lb,
                  wih, whh, b, crfw, *, T, B):
    M = fc.shape[0]
    H = whh.shape[1]
    Y2 = crfw.shape[-1]
    shared = (fc, bc, flm, blm, we, wcf, wcb, cb, wlf, wlb, lb)
    per_dir = (wih, whh, b, crfw)

    def shared_spec(a):
        nd = a.ndim
        return pl.BlockSpec(a.shape, lambda d, _nd=nd: (0,) * _nd)

    def dir_spec(a):
        nd = a.ndim
        return pl.BlockSpec((1,) + a.shape[1:],
                            lambda d, _nd=nd: (d,) + (0,) * (_nd - 1))

    # TODO(synk): for production dims (w_hidden 200-600, B/T large) re-derive
    # VMEM residency (v7x has 64 MiB physical) and, if needed, tile the time
    # axis while keeping only h/c resident; at these toy shapes defaults fit.
    return pl.pallas_call(
        functools.partial(_word_lstm_crf_kernel, T=T, B=B, H=H),
        out_shape=jax.ShapeDtypeStruct((2, M, Y2), jnp.float32),
        grid=(2,),
        in_specs=[shared_spec(a) for a in shared] + [dir_spec(a) for a in per_dir],
        out_specs=pl.BlockSpec((1, M, Y2), lambda d: (d, 0, 0)),
        compiler_params=pltpu.CompilerParams(dimension_semantics=_DIR_SEMANTICS),
    )(*shared, *per_dir)


# ---------------------------------------------------------------------------
# Parameter initialization (deterministic, synthetic), kernel-ready layout
# ---------------------------------------------------------------------------
def init_lstm_params(key, in_dim, hidden, scale=0.1):
    k1, k2, k3, k4 = jax.random.split(key, 4)
    return (
        jax.random.normal(k1, (4 * hidden, in_dim), jnp.float32) * scale,   # Wih
        jax.random.normal(k2, (4 * hidden, hidden), jnp.float32) * scale,   # Whh
        jax.random.normal(k3, (4 * hidden,), jnp.float32) * scale,          # bih
        jax.random.normal(k4, (4 * hidden,), jnp.float32) * scale,          # bhh
    )


def init_linear_params(key, in_dim, out_dim, scale=0.1):
    k1, k2 = jax.random.split(key)
    W = jax.random.normal(k1, (out_dim, in_dim), jnp.float32) * scale
    b = jax.random.normal(k2, (out_dim,), jnp.float32) * scale
    return W, b


def _reorder_gates(w, H):
    """PyTorch LSTM gate order [i, f, g, o] -> kernel order [i, f, o, g]
    along the leading 4H axis (groups the sigmoid gates contiguously)."""
    return jnp.concatenate([w[:2 * H], w[3 * H:4 * H], w[2 * H:3 * H]], axis=0)


def stack_lstm_pair(fw, bw):
    """PyTorch (4H,In)/(4H,H) layouts -> stacked, gate-reordered, transposed
    bf16 MXU operands and a fused (b_ih + b_hh) f32 bias."""
    def prep(p):
        Wih, Whh, bih, bhh = p
        H = Whh.shape[1]
        wih = _reorder_gates(Wih, H).T.astype(jnp.bfloat16)               # (In, 4H)
        whh = _reorder_gates(Whh, H).T.astype(jnp.bfloat16)               # (H, 4H)
        bb = _reorder_gates(bih + bhh, H)[None, :].astype(jnp.float32)    # (1, 4H)
        return wih, whh, bb
    wf, hf, bf_ = prep(fw)
    wb, hb, bb_ = prep(bw)
    return jnp.stack([wf, wb]), jnp.stack([hf, hb]), jnp.stack([bf_, bb_])


def make_params(key, c_num, c_dim, c_hidden, w_num, w_dim, w_hidden,
                y_num, lm_dim):
    keys = jax.random.split(key, 12)
    p = {}
    p["char_embed"] = jax.random.normal(keys[0], (c_num, c_dim), jnp.float32) * 0.1
    p["word_embed"] = jax.random.normal(keys[1], (w_num, w_dim), jnp.float32) * 0.1
    # TODO(synk): f_lm / b_lm are external nn.Modules in the original code;
    # modeled here as deterministic embedding + single-layer LSTM language
    # models whose output_dim == lm_dim.
    p["lm_embed"] = jax.random.normal(keys[5], (w_num, lm_dim), jnp.float32) * 0.1

    char_fw = init_lstm_params(keys[2], c_dim, c_hidden)
    char_bw = init_lstm_params(keys[3], c_dim, c_hidden)
    p["char_wih"], p["char_whh"], p["char_b"] = stack_lstm_pair(char_fw, char_bw)

    f_lm = init_lstm_params(keys[6], lm_dim, lm_dim)
    b_lm = init_lstm_params(keys[7], lm_dim, lm_dim)
    p["lm_wih"], p["lm_whh"], p["lm_b"] = stack_lstm_pair(f_lm, b_lm)

    hd = w_hidden // 2
    word_fw = init_lstm_params(keys[9], 3 * w_dim, hd)
    word_bw = init_lstm_params(keys[10], 3 * w_dim, hd)
    p["word_wih"], p["word_whh"], p["word_b"] = stack_lstm_pair(word_fw, word_bw)

    # char_seq: Linear(2*c_hidden -> w_dim), weight split for the fused concat.
    Wc, bc = init_linear_params(keys[4], 2 * c_hidden, w_dim)
    p["char_seq_wf"] = Wc[:, :c_hidden].T.astype(jnp.bfloat16)
    p["char_seq_wb"] = Wc[:, c_hidden:].T.astype(jnp.bfloat16)
    p["char_seq_b"] = bc.reshape(1, w_dim)

    # lm_seq: Linear(2*lm_dim -> w_dim), weight split for the fused concat.
    Wl, bl = init_linear_params(keys[8], 2 * lm_dim, w_dim)
    p["lm_seq_wf"] = Wl[:, :lm_dim].T.astype(jnp.bfloat16)
    p["lm_seq_wb"] = Wl[:, lm_dim:].T.astype(jnp.bfloat16)
    p["lm_seq_b"] = bl.reshape(1, w_dim)

    # CRF potentials: Linear(w_hidden -> y_num*y_num), split over the fwd/bwd
    # halves of the word-LSTM output (concat folded into the weight halves).
    Wcrf, bcrf = init_linear_params(keys[11], w_hidden, y_num * y_num)
    p["crf_w"] = jnp.stack([Wcrf[:, :hd].T, Wcrf[:, hd:].T]).astype(jnp.bfloat16)
    p["crf_b"] = bcrf.reshape(1, y_num * y_num).astype(jnp.float32)
    return p


# ---------------------------------------------------------------------------
# SeqLabel forward
# ---------------------------------------------------------------------------
def seqlabel_forward(params, f_c, f_p, b_c, b_p, flm_w, blm_w, blm_ind, f_w,
                     *, y_num):
    Tw, B = f_w.shape                            # word_seq_length, batch_size
    Tc = f_c.shape[0]

    # ---- character path (dropout = identity at inference) ----
    f_c_e = jnp.take(params["char_embed"], f_c, axis=0)          # (Tc, B, c_dim)
    b_c_e = jnp.take(params["char_embed"], b_c, axis=0)
    char_x = jnp.stack([f_c_e, b_c_e]).reshape(2, Tc * B, -1)
    # TODO(synk): on v6e/v5e the char and LM bilstm_pair launches could be
    # merged into one pallas_call (pad to a common T/In) to amortize launch
    # overhead further; kept separate here for shape generality.
    char_h = bilstm_pair(char_x, params["char_wih"], params["char_whh"],
                         params["char_b"], T=Tc, B=B)             # (2, Tc*B, Hc)
    f_c_o = jnp.take(char_h[0], f_p, axis=0)                      # (Tw*B, Hc)
    b_c_o = jnp.take(char_h[1], b_p, axis=0)

    # ---- language-model path ----
    f_lm_in = jnp.take(params["lm_embed"], flm_w, axis=0)         # (Tw, B, lm)
    b_lm_in = jnp.take(params["lm_embed"], blm_w, axis=0)
    lm_x = jnp.stack([f_lm_in, b_lm_in]).reshape(2, Tw * B, -1)
    lm_h = bilstm_pair(lm_x, params["lm_wih"], params["lm_whh"],
                       params["lm_b"], T=Tw, B=B)                 # (2, Tw*B, lm)
    f_lm_e = lm_h[0]
    b_lm_e = jnp.take(lm_h[1], blm_ind, axis=0)

    # ---- word embedding ----
    w_e = jnp.take(params["word_embed"], f_w, axis=0).reshape(Tw * B, -1)

    # ---- fused rnn_in + bidirectional word LSTM + CRF partials ----
    crf_part = word_lstm_crf(
        f_c_o, b_c_o, f_lm_e, b_lm_e, w_e,
        params["char_seq_wf"], params["char_seq_wb"], params["char_seq_b"],
        params["lm_seq_wf"], params["lm_seq_wb"], params["lm_seq_b"],
        params["word_wih"], params["word_whh"], params["word_b"],
        params["crf_w"], T=Tw, B=B)                               # (2, Tw*B, Y2)
    crf = crf_part[0] + crf_part[1] + params["crf_b"]
    return crf.reshape(Tw, B, y_num, y_num)


# ---------------------------------------------------------------------------
# Main
# ---------------------------------------------------------------------------
if __name__ == "__main__":
    # Small, forward-consistent hyperparameters.
    c_num, c_dim, c_hidden = 32, 16, 16       # c_layer = 1
    w_num, w_dim, w_hidden = 64, 16, 32       # w_layer = 1 (bi-dir: 16 / direction)
    y_num = 6
    lm_dim = 16                               # f_lm.output_dim == b_lm.output_dim
    Tc, Tw, B = 24, 8, 2                      # char seq len, word seq len, batch

    key = jax.random.PRNGKey(0)
    kp, k1, k2, k3, k4, k5, k6, k7, k8 = jax.random.split(key, 9)

    params = make_params(kp, c_num, c_dim, c_hidden, w_num, w_dim, w_hidden,
                         y_num, lm_dim)

    f_c = jax.random.randint(k1, (Tc, B), 0, c_num, dtype=jnp.int32)
    b_c = jax.random.randint(k2, (Tc, B), 0, c_num, dtype=jnp.int32)
    f_p = jax.random.randint(k3, (Tw * B,), 0, Tc * B, dtype=jnp.int32)
    b_p = jax.random.randint(k4, (Tw * B,), 0, Tc * B, dtype=jnp.int32)
    flm_w = jax.random.randint(k5, (Tw, B), 0, w_num, dtype=jnp.int32)
    blm_w = jax.random.randint(k6, (Tw, B), 0, w_num, dtype=jnp.int32)
    blm_ind = jax.random.randint(k7, (Tw * B,), 0, Tw * B, dtype=jnp.int32)
    f_w = jax.random.randint(k8, (Tw, B), 0, w_num, dtype=jnp.int32)

    fwd = jax.jit(functools.partial(seqlabel_forward, y_num=y_num))
    out = fwd(params, f_c, f_p, b_c, b_p, flm_w, blm_w, blm_ind, f_w)
    out = jax.block_until_ready(out)

    assert out.shape == (Tw, B, y_num, y_num), out.shape
    assert out.dtype == jnp.float32
    assert bool(jnp.all(jnp.isfinite(out)))
    print("KERNEL_OK")
</pallas_src>

<mosaic_0001>
module attributes {stable_mosaic.version = 11 : i64} {
  func.func @_bilstm_kernel(%arg0: i32, %arg1: memref<1x48x16xf32, #tpu.memory_space<vmem>>, %arg2: memref<1x16x64xbf16, #tpu.memory_space<vmem>>, %arg3: memref<1x16x64xbf16, #tpu.memory_space<vmem>>, %arg4: memref<1x1x64xf32, #tpu.memory_space<vmem>>, %arg5: memref<1x48x16xf32, #tpu.memory_space<vmem>>) attributes {dimension_semantics = [#tpu.dimension_semantics<parallel>], iteration_bounds = array<i64: 2>, scalar_prefetch = 0 : i64, scratch_operands = 0 : i64, tpu.core_type = #tpu.core_type<tc>, window_params = [{transform_indices = @transform_0, window_bounds = array<i64: 1, 48, 16>}, {transform_indices = @transform_1, window_bounds = array<i64: 1, 16, 64>}, {transform_indices = @transform_2, window_bounds = array<i64: 1, 16, 64>}, {transform_indices = @transform_3, window_bounds = array<i64: 1, 1, 64>}, {transform_indices = @transform_4, window_bounds = array<i64: 1, 48, 16>}]} {
    %c0 = arith.constant 0 : index
    %c0_0 = arith.constant 0 : index
    %c0_1 = arith.constant 0 : index
    %0 = vector.load %arg1[%c0, %c0_0, %c0_1] : memref<1x48x16xf32, #tpu.memory_space<vmem>>, vector<1x48x16xf32>
    %1 = vector.shape_cast %0 : vector<1x48x16xf32> to vector<48x16xf32>
    %2 = arith.truncf %1 : vector<48x16xf32> to vector<48x16xbf16>
    %c0_2 = arith.constant 0 : index
    %c0_3 = arith.constant 0 : index
    %c0_4 = arith.constant 0 : index
    %3 = vector.load %arg2[%c0_2, %c0_3, %c0_4] : memref<1x16x64xbf16, #tpu.memory_space<vmem>>, vector<1x16x64xbf16>
    %4 = vector.shape_cast %3 : vector<1x16x64xbf16> to vector<16x64xbf16>
    %cst = arith.constant dense<0.000000e+00> : vector<48x64xf32>
    %5 = tpu.matmul %2, %4, %cst {dimension_numbers = #tpu.dot_dimension_numbers<[1], [0], [0], [1], [0, 0, 1, 1], [], []>} : vector<48x16xbf16>, vector<16x64xbf16>, vector<48x64xf32> -> vector<48x64xf32>
    %c0_5 = arith.constant 0 : index
    %c0_6 = arith.constant 0 : index
    %c0_7 = arith.constant 0 : index
    %6 = vector.load %arg4[%c0_5, %c0_6, %c0_7] : memref<1x1x64xf32, #tpu.memory_space<vmem>>, vector<1x1x64xf32>
    %7 = vector.shape_cast %6 : vector<1x1x64xf32> to vector<1x64xf32>
    %8 = vector.broadcast %7 : vector<1x64xf32> to vector<48x64xf32>
    %9 = arith.addf %5, %8 : vector<48x64xf32>
    %c0_8 = arith.constant 0 : index
    %c0_9 = arith.constant 0 : index
    %c0_10 = arith.constant 0 : index
    %10 = vector.load %arg3[%c0_8, %c0_9, %c0_10] : memref<1x16x64xbf16, #tpu.memory_space<vmem>>, vector<1x16x64xbf16>
    %11 = vector.shape_cast %10 : vector<1x16x64xbf16> to vector<16x64xbf16>
    %cst_11 = arith.constant 0.000000e+00 : f32
    %12 = vector.broadcast %cst_11 : f32 to vector<2x16xf32>
    %cst_12 = arith.constant 0.000000e+00 : f32
    %13 = vector.broadcast %cst_12 : f32 to vector<2x16xf32>
    %14 = vector.extract_strided_slice %9 {offsets = [0, 0], sizes = [2, 64], strides = [1, 1]} : vector<48x64xf32> to vector<2x64xf32>
    %15 = arith.truncf %12 : vector<2x16xf32> to vector<2x16xbf16>
    %cst_13 = arith.constant dense<0.000000e+00> : vector<2x64xf32>
    %16 = tpu.matmul %15, %11, %cst_13 {dimension_numbers = #tpu.dot_dimension_numbers<[1], [0], [0], [1], [0, 0, 1, 1], [], []>} : vector<2x16xbf16>, vector<16x64xbf16>, vector<2x64xf32> -> vector<2x64xf32>
    %17 = arith.addf %14, %16 : vector<2x64xf32>
    %18 = vector.extract_strided_slice %17 {offsets = [0, 0], sizes = [2, 48], strides = [1, 1]} : vector<2x64xf32> to vector<2x48xf32>
    %19 = arith.negf %18 : vector<2x48xf32>
    %20 = math.exp %19 : vector<2x48xf32>
    %cst_14 = arith.constant 1.000000e+00 : f32
    %21 = vector.broadcast %cst_14 : f32 to vector<2x48xf32>
    %22 = arith.addf %21, %20 : vector<2x48xf32>
    %23 = arith.divf %21, %22 : vector<2x48xf32>
    %24 = vector.extract_strided_slice %23 {offsets = [0, 0], sizes = [2, 16], strides = [1, 1]} : vector<2x48xf32> to vector<2x16xf32>
    %25 = vector.extract_strided_slice %23 {offsets = [0, 16], sizes = [2, 16], strides = [1, 1]} : vector<2x48xf32> to vector<2x16xf32>
    %26 = vector.extract_strided_slice %23 {offsets = [0, 32], sizes = [2, 16], strides = [1, 1]} : vector<2x48xf32> to vector<2x16xf32>
    %27 = vector.extract_strided_slice %17 {offsets = [0, 48], sizes = [2, 16], strides = [1, 1]} : vector<2x64xf32> to vector<2x16xf32>
    %28 = math.tanh %27 : vector<2x16xf32>
    %29 = arith.mulf %25, %13 : vector<2x16xf32>
    %30 = arith.mulf %24, %28 : vector<2x16xf32>
    %31 = arith.addf %29, %30 : vector<2x16xf32>
    %32 = math.tanh %31 : vector<2x16xf32>
    %33 = arith.mulf %26, %32 : vector<2x16xf32>
    %34 = vector.extract_strided_slice %9 {offsets = [2, 0], sizes = [2, 64], strides = [1, 1]} : vector<48x64xf32> to vector<2x64xf32>
    %35 = arith.truncf %33 : vector<2x16xf32> to vector<2x16xbf16>
    %cst_15 = arith.constant dense<0.000000e+00> : vector<2x64xf32>
    %36 = tpu.matmul %35, %11, %cst_15 {dimension_numbers = #tpu.dot_dimension_numbers<[1], [0], [0], [1], [0, 0, 1, 1], [], []>} : vector<2x16xbf16>, vector<16x64xbf16>, vector<2x64xf32> -> vector<2x64xf32>
    %37 = arith.addf %34, %36 : vector<2x64xf32>
    %38 = vector.extract_strided_slice %37 {offsets = [0, 0], sizes = [2, 48], strides = [1, 1]} : vector<2x64xf32> to vector<2x48xf32>
    %39 = arith.negf %38 : vector<2x48xf32>
    %40 = math.exp %39 : vector<2x48xf32>
    %cst_16 = arith.constant 1.000000e+00 : f32
    %41 = vector.broadcast %cst_16 : f32 to vector<2x48xf32>
    %42 = arith.addf %41, %40 : vector<2x48xf32>
    %43 = arith.divf %41, %42 : vector<2x48xf32>
    %44 = vector.extract_strided_slice %43 {offsets = [0, 0], sizes = [2, 16], strides = [1, 1]} : vector<2x48xf32> to vector<2x16xf32>
    %45 = vector.extract_strided_slice %43 {offsets = [0, 16], sizes = [2, 16], strides = [1, 1]} : vector<2x48xf32> to vector<2x16xf32>
    %46 = vector.extract_strided_slice %43 {offsets = [0, 32], sizes = [2, 16], strides = [1, 1]} : vector<2x48xf32> to vector<2x16xf32>
    %47 = vector.extract_strided_slice %37 {offsets = [0, 48], sizes = [2, 16], strides = [1, 1]} : vector<2x64xf32> to vector<2x16xf32>
    %48 = math.tanh %47 : vector<2x16xf32>
    %49 = arith.mulf %45, %31 : vector<2x16xf32>
    %50 = arith.mulf %44, %48 : vector<2x16xf32>
    %51 = arith.addf %49, %50 : vector<2x16xf32>
    %52 = math.tanh %51 : vector<2x16xf32>
    %53 = arith.mulf %46, %52 : vector<2x16xf32>
    %54 = vector.extract_strided_slice %9 {offsets = [4, 0], sizes = [2, 64], strides = [1, 1]} : vector<48x64xf32> to vector<2x64xf32>
    %55 = arith.truncf %53 : vector<2x16xf32> to vector<2x16xbf16>
    %cst_17 = arith.constant dense<0.000000e+00> : vector<2x64xf32>
    %56 = tpu.matmul %55, %11, %cst_17 {dimension_numbers = #tpu.dot_dimension_numbers<[1], [0], [0], [1], [0, 0, 1, 1], [], []>} : vector<2x16xbf16>, vector<16x64xbf16>, vector<2x64xf32> -> vector<2x64xf32>
    %57 = arith.addf %54, %56 : vector<2x64xf32>
    %58 = vector.extract_strided_slice %57 {offsets = [0, 0], sizes = [2, 48], strides = [1, 1]} : vector<2x64xf32> to vector<2x48xf32>
    %59 = arith.negf %58 : vector<2x48xf32>
    %60 = math.exp %59 : vector<2x48xf32>
    %cst_18 = arith.constant 1.000000e+00 : f32
    %61 = vector.broadcast %cst_18 : f32 to vector<2x48xf32>
    %62 = arith.addf %61, %60 : vector<2x48xf32>
    %63 = arith.divf %61, %62 : vector<2x48xf32>
    %64 = vector.extract_strided_slice %63 {offsets = [0, 0], sizes = [2, 16], strides = [1, 1]} : vector<2x48xf32> to vector<2x16xf32>
    %65 = vector.extract_strided_slice %63 {offsets = [0, 16], sizes = [2, 16], strides = [1, 1]} : vector<2x48xf32> to vector<2x16xf32>
    %66 = vector.extract_strided_slice %63 {offsets = [0, 32], sizes = [2, 16], strides = [1, 1]} : vector<2x48xf32> to vector<2x16xf32>
    %67 = vector.extract_strided_slice %57 {offsets = [0, 48], sizes = [2, 16], strides = [1, 1]} : vector<2x64xf32> to vector<2x16xf32>
    %68 = math.tanh %67 : vector<2x16xf32>
    %69 = arith.mulf %65, %51 : vector<2x16xf32>
    %70 = arith.mulf %64, %68 : vector<2x16xf32>
    %71 = arith.addf %69, %70 : vector<2x16xf32>
    %72 = math.tanh %71 : vector<2x16xf32>
    %73 = arith.mulf %66, %72 : vector<2x16xf32>
    %74 = vector.extract_strided_slice %9 {offsets = [6, 0], sizes = [2, 64], strides = [1, 1]} : vector<48x64xf32> to vector<2x64xf32>
    %75 = arith.truncf %73 : vector<2x16xf32> to vector<2x16xbf16>
    %cst_19 = arith.constant dense<0.000000e+00> : vector<2x64xf32>
    %76 = tpu.matmul %75, %11, %cst_19 {dimension_numbers = #tpu.dot_dimension_numbers<[1], [0], [0], [1], [0, 0, 1, 1], [], []>} : vector<2x16xbf16>, vector<16x64xbf16>, vector<2x64xf32> -> vector<2x64xf32>
    %77 = arith.addf %74, %76 : vector<2x64xf32>
    %78 = vector.extract_strided_slice %77 {offsets = [0, 0], sizes = [2, 48], strides = [1, 1]} : vector<2x64xf32> to vector<2x48xf32>
    %79 = arith.negf %78 : vector<2x48xf32>
    %80 = math.exp %79 : vector<2x48xf32>
    %cst_20 = arith.constant 1.000000e+00 : f32
    %81 = vector.broadcast %cst_20 : f32 to vector<2x48xf32>
    %82 = arith.addf %81, %80 : vector<2x48xf32>
    %83 = arith.divf %81, %82 : vector<2x48xf32>
    %84 = vector.extract_strided_slice %83 {offsets = [0, 0], sizes = [2, 16], strides = [1, 1]} : vector<2x48xf32> to vector<2x16xf32>
    %85 = vector.extract_strided_slice %83 {offsets = [0, 16], sizes = [2, 16], strides = [1, 1]} : vector<2x48xf32> to vector<2x16xf32>
    %86 = vector.extract_strided_slice %83 {offsets = [0, 32], sizes = [2, 16], strides = [1, 1]} : vector<2x48xf32> to vector<2x16xf32>
    %87 = vector.extract_strided_slice %77 {offsets = [0, 48], sizes = [2, 16], strides = [1, 1]} : vector<2x64xf32> to vector<2x16xf32>
    %88 = math.tanh %87 : vector<2x16xf32>
    %89 = arith.mulf %85, %71 : vector<2x16xf32>
    %90 = arith.mulf %84, %88 : vector<2x16xf32>
    %91 = arith.addf %89, %90 : vector<2x16xf32>
    %92 = math.tanh %91 : vector<2x16xf32>
    %93 = arith.mulf %86, %92 : vector<2x16xf32>
    %94 = vector.extract_strided_slice %9 {offsets = [8, 0], sizes = [2, 64], strides = [1, 1]} : vector<48x64xf32> to vector<2x64xf32>
    %95 = arith.truncf %93 : vector<2x16xf32> to vector<2x16xbf16>
    %cst_21 = arith.constant dense<0.000000e+00> : vector<2x64xf32>
    %96 = tpu.matmul %95, %11, %cst_21 {dimension_numbers = #tpu.dot_dimension_numbers<[1], [0], [0], [1], [0, 0, 1, 1], [], []>} : vector<2x16xbf16>, vector<16x64xbf16>, vector<2x64xf32> -> vector<2x64xf32>
    %97 = arith.addf %94, %96 : vector<2x64xf32>
    %98 = vector.extract_strided_slice %97 {offsets = [0, 0], sizes = [2, 48], strides = [1, 1]} : vector<2x64xf32> to vector<2x48xf32>
    %99 = arith.negf %98 : vector<2x48xf32>
    %100 = math.exp %99 : vector<2x48xf32>
    %cst_22 = arith.constant 1.000000e+00 : f32
    %101 = vector.broadcast %cst_22 : f32 to vector<2x48xf32>
    %102 = arith.addf %101, %100 : vector<2x48xf32>
    %103 = arith.divf %101, %102 : vector<2x48xf32>
    %104 = vector.extract_strided_slice %103 {offsets = [0, 0], sizes = [2, 16], strides = [1, 1]} : vector<2x48xf32> to vector<2x16xf32>
    %105 = vector.extract_strided_slice %103 {offsets = [0, 16], sizes = [2, 16], strides = [1, 1]} : vector<2x48xf32> to vector<2x16xf32>
    %106 = vector.extract_strided_slice %103 {offsets = [0, 32], sizes = [2, 16], strides = [1, 1]} : vector<2x48xf32> to vector<2x16xf32>
    %107 = vector.extract_strided_slice %97 {offsets = [0, 48], sizes = [2, 16], strides = [1, 1]} : vector<2x64xf32> to vector<2x16xf32>
    %108 = math.tanh %107 : vector<2x16xf32>
    %109 = arith.mulf %105, %91 : vector<2x16xf32>
    %110 = arith.mulf %104, %108 : vector<2x16xf32>
    %111 = arith.addf %109, %110 : vector<2x16xf32>
    %112 = math.tanh %111 : vector<2x16xf32>
    %113 = arith.mulf %106, %112 : vector<2x16xf32>
    %114 = vector.extract_strided_slice %9 {offsets = [10, 0], sizes = [2, 64], strides = [1, 1]} : vector<48x64xf32> to vector<2x64xf32>
    %115 = arith.truncf %113 : vector<2x16xf32> to vector<2x16xbf16>
    %cst_23 = arith.constant dense<0.000000e+00> : vector<2x64xf32>
    %116 = tpu.matmul %115, %11, %cst_23 {dimension_numbers = #tpu.dot_dimension_numbers<[1], [0], [0], [1], [0, 0, 1, 1], [], []>} : vector<2x16xbf16>, vector<16x64xbf16>, vector<2x64xf32> -> vector<2x64xf32>
    %117 = arith.addf %114, %116 : vector<2x64xf32>
    %118 = vector.extract_strided_slice %117 {offsets = [0, 0], sizes = [2, 48], strides = [1, 1]} : vector<2x64xf32> to vector<2x48xf32>
    %119 = arith.negf %118 : vector<2x48xf32>
    %120 = math.exp %119 : vector<2x48xf32>
    %cst_24 = arith.constant 1.000000e+00 : f32
    %121 = vector.broadcast %cst_24 : f32 to vector<2x48xf32>
    %122 = arith.addf %121, %120 : vector<2x48xf32>
    %123 = arith.divf %121, %122 : vector<2x48xf32>
    %124 = vector.extract_strided_slice %123 {offsets = [0, 0], sizes = [2, 16], strides = [1, 1]} : vector<2x48xf32> to vector<2x16xf32>
    %125 = vector.extract_strided_slice %123 {offsets = [0, 16], sizes = [2, 16], strides = [1, 1]} : vector<2x48xf32> to vector<2x16xf32>
    %126 = vector.extract_strided_slice %123 {offsets = [0, 32], sizes = [2, 16], strides = [1, 1]} : vector<2x48xf32> to vector<2x16xf32>
    %127 = vector.extract_strided_slice %117 {offsets = [0, 48], sizes = [2, 16], strides = [1, 1]} : vector<2x64xf32> to vector<2x16xf32>
    %128 = math.tanh %127 : vector<2x16xf32>
    %129 = arith.mulf %125, %111 : vector<2x16xf32>
    %130 = arith.mulf %124, %128 : vector<2x16xf32>
    %131 = arith.addf %129, %130 : vector<2x16xf32>
    %132 = math.tanh %131 : vector<2x16xf32>
    %133 = arith.mulf %126, %132 : vector<2x16xf32>
    %134 = vector.extract_strided_slice %9 {offsets = [12, 0], sizes = [2, 64], strides = [1, 1]} : vector<48x64xf32> to vector<2x64xf32>
    %135 = arith.truncf %133 : vector<2x16xf32> to vector<2x16xbf16>
    %cst_25 = arith.constant dense<0.000000e+00> : vector<2x64xf32>
    %136 = tpu.matmul %135, %11, %cst_25 {dimension_numbers = #tpu.dot_dimension_numbers<[1], [0], [0], [1], [0, 0, 1, 1], [], []>} : vector<2x16xbf16>, vector<16x64xbf16>, vector<2x64xf32> -> vector<2x64xf32>
    %137 = arith.addf %134, %136 : vector<2x64xf32>
    %138 = vector.extract_strided_slice %137 {offsets = [0, 0], sizes = [2, 48], strides = [1, 1]} : vector<2x64xf32> to vector<2x48xf32>
    %139 = arith.negf %138 : vector<2x48xf32>
    %140 = math.exp %139 : vector<2x48xf32>
    %cst_26 = arith.constant 1.000000e+00 : f32
    %141 = vector.broadcast %cst_26 : f32 to vector<2x48xf32>
    %142 = arith.addf %141, %140 : vector<2x48xf32>
    %143 = arith.divf %141, %142 : vector<2x48xf32>
    %144 = vector.extract_strided_slice %143 {offsets = [0, 0], sizes = [2, 16], strides = [1, 1]} : vector<2x48xf32> to vector<2x16xf32>
    %145 = vector.extract_strided_slice %143 {offsets = [0, 16], sizes = [2, 16], strides = [1, 1]} : vector<2x48xf32> to vector<2x16xf32>
    %146 = vector.extract_strided_slice %143 {offsets = [0, 32], sizes = [2, 16], strides = [1, 1]} : vector<2x48xf32> to vector<2x16xf32>
    %147 = vector.extract_strided_slice %137 {offsets = [0, 48], sizes = [2, 16], strides = [1, 1]} : vector<2x64xf32> to vector<2x16xf32>
    %148 = math.tanh %147 : vector<2x16xf32>
    %149 = arith.mulf %145, %131 : vector<2x16xf32>
    %150 = arith.mulf %144, %148 : vector<2x16xf32>
    %151 = arith.addf %149, %150 : vector<2x16xf32>
    %152 = math.tanh %151 : vector<2x16xf32>
    %153 = arith.mulf %146, %152 : vector<2x16xf32>
    %154 = vector.extract_strided_slice %9 {offsets = [14, 0], sizes = [2, 64], strides = [1, 1]} : vector<48x64xf32> to vector<2x64xf32>
    %155 = arith.truncf %153 : vector<2x16xf32> to vector<2x16xbf16>
    %cst_27 = arith.constant dense<0.000000e+00> : vector<2x64xf32>
    %156 = tpu.matmul %155, %11, %cst_27 {dimension_numbers = #tpu.dot_dimension_numbers<[1], [0], [0], [1], [0, 0, 1, 1], [], []>} : vector<2x16xbf16>, vector<16x64xbf16>, vector<2x64xf32> -> vector<2x64xf32>
    %157 = arith.addf %154, %156 : vector<2x64xf32>
    %158 = vector.extract_strided_slice %157 {offsets = [0, 0], sizes = [2, 48], strides = [1, 1]} : vector<2x64xf32> to vector<2x48xf32>
    %159 = arith.negf %158 : vector<2x48xf32>
    %160 = math.exp %159 : vector<2x48xf32>
    %cst_28 = arith.constant 1.000000e+00 : f32
    %161 = vector.broadcast %cst_28 : f32 to vector<2x48xf32>
    %162 = arith.addf %161, %160 : vector<2x48xf32>
    %163 = arith.divf %161, %162 : vector<2x48xf32>
    %164 = vector.extract_strided_slice %163 {offsets = [0, 0], sizes = [2, 16], strides = [1, 1]} : vector<2x48xf32> to vector<2x16xf32>
    %165 = vector.extract_strided_slice %163 {offsets = [0, 16], sizes = [2, 16], strides = [1, 1]} : vector<2x48xf32> to vector<2x16xf32>
    %166 = vector.extract_strided_slice %163 {offsets = [0, 32], sizes = [2, 16], strides = [1, 1]} : vector<2x48xf32> to vector<2x16xf32>
    %167 = vector.extract_strided_slice %157 {offsets = [0, 48], sizes = [2, 16], strides = [1, 1]} : vector<2x64xf32> to vector<2x16xf32>
    %168 = math.tanh %167 : vector<2x16xf32>
    %169 = arith.mulf %165, %151 : vector<2x16xf32>
    %170 = arith.mulf %164, %168 : vector<2x16xf32>
    %171 = arith.addf %169, %170 : vector<2x16xf32>
    %172 = math.tanh %171 : vector<2x16xf32>
    %173 = arith.mulf %166, %172 : vector<2x16xf32>
    %174 = vector.extract_strided_slice %9 {offsets = [16, 0], sizes = [2, 64], strides = [1, 1]} : vector<48x64xf32> to vector<2x64xf32>
    %175 = arith.truncf %173 : vector<2x16xf32> to vector<2x16xbf16>
    %cst_29 = arith.constant dense<0.000000e+00> : vector<2x64xf32>
    %176 = tpu.matmul %175, %11, %cst_29 {dimension_numbers = #tpu.dot_dimension_numbers<[1], [0], [0], [1], [0, 0, 1, 1], [], []>} : vector<2x16xbf16>, vector<16x64xbf16>, vector<2x64xf32> -> vector<2x64xf32>
    %177 = arith.addf %174, %176 : vector<2x64xf32>
    %178 = vector.extract_strided_slice %177 {offsets = [0, 0], sizes = [2, 48], strides = [1, 1]} : vector<2x64xf32> to vector<2x48xf32>
    %179 = arith.negf %178 : vector<2x48xf32>
    %180 = math.exp %179 : vector<2x48xf32>
    %cst_30 = arith.constant 1.000000e+00 : f32
    %181 = vector.broadcast %cst_30 : f32 to vector<2x48xf32>
    %182 = arith.addf %181, %180 : vector<2x48xf32>
    %183 = arith.divf %181, %182 : vector<2x48xf32>
    %184 = vector.extract_strided_slice %183 {offsets = [0, 0], sizes = [2, 16], strides = [1, 1]} : vector<2x48xf32> to vector<2x16xf32>
    %185 = vector.extract_strided_slice %183 {offsets = [0, 16], sizes = [2, 16], strides = [1, 1]} : vector<2x48xf32> to vector<2x16xf32>
    %186 = vector.extract_strided_slice %183 {offsets = [0, 32], sizes = [2, 16], strides = [1, 1]} : vector<2x48xf32> to vector<2x16xf32>
    %187 = vector.extract_strided_slice %177 {offsets = [0, 48], sizes = [2, 16], strides = [1, 1]} : vector<2x64xf32> to vector<2x16xf32>
    %188 = math.tanh %187 : vector<2x16xf32>
    %189 = arith.mulf %185, %171 : vector<2x16xf32>
    %190 = arith.mulf %184, %188 : vector<2x16xf32>
    %191 = arith.addf %189, %190 : vector<2x16xf32>
    %192 = math.tanh %191 : vector<2x16xf32>
    %193 = arith.mulf %186, %192 : vector<2x16xf32>
    %194 = vector.extract_strided_slice %9 {offsets = [18, 0], sizes = [2, 64], strides = [1, 1]} : vector<48x64xf32> to vector<2x64xf32>
    %195 = arith.truncf %193 : vector<2x16xf32> to vector<2x16xbf16>
    %cst_31 = arith.constant dense<0.000000e+00> : vector<2x64xf32>
    %196 = tpu.matmul %195, %11, %cst_31 {dimension_numbers = #tpu.dot_dimension_numbers<[1], [0], [0], [1], [0, 0, 1, 1], [], []>} : vector<2x16xbf16>, vector<16x64xbf16>, vector<2x64xf32> -> vector<2x64xf32>
    %197 = arith.addf %194, %196 : vector<2x64xf32>
    %198 = vector.extract_strided_slice %197 {offsets = [0, 0], sizes = [2, 48], strides = [1, 1]} : vector<2x64xf32> to vector<2x48xf32>
    %199 = arith.negf %198 : vector<2x48xf32>
    %200 = math.exp %199 : vector<2x48xf32>
    %cst_32 = arith.constant 1.000000e+00 : f32
    %201 = vector.broadcast %cst_32 : f32 to vector<2x48xf32>
    %202 = arith.addf %201, %200 : vector<2x48xf32>
    %203 = arith.divf %201, %202 : vector<2x48xf32>
    %204 = vector.extract_strided_slice %203 {offsets = [0, 0], sizes = [2, 16], strides = [1, 1]} : vector<2x48xf32> to vector<2x16xf32>
    %205 = vector.extract_strided_slice %203 {offsets = [0, 16], sizes = [2, 16], strides = [1, 1]} : vector<2x48xf32> to vector<2x16xf32>
    %206 = vector.extract_strided_slice %203 {offsets = [0, 32], sizes = [2, 16], strides = [1, 1]} : vector<2x48xf32> to vector<2x16xf32>
    %207 = vector.extract_strided_slice %197 {offsets = [0, 48], sizes = [2, 16], strides = [1, 1]} : vector<2x64xf32> to vector<2x16xf32>
    %208 = math.tanh %207 : vector<2x16xf32>
    %209 = arith.mulf %205, %191 : vector<2x16xf32>
    %210 = arith.mulf %204, %208 : vector<2x16xf32>
    %211 = arith.addf %209, %210 : vector<2x16xf32>
    %212 = math.tanh %211 : vector<2x16xf32>
    %213 = arith.mulf %206, %212 : vector<2x16xf32>
    %214 = vector.extract_strided_slice %9 {offsets = [20, 0], sizes = [2, 64], strides = [1, 1]} : vector<48x64xf32> to vector<2x64xf32>
    %215 = arith.truncf %213 : vector<2x16xf32> to vector<2x16xbf16>
    %cst_33 = arith.constant dense<0.000000e+00> : vector<2x64xf32>
    %216 = tpu.matmul %215, %11, %cst_33 {dimension_numbers = #tpu.dot_dimension_numbers<[1], [0], [0], [1], [0, 0, 1, 1], [], []>} : vector<2x16xbf16>, vector<16x64xbf16>, vector<2x64xf32> -> vector<2x64xf32>
    %217 = arith.addf %214, %216 : vector<2x64xf32>
    %218 = vector.extract_strided_slice %217 {offsets = [0, 0], sizes = [2, 48], strides = [1, 1]} : vector<2x64xf32> to vector<2x48xf32>
    %219 = arith.negf %218 : vector<2x48xf32>
    %220 = math.exp %219 : vector<2x48xf32>
    %cst_34 = arith.constant 1.000000e+00 : f32
    %221 = vector.broadcast %cst_34 : f32 to vector<2x48xf32>
    %222 = arith.addf %221, %220 : vector<2x48xf32>
    %223 = arith.divf %221, %222 : vector<2x48xf32>
    %224 = vector.extract_strided_slice %223 {offsets = [0, 0], sizes = [2, 16], strides = [1, 1]} : vector<2x48xf32> to vector<2x16xf32>
    %225 = vector.extract_strided_slice %223 {offsets = [0, 16], sizes = [2, 16], strides = [1, 1]} : vector<2x48xf32> to vector<2x16xf32>
    %226 = vector.extract_strided_slice %223 {offsets = [0, 32], sizes = [2, 16], strides = [1, 1]} : vector<2x48xf32> to vector<2x16xf32>
    %227 = vector.extract_strided_slice %217 {offsets = [0, 48], sizes = [2, 16], strides = [1, 1]} : vector<2x64xf32> to vector<2x16xf32>
    %228 = math.tanh %227 : vector<2x16xf32>
    %229 = arith.mulf %225, %211 : vector<2x16xf32>
    %230 = arith.mulf %224, %228 : vector<2x16xf32>
    %231 = arith.addf %229, %230 : vector<2x16xf32>
    %232 = math.tanh %231 : vector<2x16xf32>
    %233 = arith.mulf %226, %232 : vector<2x16xf32>
    %234 = vector.extract_strided_slice %9 {offsets = [22, 0], sizes = [2, 64], strides = [1, 1]} : vector<48x64xf32> to vector<2x64xf32>
    %235 = arith.truncf %233 : vector<2x16xf32> to vector<2x16xbf16>
    %cst_35 = arith.constant dense<0.000000e+00> : vector<2x64xf32>
    %236 = tpu.matmul %235, %11, %cst_35 {dimension_numbers = #tpu.dot_dimension_numbers<[1], [0], [0], [1], [0, 0, 1, 1], [], []>} : vector<2x16xbf16>, vector<16x64xbf16>, vector<2x64xf32> -> vector<2x64xf32>
    %237 = arith.addf %234, %236 : vector<2x64xf32>
    %238 = vector.extract_strided_slice %237 {offsets = [0, 0], sizes = [2, 48], strides = [1, 1]} : vector<2x64xf32> to vector<2x48xf32>
    %239 = arith.negf %238 : vector<2x48xf32>
    %240 = math.exp %239 : vector<2x48xf32>
    %cst_36 = arith.constant 1.000000e+00 : f32
    %241 = vector.broadcast %cst_36 : f32 to vector<2x48xf32>
    %242 = arith.addf %241, %240 : vector<2x48xf32>
    %243 = arith.divf %241, %242 : vector<2x48xf32>
    %244 = vector.extract_strided_slice %243 {offsets = [0, 0], sizes = [2, 16], strides = [1, 1]} : vector<2x48xf32> to vector<2x16xf32>
    %245 = vector.extract_strided_slice %243 {offsets = [0, 16], sizes = [2, 16], strides = [1, 1]} : vector<2x48xf32> to vector<2x16xf32>
    %246 = vector.extract_strided_slice %243 {offsets = [0, 32], sizes = [2, 16], strides = [1, 1]} : vector<2x48xf32> to vector<2x16xf32>
    %247 = vector.extract_strided_slice %237 {offsets = [0, 48], sizes = [2, 16], strides = [1, 1]} : vector<2x64xf32> to vector<2x16xf32>
    %248 = math.tanh %247 : vector<2x16xf32>
    %249 = arith.mulf %245, %231 : vector<2x16xf32>
    %250 = arith.mulf %244, %248 : vector<2x16xf32>
    %251 = arith.addf %249, %250 : vector<2x16xf32>
    %252 = math.tanh %251 : vector<2x16xf32>
    %253 = arith.mulf %246, %252 : vector<2x16xf32>
    %254 = vector.extract_strided_slice %9 {offsets = [24, 0], sizes = [2, 64], strides = [1, 1]} : vector<48x64xf32> to vector<2x64xf32>
    %255 = arith.truncf %253 : vector<2x16xf32> to vector<2x16xbf16>
    %cst_37 = arith.constant dense<0.000000e+00> : vector<2x64xf32>
    %256 = tpu.matmul %255, %11, %cst_37 {dimension_numbers = #tpu.dot_dimension_numbers<[1], [0], [0], [1], [0, 0, 1, 1], [], []>} : vector<2x16xbf16>, vector<16x64xbf16>, vector<2x64xf32> -> vector<2x64xf32>
    %257 = arith.addf %254, %256 : vector<2x64xf32>
    %258 = vector.extract_strided_slice %257 {offsets = [0, 0], sizes = [2, 48], strides = [1, 1]} : vector<2x64xf32> to vector<2x48xf32>
    %259 = arith.negf %258 : vector<2x48xf32>
    %260 = math.exp %259 : vector<2x48xf32>
    %cst_38 = arith.constant 1.000000e+00 : f32
    %261 = vector.broadcast %cst_38 : f32 to vector<2x48xf32>
    %262 = arith.addf %261, %260 : vector<2x48xf32>
    %263 = arith.divf %261, %262 : vector<2x48xf32>
    %264 = vector.extract_strided_slice %263 {offsets = [0, 0], sizes = [2, 16], strides = [1, 1]} : vector<2x48xf32> to vector<2x16xf32>
    %265 = vector.extract_strided_slice %263 {offsets = [0, 16], sizes = [2, 16], strides = [1, 1]} : vector<2x48xf32> to vector<2x16xf32>
    %266 = vector.extract_strided_slice %263 {offsets = [0, 32], sizes = [2, 16], strides = [1, 1]} : vector<2x48xf32> to vector<2x16xf32>
    %267 = vector.extract_strided_slice %257 {offsets = [0, 48], sizes = [2, 16], strides = [1, 1]} : vector<2x64xf32> to vector<2x16xf32>
    %268 = math.tanh %267 : vector<2x16xf32>
    %269 = arith.mulf %265, %251 : vector<2x16xf32>
    %270 = arith.mulf %264, %268 : vector<2x16xf32>
    %271 = arith.addf %269, %270 : vector<2x16xf32>
    %272 = math.tanh %271 : vector<2x16xf32>
    %273 = arith.mulf %266, %272 : vector<2x16xf32>
    %274 = vector.extract_strided_slice %9 {offsets = [26, 0], sizes = [2, 64], strides = [1, 1]} : vector<48x64xf32> to vector<2x64xf32>
    %275 = arith.truncf %273 : vector<2x16xf32> to vector<2x16xbf16>
    %cst_39 = arith.constant dense<0.000000e+00> : vector<2x64xf32>
    %276 = tpu.matmul %275, %11, %cst_39 {dimension_numbers = #tpu.dot_dimension_numbers<[1], [0], [0], [1], [0, 0, 1, 1], [], []>} : vector<2x16xbf16>, vector<16x64xbf16>, vector<2x64xf32> -> vector<2x64xf32>
    %277 = arith.addf %274, %276 : vector<2x64xf32>
    %278 = vector.extract_strided_slice %277 {offsets = [0, 0], sizes = [2, 48], strides = [1, 1]} : vector<2x64xf32> to vector<2x48xf32>
    %279 = arith.negf %278 : vector<2x48xf32>
    %280 = math.exp %279 : vector<2x48xf32>
    %cst_40 = arith.constant 1.000000e+00 : f32
    %281 = vector.broadcast %cst_40 : f32 to vector<2x48xf32>
    %282 = arith.addf %281, %280 : vector<2x48xf32>
    %283 = arith.divf %281, %282 : vector<2x48xf32>
    %284 = vector.extract_strided_slice %283 {offsets = [0, 0], sizes = [2, 16], strides = [1, 1]} : vector<2x48xf32> to vector<2x16xf32>
    %285 = vector.extract_strided_slice %283 {offsets = [0, 16], sizes = [2, 16], strides = [1, 1]} : vector<2x48xf32> to vector<2x16xf32>
    %286 = vector.extract_strided_slice %283 {offsets = [0, 32], sizes = [2, 16], strides = [1, 1]} : vector<2x48xf32> to vector<2x16xf32>
    %287 = vector.extract_strided_slice %277 {offsets = [0, 48], sizes = [2, 16], strides = [1, 1]} : vector<2x64xf32> to vector<2x16xf32>
    %288 = math.tanh %287 : vector<2x16xf32>
    %289 = arith.mulf %285, %271 : vector<2x16xf32>
    %290 = arith.mulf %284, %288 : vector<2x16xf32>
    %291 = arith.addf %289, %290 : vector<2x16xf32>
    %292 = math.tanh %291 : vector<2x16xf32>
    %293 = arith.mulf %286, %292 : vector<2x16xf32>
    %294 = vector.extract_strided_slice %9 {offsets = [28, 0], sizes = [2, 64], strides = [1, 1]} : vector<48x64xf32> to vector<2x64xf32>
    %295 = arith.truncf %293 : vector<2x16xf32> to vector<2x16xbf16>
    %cst_41 = arith.constant dense<0.000000e+00> : vector<2x64xf32>
    %296 = tpu.matmul %295, %11, %cst_41 {dimension_numbers = #tpu.dot_dimension_numbers<[1], [0], [0], [1], [0, 0, 1, 1], [], []>} : vector<2x16xbf16>, vector<16x64xbf16>, vector<2x64xf32> -> vector<2x64xf32>
    %297 = arith.addf %294, %296 : vector<2x64xf32>
    %298 = vector.extract_strided_slice %297 {offsets = [0, 0], sizes = [2, 48], strides = [1, 1]} : vector<2x64xf32> to vector<2x48xf32>
    %299 = arith.negf %298 : vector<2x48xf32>
    %300 = math.exp %299 : vector<2x48xf32>
    %cst_42 = arith.constant 1.000000e+00 : f32
    %301 = vector.broadcast %cst_42 : f32 to vector<2x48xf32>
    %302 = arith.addf %301, %300 : vector<2x48xf32>
    %303 = arith.divf %301, %302 : vector<2x48xf32>
    %304 = vector.extract_strided_slice %303 {offsets = [0, 0], sizes = [2, 16], strides = [1, 1]} : vector<2x48xf32> to vector<2x16xf32>
    %305 = vector.extract_strided_slice %303 {offsets = [0, 16], sizes = [2, 16], strides = [1, 1]} : vector<2x48xf32> to vector<2x16xf32>
    %306 = vector.extract_strided_slice %303 {offsets = [0, 32], sizes = [2, 16], strides = [1, 1]} : vector<2x48xf32> to vector<2x16xf32>
    %307 = vector.extract_strided_slice %297 {offsets = [0, 48], sizes = [2, 16], strides = [1, 1]} : vector<2x64xf32> to vector<2x16xf32>
    %308 = math.tanh %307 : vector<2x16xf32>
    %309 = arith.mulf %305, %291 : vector<2x16xf32>
    %310 = arith.mulf %304, %308 : vector<2x16xf32>
    %311 = arith.addf %309, %310 : vector<2x16xf32>
    %312 = math.tanh %311 : vector<2x16xf32>
    %313 = arith.mulf %306, %312 : vector<2x16xf32>
    %314 = vector.extract_strided_slice %9 {offsets = [30, 0], sizes = [2, 64], strides = [1, 1]} : vector<48x64xf32> to vector<2x64xf32>
    %315 = arith.truncf %313 : vector<2x16xf32> to vector<2x16xbf16>
    %cst_43 = arith.constant dense<0.000000e+00> : vector<2x64xf32>
    %316 = tpu.matmul %315, %11, %cst_43 {dimension_numbers = #tpu.dot_dimension_numbers<[1], [0], [0], [1], [0, 0, 1, 1], [], []>} : vector<2x16xbf16>, vector<16x64xbf16>, vector<2x64xf32> -> vector<2x64xf32>
    %317 = arith.addf %314, %316 : vector<2x64xf32>
    %318 = vector.extract_strided_slice %317 {offsets = [0, 0], sizes = [2, 48], strides = [1, 1]} : vector<2x64xf32> to vector<2x48xf32>
    %319 = arith.negf %318 : vector<2x48xf32>
    %320 = math.exp %319 : vector<2x48xf32>
    %cst_44 = arith.constant 1.000000e+00 : f32
    %321 = vector.broadcast %cst_44 : f32 to vector<2x48xf32>
    %322 = arith.addf %321, %320 : vector<2x48xf32>
    %323 = arith.divf %321, %322 : vector<2x48xf32>
    %324 = vector.extract_strided_slice %323 {offsets = [0, 0], sizes = [2, 16], strides = [1, 1]} : vector<2x48xf32> to vector<2x16xf32>
    %325 = vector.extract_strided_slice %323 {offsets = [0, 16], sizes = [2, 16], strides = [1, 1]} : vector<2x48xf32> to vector<2x16xf32>
    %326 = vector.extract_strided_slice %323 {offsets = [0, 32], sizes = [2, 16], strides = [1, 1]} : vector<2x48xf32> to vector<2x16xf32>
    %327 = vector.extract_strided_slice %317 {offsets = [0, 48], sizes = [2, 16], strides = [1, 1]} : vector<2x64xf32> to vector<2x16xf32>
    %328 = math.tanh %327 : vector<2x16xf32>
    %329 = arith.mulf %325, %311 : vector<2x16xf32>
    %330 = arith.mulf %324, %328 : vector<2x16xf32>
    %331 = arith.addf %329, %330 : vector<2x16xf32>
    %332 = math.tanh %331 : vector<2x16xf32>
    %333 = arith.mulf %326, %332 : vector<2x16xf32>
    %334 = vector.extract_strided_slice %9 {offsets = [32, 0], sizes = [2, 64], strides = [1, 1]} : vector<48x64xf32> to vector<2x64xf32>
    %335 = arith.truncf %333 : vector<2x16xf32> to vector<2x16xbf16>
    %cst_45 = arith.constant dense<0.000000e+00> : vector<2x64xf32>
    %336 = tpu.matmul %335, %11, %cst_45 {dimension_numbers = #tpu.dot_dimension_numbers<[1], [0], [0], [1], [0, 0, 1, 1], [], []>} : vector<2x16xbf16>, vector<16x64xbf16>, vector<2x64xf32> -> vector<2x64xf32>
    %337 = arith.addf %334, %336 : vector<2x64xf32>
    %338 = vector.extract_strided_slice %337 {offsets = [0, 0], sizes = [2, 48], strides = [1, 1]} : vector<2x64xf32> to vector<2x48xf32>
    %339 = arith.negf %338 : vector<2x48xf32>
    %340 = math.exp %339 : vector<2x48xf32>
    %cst_46 = arith.constant 1.000000e+00 : f32
    %341 = vector.broadcast %cst_46 : f32 to vector<2x48xf32>
    %342 = arith.addf %341, %340 : vector<2x48xf32>
    %343 = arith.divf %341, %342 : vector<2x48xf32>
    %344 = vector.extract_strided_slice %343 {offsets = [0, 0], sizes = [2, 16], strides = [1, 1]} : vector<2x48xf32> to vector<2x16xf32>
    %345 = vector.extract_strided_slice %343 {offsets = [0, 16], sizes = [2, 16], strides = [1, 1]} : vector<2x48xf32> to vector<2x16xf32>
    %346 = vector.extract_strided_slice %343 {offsets = [0, 32], sizes = [2, 16], strides = [1, 1]} : vector<2x48xf32> to vector<2x16xf32>
    %347 = vector.extract_strided_slice %337 {offsets = [0, 48], sizes = [2, 16], strides = [1, 1]} : vector<2x64xf32> to vector<2x16xf32>
    %348 = math.tanh %347 : vector<2x16xf32>
    %349 = arith.mulf %345, %331 : vector<2x16xf32>
    %350 = arith.mulf %344, %348 : vector<2x16xf32>
    %351 = arith.addf %349, %350 : vector<2x16xf32>
    %352 = math.tanh %351 : vector<2x16xf32>
    %353 = arith.mulf %346, %352 : vector<2x16xf32>
    %354 = vector.extract_strided_slice %9 {offsets = [34, 0], sizes = [2, 64], strides = [1, 1]} : vector<48x64xf32> to vector<2x64xf32>
    %355 = arith.truncf %353 : vector<2x16xf32> to vector<2x16xbf16>
    %cst_47 = arith.constant dense<0.000000e+00> : vector<2x64xf32>
    %356 = tpu.matmul %355, %11, %cst_47 {dimension_numbers = #tpu.dot_dimension_numbers<[1], [0], [0], [1], [0, 0, 1, 1], [], []>} : vector<2x16xbf16>, vector<16x64xbf16>, vector<2x64xf32> -> vector<2x64xf32>
    %357 = arith.addf %354, %356 : vector<2x64xf32>
    %358 = vector.extract_strided_slice %357 {offsets = [0, 0], sizes = [2, 48], strides = [1, 1]} : vector<2x64xf32> to vector<2x48xf32>
    %359 = arith.negf %358 : vector<2x48xf32>
    %360 = math.exp %359 : vector<2x48xf32>
    %cst_48 = arith.constant 1.000000e+00 : f32
    %361 = vector.broadcast %cst_48 : f32 to vector<2x48xf32>
    %362 = arith.addf %361, %360 : vector<2x48xf32>
    %363 = arith.divf %361, %362 : vector<2x48xf32>
    %364 = vector.extract_strided_slice %363 {offsets = [0, 0], sizes = [2, 16], strides = [1, 1]} : vector<2x48xf32> to vector<2x16xf32>
    %365 = vector.extract_strided_slice %363 {offsets = [0, 16], sizes = [2, 16], strides = [1, 1]} : vector<2x48xf32> to vector<2x16xf32>
    %366 = vector.extract_strided_slice %363 {offsets = [0, 32], sizes = [2, 16], strides = [1, 1]} : vector<2x48xf32> to vector<2x16xf32>
    %367 = vector.extract_strided_slice %357 {offsets = [0, 48], sizes = [2, 16], strides = [1, 1]} : vector<2x64xf32> to vector<2x16xf32>
    %368 = math.tanh %367 : vector<2x16xf32>
    %369 = arith.mulf %365, %351 : vector<2x16xf32>
    %370 = arith.mulf %364, %368 : vector<2x16xf32>
    %371 = arith.addf %369, %370 : vector<2x16xf32>
    %372 = math.tanh %371 : vector<2x16xf32>
    %373 = arith.mulf %366, %372 : vector<2x16xf32>
    %374 = vector.extract_strided_slice %9 {offsets = [36, 0], sizes = [2, 64], strides = [1, 1]} : vector<48x64xf32> to vector<2x64xf32>
    %375 = arith.truncf %373 : vector<2x16xf32> to vector<2x16xbf16>
    %cst_49 = arith.constant dense<0.000000e+00> : vector<2x64xf32>
    %376 = tpu.matmul %375, %11, %cst_49 {dimension_numbers = #tpu.dot_dimension_numbers<[1], [0], [0], [1], [0, 0, 1, 1], [], []>} : vector<2x16xbf16>, vector<16x64xbf16>, vector<2x64xf32> -> vector<2x64xf32>
    %377 = arith.addf %374, %376 : vector<2x64xf32>
    %378 = vector.extract_strided_slice %377 {offsets = [0, 0], sizes = [2, 48], strides = [1, 1]} : vector<2x64xf32> to vector<2x48xf32>
    %379 = arith.negf %378 : vector<2x48xf32>
    %380 = math.exp %379 : vector<2x48xf32>
    %cst_50 = arith.constant 1.000000e+00 : f32
    %381 = vector.broadcast %cst_50 : f32 to vector<2x48xf32>
    %382 = arith.addf %381, %380 : vector<2x48xf32>
    %383 = arith.divf %381, %382 : vector<2x48xf32>
    %384 = vector.extract_strided_slice %383 {offsets = [0, 0], sizes = [2, 16], strides = [1, 1]} : vector<2x48xf32> to vector<2x16xf32>
    %385 = vector.extract_strided_slice %383 {offsets = [0, 16], sizes = [2, 16], strides = [1, 1]} : vector<2x48xf32> to vector<2x16xf32>
    %386 = vector.extract_strided_slice %383 {offsets = [0, 32], sizes = [2, 16], strides = [1, 1]} : vector<2x48xf32> to vector<2x16xf32>
    %387 = vector.extract_strided_slice %377 {offsets = [0, 48], sizes = [2, 16], strides = [1, 1]} : vector<2x64xf32> to vector<2x16xf32>
    %388 = math.tanh %387 : vector<2x16xf32>
    %389 = arith.mulf %385, %371 : vector<2x16xf32>
    %390 = arith.mulf %384, %388 : vector<2x16xf32>
    %391 = arith.addf %389, %390 : vector<2x16xf32>
    %392 = math.tanh %391 : vector<2x16xf32>
    %393 = arith.mulf %386, %392 : vector<2x16xf32>
    %394 = vector.extract_strided_slice %9 {offsets = [38, 0], sizes = [2, 64], strides = [1, 1]} : vector<48x64xf32> to vector<2x64xf32>
    %395 = arith.truncf %393 : vector<2x16xf32> to vector<2x16xbf16>
    %cst_51 = arith.constant dense<0.000000e+00> : vector<2x64xf32>
    %396 = tpu.matmul %395, %11, %cst_51 {dimension_numbers = #tpu.dot_dimension_numbers<[1], [0], [0], [1], [0, 0, 1, 1], [], []>} : vector<2x16xbf16>, vector<16x64xbf16>, vector<2x64xf32> -> vector<2x64xf32>
    %397 = arith.addf %394, %396 : vector<2x64xf32>
    %398 = vector.extract_strided_slice %397 {offsets = [0, 0], sizes = [2, 48], strides = [1, 1]} : vector<2x64xf32> to vector<2x48xf32>
    %399 = arith.negf %398 : vector<2x48xf32>
    %400 = math.exp %399 : vector<2x48xf32>
    %cst_52 = arith.constant 1.000000e+00 : f32
    %401 = vector.broadcast %cst_52 : f32 to vector<2x48xf32>
    %402 = arith.addf %401, %400 : vector<2x48xf32>
    %403 = arith.divf %401, %402 : vector<2x48xf32>
    %404 = vector.extract_strided_slice %403 {offsets = [0, 0], sizes = [2, 16], strides = [1, 1]} : vector<2x48xf32> to vector<2x16xf32>
    %405 = vector.extract_strided_slice %403 {offsets = [0, 16], sizes = [2, 16], strides = [1, 1]} : vector<2x48xf32> to vector<2x16xf32>
    %406 = vector.extract_strided_slice %403 {offsets = [0, 32], sizes = [2, 16], strides = [1, 1]} : vector<2x48xf32> to vector<2x16xf32>
    %407 = vector.extract_strided_slice %397 {offsets = [0, 48], sizes = [2, 16], strides = [1, 1]} : vector<2x64xf32> to vector<2x16xf32>
    %408 = math.tanh %407 : vector<2x16xf32>
    %409 = arith.mulf %405, %391 : vector<2x16xf32>
    %410 = arith.mulf %404, %408 : vector<2x16xf32>
    %411 = arith.addf %409, %410 : vector<2x16xf32>
    %412 = math.tanh %411 : vector<2x16xf32>
    %413 = arith.mulf %406, %412 : vector<2x16xf32>
    %414 = vector.extract_strided_slice %9 {offsets = [40, 0], sizes = [2, 64], strides = [1, 1]} : vector<48x64xf32> to vector<2x64xf32>
    %415 = arith.truncf %413 : vector<2x16xf32> to vector<2x16xbf16>
    %cst_53 = arith.constant dense<0.000000e+00> : vector<2x64xf32>
    %416 = tpu.matmul %415, %11, %cst_53 {dimension_numbers = #tpu.dot_dimension_numbers<[1], [0], [0], [1], [0, 0, 1, 1], [], []>} : vector<2x16xbf16>, vector<16x64xbf16>, vector<2x64xf32> -> vector<2x64xf32>
    %417 = arith.addf %414, %416 : vector<2x64xf32>
    %418 = vector.extract_strided_slice %417 {offsets = [0, 0], sizes = [2, 48], strides = [1, 1]} : vector<2x64xf32> to vector<2x48xf32>
    %419 = arith.negf %418 : vector<2x48xf32>
    %420 = math.exp %419 : vector<2x48xf32>
    %cst_54 = arith.constant 1.000000e+00 : f32
    %421 = vector.broadcast %cst_54 : f32 to vector<2x48xf32>
    %422 = arith.addf %421, %420 : vector<2x48xf32>
    %423 = arith.divf %421, %422 : vector<2x48xf32>
    %424 = vector.extract_strided_slice %423 {offsets = [0, 0], sizes = [2, 16], strides = [1, 1]} : vector<2x48xf32> to vector<2x16xf32>
    %425 = vector.extract_strided_slice %423 {offsets = [0, 16], sizes = [2, 16], strides = [1, 1]} : vector<2x48xf32> to vector<2x16xf32>
    %426 = vector.extract_strided_slice %423 {offsets = [0, 32], sizes = [2, 16], strides = [1, 1]} : vector<2x48xf32> to vector<2x16xf32>
    %427 = vector.extract_strided_slice %417 {offsets = [0, 48], sizes = [2, 16], strides = [1, 1]} : vector<2x64xf32> to vector<2x16xf32>
    %428 = math.tanh %427 : vector<2x16xf32>
    %429 = arith.mulf %425, %411 : vector<2x16xf32>
    %430 = arith.mulf %424, %428 : vector<2x16xf32>
    %431 = arith.addf %429, %430 : vector<2x16xf32>
    %432 = math.tanh %431 : vector<2x16xf32>
    %433 = arith.mulf %426, %432 : vector<2x16xf32>
    %434 = vector.extract_strided_slice %9 {offsets = [42, 0], sizes = [2, 64], strides = [1, 1]} : vector<48x64xf32> to vector<2x64xf32>
    %435 = arith.truncf %433 : vector<2x16xf32> to vector<2x16xbf16>
    %cst_55 = arith.constant dense<0.000000e+00> : vector<2x64xf32>
    %436 = tpu.matmul %435, %11, %cst_55 {dimension_numbers = #tpu.dot_dimension_numbers<[1], [0], [0], [1], [0, 0, 1, 1], [], []>} : vector<2x16xbf16>, vector<16x64xbf16>, vector<2x64xf32> -> vector<2x64xf32>
    %437 = arith.addf %434, %436 : vector<2x64xf32>
    %438 = vector.extract_strided_slice %437 {offsets = [0, 0], sizes = [2, 48], strides = [1, 1]} : vector<2x64xf32> to vector<2x48xf32>
    %439 = arith.negf %438 : vector<2x48xf32>
    %440 = math.exp %439 : vector<2x48xf32>
    %cst_56 = arith.constant 1.000000e+00 : f32
    %441 = vector.broadcast %cst_56 : f32 to vector<2x48xf32>
    %442 = arith.addf %441, %440 : vector<2x48xf32>
    %443 = arith.divf %441, %442 : vector<2x48xf32>
    %444 = vector.extract_strided_slice %443 {offsets = [0, 0], sizes = [2, 16], strides = [1, 1]} : vector<2x48xf32> to vector<2x16xf32>
    %445 = vector.extract_strided_slice %443 {offsets = [0, 16], sizes = [2, 16], strides = [1, 1]} : vector<2x48xf32> to vector<2x16xf32>
    %446 = vector.extract_strided_slice %443 {offsets = [0, 32], sizes = [2, 16], strides = [1, 1]} : vector<2x48xf32> to vector<2x16xf32>
    %447 = vector.extract_strided_slice %437 {offsets = [0, 48], sizes = [2, 16], strides = [1, 1]} : vector<2x64xf32> to vector<2x16xf32>
    %448 = math.tanh %447 : vector<2x16xf32>
    %449 = arith.mulf %445, %431 : vector<2x16xf32>
    %450 = arith.mulf %444, %448 : vector<2x16xf32>
    %451 = arith.addf %449, %450 : vector<2x16xf32>
    %452 = math.tanh %451 : vector<2x16xf32>
    %453 = arith.mulf %446, %452 : vector<2x16xf32>
    %454 = vector.extract_strided_slice %9 {offsets = [44, 0], sizes = [2, 64], strides = [1, 1]} : vector<48x64xf32> to vector<2x64xf32>
    %455 = arith.truncf %453 : vector<2x16xf32> to vector<2x16xbf16>
    %cst_57 = arith.constant dense<0.000000e+00> : vector<2x64xf32>
    %456 = tpu.matmul %455, %11, %cst_57 {dimension_numbers = #tpu.dot_dimension_numbers<[1], [0], [0], [1], [0, 0, 1, 1], [], []>} : vector<2x16xbf16>, vector<16x64xbf16>, vector<2x64xf32> -> vector<2x64xf32>
    %457 = arith.addf %454, %456 : vector<2x64xf32>
    %458 = vector.extract_strided_slice %457 {offsets = [0, 0], sizes = [2, 48], strides = [1, 1]} : vector<2x64xf32> to vector<2x48xf32>
    %459 = arith.negf %458 : vector<2x48xf32>
    %460 = math.exp %459 : vector<2x48xf32>
    %cst_58 = arith.constant 1.000000e+00 : f32
    %461 = vector.broadcast %cst_58 : f32 to vector<2x48xf32>
    %462 = arith.addf %461, %460 : vector<2x48xf32>
    %463 = arith.divf %461, %462 : vector<2x48xf32>
    %464 = vector.extract_strided_slice %463 {offsets = [0, 0], sizes = [2, 16], strides = [1, 1]} : vector<2x48xf32> to vector<2x16xf32>
    %465 = vector.extract_strided_slice %463 {offsets = [0, 16], sizes = [2, 16], strides = [1, 1]} : vector<2x48xf32> to vector<2x16xf32>
    %466 = vector.extract_strided_slice %463 {offsets = [0, 32], sizes = [2, 16], strides = [1, 1]} : vector<2x48xf32> to vector<2x16xf32>
    %467 = vector.extract_strided_slice %457 {offsets = [0, 48], sizes = [2, 16], strides = [1, 1]} : vector<2x64xf32> to vector<2x16xf32>
    %468 = math.tanh %467 : vector<2x16xf32>
    %469 = arith.mulf %465, %451 : vector<2x16xf32>
    %470 = arith.mulf %464, %468 : vector<2x16xf32>
    %471 = arith.addf %469, %470 : vector<2x16xf32>
    %472 = math.tanh %471 : vector<2x16xf32>
    %473 = arith.mulf %466, %472 : vector<2x16xf32>
    %474 = vector.extract_strided_slice %9 {offsets = [46, 0], sizes = [2, 64], strides = [1, 1]} : vector<48x64xf32> to vector<2x64xf32>
    %475 = arith.truncf %473 : vector<2x16xf32> to vector<2x16xbf16>
    %cst_59 = arith.constant dense<0.000000e+00> : vector<2x64xf32>
    %476 = tpu.matmul %475, %11, %cst_59 {dimension_numbers = #tpu.dot_dimension_numbers<[1], [0], [0], [1], [0, 0, 1, 1], [], []>} : vector<2x16xbf16>, vector<16x64xbf16>, vector<2x64xf32> -> vector<2x64xf32>
    %477 = arith.addf %474, %476 : vector<2x64xf32>
    %478 = vector.extract_strided_slice %477 {offsets = [0, 0], sizes = [2, 48], strides = [1, 1]} : vector<2x64xf32> to vector<2x48xf32>
    %479 = arith.negf %478 : vector<2x48xf32>
    %480 = math.exp %479 : vector<2x48xf32>
    %cst_60 = arith.constant 1.000000e+00 : f32
    %481 = vector.broadcast %cst_60 : f32 to vector<2x48xf32>
    %482 = arith.addf %481, %480 : vector<2x48xf32>
    %483 = arith.divf %481, %482 : vector<2x48xf32>
    %484 = vector.extract_strided_slice %483 {offsets = [0, 0], sizes = [2, 16], strides = [1, 1]} : vector<2x48xf32> to vector<2x16xf32>
    %485 = vector.extract_strided_slice %483 {offsets = [0, 16], sizes = [2, 16], strides = [1, 1]} : vector<2x48xf32> to vector<2x16xf32>
    %486 = vector.extract_strided_slice %483 {offsets = [0, 32], sizes = [2, 16], strides = [1, 1]} : vector<2x48xf32> to vector<2x16xf32>
    %487 = vector.extract_strided_slice %477 {offsets = [0, 48], sizes = [2, 16], strides = [1, 1]} : vector<2x64xf32> to vector<2x16xf32>
    %488 = math.tanh %487 : vector<2x16xf32>
    %489 = arith.mulf %485, %471 : vector<2x16xf32>
    %490 = arith.mulf %484, %488 : vector<2x16xf32>
    %491 = arith.addf %489, %490 : vector<2x16xf32>
    %492 = math.tanh %491 : vector<2x16xf32>
    %493 = arith.mulf %486, %492 : vector<2x16xf32>
    %494 = tpu.concatenate %33, %53, %73, %93, %113, %133, %153, %173, %193, %213, %233, %253, %273, %293, %313, %333 in 0 : vector<2x16xf32>, vector<2x16xf32>, vector<2x16xf32>, vector<2x16xf32>, vector<2x16xf32>, vector<2x16xf32>, vector<2x16xf32>, vector<2x16xf32>, vector<2x16xf32>, vector<2x16xf32>, vector<2x16xf32>, vector<2x16xf32>, vector<2x16xf32>, vector<2x16xf32>, vector<2x16xf32>, vector<2x16xf32> -> vector<32x16xf32>
    %495 = tpu.concatenate %353, %373, %393, %413, %433, %453, %473, %493 in 0 : vector<2x16xf32>, vector<2x16xf32>, vector<2x16xf32>, vector<2x16xf32>, vector<2x16xf32>, vector<2x16xf32>, vector<2x16xf32>, vector<2x16xf32> -> vector<16x16xf32>
    %496 = tpu.concatenate %494, %495 in 0 : vector<32x16xf32>, vector<16x16xf32> -> vector<48x16xf32>
    %c0_61 = arith.constant 0 : index
    %c0_62 = arith.constant 0 : index
    %c0_63 = arith.constant 0 : index
    %497 = vector.load %arg5[%c0_61, %c0_62, %c0_63] : memref<1x48x16xf32, #tpu.memory_space<vmem>>, vector<1x48x16xf32>
    %498 = vector.shape_cast %497 : vector<1x48x16xf32> to vector<48x16xf32>
    %499 = vector.shape_cast %496 : vector<48x16xf32> to vector<1x48x16xf32>
    tpu.vector_store %arg5[%c0_61, %c0_62, %c0_63], %499 {strides = array<i32>} : memref<1x48x16xf32, #tpu.memory_space<vmem>>, vector<1x48x16xf32>,
    return
  }
  func.func @transform_0(%arg0: i32) -> (i32, i32, i32) {
    %c0_i32 = arith.constant 0 : i32
    %c0_i32_0 = arith.constant 0 : i32
    %c0_i32_1 = arith.constant 0 : i32
    return %arg0, %c0_i32, %c0_i32_0 : i32, i32, i32
  }
  func.func @transform_1(%arg0: i32) -> (i32, i32, i32) {
    %c0_i32 = arith.constant 0 : i32
    %c0_i32_0 = arith.constant 0 : i32
    %c0_i32_1 = arith.constant 0 : i32
    return %arg0, %c0_i32, %c0_i32_0 : i32, i32, i32
  }
  func.func @transform_2(%arg0: i32) -> (i32, i32, i32) {
    %c0_i32 = arith.constant 0 : i32
    %c0_i32_0 = arith.constant 0 : i32
    %c0_i32_1 = arith.constant 0 : i32
    return %arg0, %c0_i32, %c0_i32_0 : i32, i32, i32
  }
  func.func @transform_3(%arg0: i32) -> (i32, i32, i32) {
    %c0_i32 = arith.constant 0 : i32
    %c0_i32_0 = arith.constant 0 : i32
    %c0_i32_1 = arith.constant 0 : i32
    return %arg0, %c0_i32, %c0_i32_0 : i32, i32, i32
  }
  func.func @transform_4(%arg0: i32) -> (i32, i32, i32) {
    %c0_i32 = arith.constant 0 : i32
    %c0_i32_0 = arith.constant 0 : i32
    %c0_i32_1 = arith.constant 0 : i32
    return %arg0, %c0_i32, %c0_i32_0 : i32, i32, i32
  }
}

module attributes {stable_mosaic.version = 11 : i64} {
  func.func @_bilstm_kernel(%arg0: i32, %arg1: memref<1x16x16xf32, #tpu.memory_space<vmem>>, %arg2: memref<1x16x64xbf16, #tpu.memory_space<vmem>>, %arg3: memref<1x16x64xbf16, #tpu.memory_space<vmem>>, %arg4: memref<1x1x64xf32, #tpu.memory_space<vmem>>, %arg5: memref<1x16x16xf32, #tpu.memory_space<vmem>>) attributes {dimension_semantics = [#tpu.dimension_semantics<parallel>], iteration_bounds = array<i64: 2>, scalar_prefetch = 0 : i64, scratch_operands = 0 : i64, tpu.core_type = #tpu.core_type<tc>, window_params = [{transform_indices = @transform_0, window_bounds = array<i64: 1, 16, 16>}, {transform_indices = @transform_1, window_bounds = array<i64: 1, 16, 64>}, {transform_indices = @transform_2, window_bounds = array<i64: 1, 16, 64>}, {transform_indices = @transform_3, window_bounds = array<i64: 1, 1, 64>}, {transform_indices = @transform_4, window_bounds = array<i64: 1, 16, 16>}]} {
    %c0 = arith.constant 0 : index
    %c0_0 = arith.constant 0 : index
    %c0_1 = arith.constant 0 : index
    %0 = vector.load %arg1[%c0, %c0_0, %c0_1] : memref<1x16x16xf32, #tpu.memory_space<vmem>>, vector<1x16x16xf32>
    %1 = vector.shape_cast %0 : vector<1x16x16xf32> to vector<16x16xf32>
    %2 = arith.truncf %1 : vector<16x16xf32> to vector<16x16xbf16>
    %c0_2 = arith.constant 0 : index
    %c0_3 = arith.constant 0 : index
    %c0_4 = arith.constant 0 : index
    %3 = vector.load %arg2[%c0_2, %c0_3, %c0_4] : memref<1x16x64xbf16, #tpu.memory_space<vmem>>, vector<1x16x64xbf16>
    %4 = vector.shape_cast %3 : vector<1x16x64xbf16> to vector<16x64xbf16>
    %cst = arith.constant dense<0.000000e+00> : vector<16x64xf32>
    %5 = tpu.matmul %2, %4, %cst {dimension_numbers = #tpu.dot_dimension_numbers<[1], [0], [0], [1], [0, 0, 1, 1], [], []>} : vector<16x16xbf16>, vector<16x64xbf16>, vector<16x64xf32> -> vector<16x64xf32>
    %c0_5 = arith.constant 0 : index
    %c0_6 = arith.constant 0 : index
    %c0_7 = arith.constant 0 : index
    %6 = vector.load %arg4[%c0_5, %c0_6, %c0_7] : memref<1x1x64xf32, #tpu.memory_space<vmem>>, vector<1x1x64xf32>
    %7 = vector.shape_cast %6 : vector<1x1x64xf32> to vector<1x64xf32>
    %8 = vector.broadcast %7 : vector<1x64xf32> to vector<16x64xf32>
    %9 = arith.addf %5, %8 : vector<16x64xf32>
    %c0_8 = arith.constant 0 : index
    %c0_9 = arith.constant 0 : index
    %c0_10 = arith.constant 0 : index
    %10 = vector.load %arg3[%c0_8, %c0_9, %c0_10] : memref<1x16x64xbf16, #tpu.memory_space<vmem>>, vector<1x16x64xbf16>
    %11 = vector.shape_cast %10 : vector<1x16x64xbf16> to vector<16x64xbf16>
    %cst_11 = arith.constant 0.000000e+00 : f32
    %12 = vector.broadcast %cst_11 : f32 to vector<2x16xf32>
    %cst_12 = arith.constant 0.000000e+00 : f32
    %13 = vector.broadcast %cst_12 : f32 to vector<2x16xf32>
    %14 = vector.extract_strided_slice %9 {offsets = [0, 0], sizes = [2, 64], strides = [1, 1]} : vector<16x64xf32> to vector<2x64xf32>
    %15 = arith.truncf %12 : vector<2x16xf32> to vector<2x16xbf16>
    %cst_13 = arith.constant dense<0.000000e+00> : vector<2x64xf32>
    %16 = tpu.matmul %15, %11, %cst_13 {dimension_numbers = #tpu.dot_dimension_numbers<[1], [0], [0], [1], [0, 0, 1, 1], [], []>} : vector<2x16xbf16>, vector<16x64xbf16>, vector<2x64xf32> -> vector<2x64xf32>
    %17 = arith.addf %14, %16 : vector<2x64xf32>
    %18 = vector.extract_strided_slice %17 {offsets = [0, 0], sizes = [2, 48], strides = [1, 1]} : vector<2x64xf32> to vector<2x48xf32>
    %19 = arith.negf %18 : vector<2x48xf32>
    %20 = math.exp %19 : vector<2x48xf32>
    %cst_14 = arith.constant 1.000000e+00 : f32
    %21 = vector.broadcast %cst_14 : f32 to vector<2x48xf32>
    %22 = arith.addf %21, %20 : vector<2x48xf32>
    %23 = arith.divf %21, %22 : vector<2x48xf32>
    %24 = vector.extract_strided_slice %23 {offsets = [0, 0], sizes = [2, 16], strides = [1, 1]} : vector<2x48xf32> to vector<2x16xf32>
    %25 = vector.extract_strided_slice %23 {offsets = [0, 16], sizes = [2, 16], strides = [1, 1]} : vector<2x48xf32> to vector<2x16xf32>
    %26 = vector.extract_strided_slice %23 {offsets = [0, 32], sizes = [2, 16], strides = [1, 1]} : vector<2x48xf32> to vector<2x16xf32>
    %27 = vector.extract_strided_slice %17 {offsets = [0, 48], sizes = [2, 16], strides = [1, 1]} : vector<2x64xf32> to vector<2x16xf32>
    %28 = math.tanh %27 : vector<2x16xf32>
    %29 = arith.mulf %25, %13 : vector<2x16xf32>
    %30 = arith.mulf %24, %28 : vector<2x16xf32>
    %31 = arith.addf %29, %30 : vector<2x16xf32>
    %32 = math.tanh %31 : vector<2x16xf32>
    %33 = arith.mulf %26, %32 : vector<2x16xf32>
    %34 = vector.extract_strided_slice %9 {offsets = [2, 0], sizes = [2, 64], strides = [1, 1]} : vector<16x64xf32> to vector<2x64xf32>
    %35 = arith.truncf %33 : vector<2x16xf32> to vector<2x16xbf16>
    %cst_15 = arith.constant dense<0.000000e+00> : vector<2x64xf32>
    %36 = tpu.matmul %35, %11, %cst_15 {dimension_numbers = #tpu.dot_dimension_numbers<[1], [0], [0], [1], [0, 0, 1, 1], [], []>} : vector<2x16xbf16>, vector<16x64xbf16>, vector<2x64xf32> -> vector<2x64xf32>
    %37 = arith.addf %34, %36 : vector<2x64xf32>
    %38 = vector.extract_strided_slice %37 {offsets = [0, 0], sizes = [2, 48], strides = [1, 1]} : vector<2x64xf32> to vector<2x48xf32>
    %39 = arith.negf %38 : vector<2x48xf32>
    %40 = math.exp %39 : vector<2x48xf32>
    %cst_16 = arith.constant 1.000000e+00 : f32
    %41 = vector.broadcast %cst_16 : f32 to vector<2x48xf32>
    %42 = arith.addf %41, %40 : vector<2x48xf32>
    %43 = arith.divf %41, %42 : vector<2x48xf32>
    %44 = vector.extract_strided_slice %43 {offsets = [0, 0], sizes = [2, 16], strides = [1, 1]} : vector<2x48xf32> to vector<2x16xf32>
    %45 = vector.extract_strided_slice %43 {offsets = [0, 16], sizes = [2, 16], strides = [1, 1]} : vector<2x48xf32> to vector<2x16xf32>
    %46 = vector.extract_strided_slice %43 {offsets = [0, 32], sizes = [2, 16], strides = [1, 1]} : vector<2x48xf32> to vector<2x16xf32>
    %47 = vector.extract_strided_slice %37 {offsets = [0, 48], sizes = [2, 16], strides = [1, 1]} : vector<2x64xf32> to vector<2x16xf32>
    %48 = math.tanh %47 : vector<2x16xf32>
    %49 = arith.mulf %45, %31 : vector<2x16xf32>
    %50 = arith.mulf %44, %48 : vector<2x16xf32>
    %51 = arith.addf %49, %50 : vector<2x16xf32>
    %52 = math.tanh %51 : vector<2x16xf32>
    %53 = arith.mulf %46, %52 : vector<2x16xf32>
    %54 = vector.extract_strided_slice %9 {offsets = [4, 0], sizes = [2, 64], strides = [1, 1]} : vector<16x64xf32> to vector<2x64xf32>
    %55 = arith.truncf %53 : vector<2x16xf32> to vector<2x16xbf16>
    %cst_17 = arith.constant dense<0.000000e+00> : vector<2x64xf32>
    %56 = tpu.matmul %55, %11, %cst_17 {dimension_numbers = #tpu.dot_dimension_numbers<[1], [0], [0], [1], [0, 0, 1, 1], [], []>} : vector<2x16xbf16>, vector<16x64xbf16>, vector<2x64xf32> -> vector<2x64xf32>
    %57 = arith.addf %54, %56 : vector<2x64xf32>
    %58 = vector.extract_strided_slice %57 {offsets = [0, 0], sizes = [2, 48], strides = [1, 1]} : vector<2x64xf32> to vector<2x48xf32>
    %59 = arith.negf %58 : vector<2x48xf32>
    %60 = math.exp %59 : vector<2x48xf32>
    %cst_18 = arith.constant 1.000000e+00 : f32
    %61 = vector.broadcast %cst_18 : f32 to vector<2x48xf32>
    %62 = arith.addf %61, %60 : vector<2x48xf32>
    %63 = arith.divf %61, %62 : vector<2x48xf32>
    %64 = vector.extract_strided_slice %63 {offsets = [0, 0], sizes = [2, 16], strides = [1, 1]} : vector<2x48xf32> to vector<2x16xf32>
    %65 = vector.extract_strided_slice %63 {offsets = [0, 16], sizes = [2, 16], strides = [1, 1]} : vector<2x48xf32> to vector<2x16xf32>
    %66 = vector.extract_strided_slice %63 {offsets = [0, 32], sizes = [2, 16], strides = [1, 1]} : vector<2x48xf32> to vector<2x16xf32>
    %67 = vector.extract_strided_slice %57 {offsets = [0, 48], sizes = [2, 16], strides = [1, 1]} : vector<2x64xf32> to vector<2x16xf32>
    %68 = math.tanh %67 : vector<2x16xf32>
    %69 = arith.mulf %65, %51 : vector<2x16xf32>
    %70 = arith.mulf %64, %68 : vector<2x16xf32>
    %71 = arith.addf %69, %70 : vector<2x16xf32>
    %72 = math.tanh %71 : vector<2x16xf32>
    %73 = arith.mulf %66, %72 : vector<2x16xf32>
    %74 = vector.extract_strided_slice %9 {offsets = [6, 0], sizes = [2, 64], strides = [1, 1]} : vector<16x64xf32> to vector<2x64xf32>
    %75 = arith.truncf %73 : vector<2x16xf32> to vector<2x16xbf16>
    %cst_19 = arith.constant dense<0.000000e+00> : vector<2x64xf32>
    %76 = tpu.matmul %75, %11, %cst_19 {dimension_numbers = #tpu.dot_dimension_numbers<[1], [0], [0], [1], [0, 0, 1, 1], [], []>} : vector<2x16xbf16>, vector<16x64xbf16>, vector<2x64xf32> -> vector<2x64xf32>
    %77 = arith.addf %74, %76 : vector<2x64xf32>
    %78 = vector.extract_strided_slice %77 {offsets = [0, 0], sizes = [2, 48], strides = [1, 1]} : vector<2x64xf32> to vector<2x48xf32>
    %79 = arith.negf %78 : vector<2x48xf32>
    %80 = math.exp %79 : vector<2x48xf32>
    %cst_20 = arith.constant 1.000000e+00 : f32
    %81 = vector.broadcast %cst_20 : f32 to vector<2x48xf32>
    %82 = arith.addf %81, %80 : vector<2x48xf32>
    %83 = arith.divf %81, %82 : vector<2x48xf32>
    %84 = vector.extract_strided_slice %83 {offsets = [0, 0], sizes = [2, 16], strides = [1, 1]} : vector<2x48xf32> to vector<2x16xf32>
    %85 = vector.extract_strided_slice %83 {offsets = [0, 16], sizes = [2, 16], strides = [1, 1]} : vector<2x48xf32> to vector<2x16xf32>
    %86 = vector.extract_strided_slice %83 {offsets = [0, 32], sizes = [2, 16], strides = [1, 1]} : vector<2x48xf32> to vector<2x16xf32>
    %87 = vector.extract_strided_slice %77 {offsets = [0, 48], sizes = [2, 16], strides = [1, 1]} : vector<2x64xf32> to vector<2x16xf32>
    %88 = math.tanh %87 : vector<2x16xf32>
    %89 = arith.mulf %85, %71 : vector<2x16xf32>
    %90 = arith.mulf %84, %88 : vector<2x16xf32>
    %91 = arith.addf %89, %90 : vector<2x16xf32>
    %92 = math.tanh %91 : vector<2x16xf32>
    %93 = arith.mulf %86, %92 : vector<2x16xf32>
    %94 = vector.extract_strided_slice %9 {offsets = [8, 0], sizes = [2, 64], strides = [1, 1]} : vector<16x64xf32> to vector<2x64xf32>
    %95 = arith.truncf %93 : vector<2x16xf32> to vector<2x16xbf16>
    %cst_21 = arith.constant dense<0.000000e+00> : vector<2x64xf32>
    %96 = tpu.matmul %95, %11, %cst_21 {dimension_numbers = #tpu.dot_dimension_numbers<[1], [0], [0], [1], [0, 0, 1, 1], [], []>} : vector<2x16xbf16>, vector<16x64xbf16>, vector<2x64xf32> -> vector<2x64xf32>
    %97 = arith.addf %94, %96 : vector<2x64xf32>
    %98 = vector.extract_strided_slice %97 {offsets = [0, 0], sizes = [2, 48], strides = [1, 1]} : vector<2x64xf32> to vector<2x48xf32>
    %99 = arith.negf %98 : vector<2x48xf32>
    %100 = math.exp %99 : vector<2x48xf32>
    %cst_22 = arith.constant 1.000000e+00 : f32
    %101 = vector.broadcast %cst_22 : f32 to vector<2x48xf32>
    %102 = arith.addf %101, %100 : vector<2x48xf32>
    %103 = arith.divf %101, %102 : vector<2x48xf32>
    %104 = vector.extract_strided_slice %103 {offsets = [0, 0], sizes = [2, 16], strides = [1, 1]} : vector<2x48xf32> to vector<2x16xf32>
    %105 = vector.extract_strided_slice %103 {offsets = [0, 16], sizes = [2, 16], strides = [1, 1]} : vector<2x48xf32> to vector<2x16xf32>
    %106 = vector.extract_strided_slice %103 {offsets = [0, 32], sizes = [2, 16], strides = [1, 1]} : vector<2x48xf32> to vector<2x16xf32>
    %107 = vector.extract_strided_slice %97 {offsets = [0, 48], sizes = [2, 16], strides = [1, 1]} : vector<2x64xf32> to vector<2x16xf32>
    %108 = math.tanh %107 : vector<2x16xf32>
    %109 = arith.mulf %105, %91 : vector<2x16xf32>
    %110 = arith.mulf %104, %108 : vector<2x16xf32>
    %111 = arith.addf %109, %110 : vector<2x16xf32>
    %112 = math.tanh %111 : vector<2x16xf32>
    %113 = arith.mulf %106, %112 : vector<2x16xf32>
    %114 = vector.extract_strided_slice %9 {offsets = [10, 0], sizes = [2, 64], strides = [1, 1]} : vector<16x64xf32> to vector<2x64xf32>
    %115 = arith.truncf %113 : vector<2x16xf32> to vector<2x16xbf16>
    %cst_23 = arith.constant dense<0.000000e+00> : vector<2x64xf32>
    %116 = tpu.matmul %115, %11, %cst_23 {dimension_numbers = #tpu.dot_dimension_numbers<[1], [0], [0], [1], [0, 0, 1, 1], [], []>} : vector<2x16xbf16>, vector<16x64xbf16>, vector<2x64xf32> -> vector<2x64xf32>
    %117 = arith.addf %114, %116 : vector<2x64xf32>
    %118 = vector.extract_strided_slice %117 {offsets = [0, 0], sizes = [2, 48], strides = [1, 1]} : vector<2x64xf32> to vector<2x48xf32>
    %119 = arith.negf %118 : vector<2x48xf32>
    %120 = math.exp %119 : vector<2x48xf32>
    %cst_24 = arith.constant 1.000000e+00 : f32
    %121 = vector.broadcast %cst_24 : f32 to vector<2x48xf32>
    %122 = arith.addf %121, %120 : vector<2x48xf32>
    %123 = arith.divf %121, %122 : vector<2x48xf32>
    %124 = vector.extract_strided_slice %123 {offsets = [0, 0], sizes = [2, 16], strides = [1, 1]} : vector<2x48xf32> to vector<2x16xf32>
    %125 = vector.extract_strided_slice %123 {offsets = [0, 16], sizes = [2, 16], strides = [1, 1]} : vector<2x48xf32> to vector<2x16xf32>
    %126 = vector.extract_strided_slice %123 {offsets = [0, 32], sizes = [2, 16], strides = [1, 1]} : vector<2x48xf32> to vector<2x16xf32>
    %127 = vector.extract_strided_slice %117 {offsets = [0, 48], sizes = [2, 16], strides = [1, 1]} : vector<2x64xf32> to vector<2x16xf32>
    %128 = math.tanh %127 : vector<2x16xf32>
    %129 = arith.mulf %125, %111 : vector<2x16xf32>
    %130 = arith.mulf %124, %128 : vector<2x16xf32>
    %131 = arith.addf %129, %130 : vector<2x16xf32>
    %132 = math.tanh %131 : vector<2x16xf32>
    %133 = arith.mulf %126, %132 : vector<2x16xf32>
    %134 = vector.extract_strided_slice %9 {offsets = [12, 0], sizes = [2, 64], strides = [1, 1]} : vector<16x64xf32> to vector<2x64xf32>
    %135 = arith.truncf %133 : vector<2x16xf32> to vector<2x16xbf16>
    %cst_25 = arith.constant dense<0.000000e+00> : vector<2x64xf32>
    %136 = tpu.matmul %135, %11, %cst_25 {dimension_numbers = #tpu.dot_dimension_numbers<[1], [0], [0], [1], [0, 0, 1, 1], [], []>} : vector<2x16xbf16>, vector<16x64xbf16>, vector<2x64xf32> -> vector<2x64xf32>
    %137 = arith.addf %134, %136 : vector<2x64xf32>
    %138 = vector.extract_strided_slice %137 {offsets = [0, 0], sizes = [2, 48], strides = [1, 1]} : vector<2x64xf32> to vector<2x48xf32>
    %139 = arith.negf %138 : vector<2x48xf32>
    %140 = math.exp %139 : vector<2x48xf32>
    %cst_26 = arith.constant 1.000000e+00 : f32
    %141 = vector.broadcast %cst_26 : f32 to vector<2x48xf32>
    %142 = arith.addf %141, %140 : vector<2x48xf32>
    %143 = arith.divf %141, %142 : vector<2x48xf32>
    %144 = vector.extract_strided_slice %143 {offsets = [0, 0], sizes = [2, 16], strides = [1, 1]} : vector<2x48xf32> to vector<2x16xf32>
    %145 = vector.extract_strided_slice %143 {offsets = [0, 16], sizes = [2, 16], strides = [1, 1]} : vector<2x48xf32> to vector<2x16xf32>
    %146 = vector.extract_strided_slice %143 {offsets = [0, 32], sizes = [2, 16], strides = [1, 1]} : vector<2x48xf32> to vector<2x16xf32>
    %147 = vector.extract_strided_slice %137 {offsets = [0, 48], sizes = [2, 16], strides = [1, 1]} : vector<2x64xf32> to vector<2x16xf32>
    %148 = math.tanh %147 : vector<2x16xf32>
    %149 = arith.mulf %145, %131 : vector<2x16xf32>
    %150 = arith.mulf %144, %148 : vector<2x16xf32>
    %151 = arith.addf %149, %150 : vector<2x16xf32>
    %152 = math.tanh %151 : vector<2x16xf32>
    %153 = arith.mulf %146, %152 : vector<2x16xf32>
    %154 = vector.extract_strided_slice %9 {offsets = [14, 0], sizes = [2, 64], strides = [1, 1]} : vector<16x64xf32> to vector<2x64xf32>
    %155 = arith.truncf %153 : vector<2x16xf32> to vector<2x16xbf16>
    %cst_27 = arith.constant dense<0.000000e+00> : vector<2x64xf32>
    %156 = tpu.matmul %155, %11, %cst_27 {dimension_numbers = #tpu.dot_dimension_numbers<[1], [0], [0], [1], [0, 0, 1, 1], [], []>} : vector<2x16xbf16>, vector<16x64xbf16>, vector<2x64xf32> -> vector<2x64xf32>
    %157 = arith.addf %154, %156 : vector<2x64xf32>
    %158 = vector.extract_strided_slice %157 {offsets = [0, 0], sizes = [2, 48], strides = [1, 1]} : vector<2x64xf32> to vector<2x48xf32>
    %159 = arith.negf %158 : vector<2x48xf32>
    %160 = math.exp %159 : vector<2x48xf32>
    %cst_28 = arith.constant 1.000000e+00 : f32
    %161 = vector.broadcast %cst_28 : f32 to vector<2x48xf32>
    %162 = arith.addf %161, %160 : vector<2x48xf32>
    %163 = arith.divf %161, %162 : vector<2x48xf32>
    %164 = vector.extract_strided_slice %163 {offsets = [0, 0], sizes = [2, 16], strides = [1, 1]} : vector<2x48xf32> to vector<2x16xf32>
    %165 = vector.extract_strided_slice %163 {offsets = [0, 16], sizes = [2, 16], strides = [1, 1]} : vector<2x48xf32> to vector<2x16xf32>
    %166 = vector.extract_strided_slice %163 {offsets = [0, 32], sizes = [2, 16], strides = [1, 1]} : vector<2x48xf32> to vector<2x16xf32>
    %167 = vector.extract_strided_slice %157 {offsets = [0, 48], sizes = [2, 16], strides = [1, 1]} : vector<2x64xf32> to vector<2x16xf32>
    %168 = math.tanh %167 : vector<2x16xf32>
    %169 = arith.mulf %165, %151 : vector<2x16xf32>
    %170 = arith.mulf %164, %168 : vector<2x16xf32>
    %171 = arith.addf %169, %170 : vector<2x16xf32>
    %172 = math.tanh %171 : vector<2x16xf32>
    %173 = arith.mulf %166, %172 : vector<2x16xf32>
    %174 = tpu.concatenate %33, %53, %73, %93, %113, %133, %153, %173 in 0 : vector<2x16xf32>, vector<2x16xf32>, vector<2x16xf32>, vector<2x16xf32>, vector<2x16xf32>, vector<2x16xf32>, vector<2x16xf32>, vector<2x16xf32> -> vector<16x16xf32>
    %c0_29 = arith.constant 0 : index
    %c0_30 = arith.constant 0 : index
    %c0_31 = arith.constant 0 : index
    %175 = vector.load %arg5[%c0_29, %c0_30, %c0_31] : memref<1x16x16xf32, #tpu.memory_space<vmem>>, vector<1x16x16xf32>
    %176 = vector.shape_cast %175 : vector<1x16x16xf32> to vector<16x16xf32>
    %177 = vector.shape_cast %174 : vector<16x16xf32> to vector<1x16x16xf32>
    tpu.vector_store %arg5[%c0_29, %c0_30, %c0_31], %177 {strides = array<i32>} : memref<1x16x16xf32, #tpu.memory_space<vmem>>, vector<1x16x16xf32>,
    return
  }
  func.func @transform_0(%arg0: i32) -> (i32, i32, i32) {
    %c0_i32 = arith.constant 0 : i32
    %c0_i32_0 = arith.constant 0 : i32
    %c0_i32_1 = arith.constant 0 : i32
    return %arg0, %c0_i32, %c0_i32_0 : i32, i32, i32
  }
  func.func @transform_1(%arg0: i32) -> (i32, i32, i32) {
    %c0_i32 = arith.constant 0 : i32
    %c0_i32_0 = arith.constant 0 : i32
    %c0_i32_1 = arith.constant 0 : i32
    return %arg0, %c0_i32, %c0_i32_0 : i32, i32, i32
  }
  func.func @transform_2(%arg0: i32) -> (i32, i32, i32) {
    %c0_i32 = arith.constant 0 : i32
    %c0_i32_0 = arith.constant 0 : i32
    %c0_i32_1 = arith.constant 0 : i32
    return %arg0, %c0_i32, %c0_i32_0 : i32, i32, i32
  }
  func.func @transform_3(%arg0: i32) -> (i32, i32, i32) {
    %c0_i32 = arith.constant 0 : i32
    %c0_i32_0 = arith.constant 0 : i32
    %c0_i32_1 = arith.constant 0 : i32
    return %arg0, %c0_i32, %c0_i32_0 : i32, i32, i32
  }
  func.func @transform_4(%arg0: i32) -> (i32, i32, i32) {
    %c0_i32 = arith.constant 0 : i32
    %c0_i32_0 = arith.constant 0 : i32
    %c0_i32_1 = arith.constant 0 : i32
    return %arg0, %c0_i32, %c0_i32_0 : i32, i32, i32
  }
}

module attributes {stable_mosaic.version = 11 : i64} {
  func.func @_word_lstm_crf_kernel(%arg0: i32, %arg1: memref<16x16xf32, #tpu.memory_space<vmem>>, %arg2: memref<16x16xf32, #tpu.memory_space<vmem>>, %arg3: memref<16x16xf32, #tpu.memory_space<vmem>>, %arg4: memref<16x16xf32, #tpu.memory_space<vmem>>, %arg5: memref<16x16xf32, #tpu.memory_space<vmem>>, %arg6: memref<16x16xbf16, #tpu.memory_space<vmem>>, %arg7: memref<16x16xbf16, #tpu.memory_space<vmem>>, %arg8: memref<1x16xf32, #tpu.memory_space<vmem>>, %arg9: memref<16x16xbf16, #tpu.memory_space<vmem>>, %arg10: memref<16x16xbf16, #tpu.memory_space<vmem>>, %arg11: memref<1x16xf32, #tpu.memory_space<vmem>>, %arg12: memref<1x48x64xbf16, #tpu.memory_space<vmem>>, %arg13: memref<1x16x64xbf16, #tpu.memory_space<vmem>>, %arg14: memref<1x1x64xf32, #tpu.memory_space<vmem>>, %arg15: memref<1x16x36xbf16, #tpu.memory_space<vmem>>, %arg16: memref<1x16x36xf32, #tpu.memory_space<vmem>>) attributes {dimension_semantics = [#tpu.dimension_semantics<parallel>], iteration_bounds = array<i64: 2>, scalar_prefetch = 0 : i64, scratch_operands = 0 : i64, tpu.core_type = #tpu.core_type<tc>, window_params = [{pipeline_mode = #tpu.pipeline_mode<synchronous>, transform_indices = @transform_0, window_bounds = array<i64: 16, 16>}, {pipeline_mode = #tpu.pipeline_mode<synchronous>, transform_indices = @transform_1, window_bounds = array<i64: 16, 16>}, {pipeline_mode = #tpu.pipeline_mode<synchronous>, transform_indices = @transform_2, window_bounds = array<i64: 16, 16>}, {pipeline_mode = #tpu.pipeline_mode<synchronous>, transform_indices = @transform_3, window_bounds = array<i64: 16, 16>}, {pipeline_mode = #tpu.pipeline_mode<synchronous>, transform_indices = @transform_4, window_bounds = array<i64: 16, 16>}, {pipeline_mode = #tpu.pipeline_mode<synchronous>, transform_indices = @transform_5, window_bounds = array<i64: 16, 16>}, {pipeline_mode = #tpu.pipeline_mode<synchronous>, transform_indices = @transform_6, window_bounds = array<i64: 16, 16>}, {pipeline_mode = #tpu.pipeline_mode<synchronous>, transform_indices = @transform_7, window_bounds = array<i64: 1, 16>}, {pipeline_mode = #tpu.pipeline_mode<synchronous>, transform_indices = @transform_8, window_bounds = array<i64: 16, 16>}, {pipeline_mode = #tpu.pipeline_mode<synchronous>, transform_indices = @transform_9, window_bounds = array<i64: 16, 16>}, {pipeline_mode = #tpu.pipeline_mode<synchronous>, transform_indices = @transform_10, window_bounds = array<i64: 1, 16>}, {transform_indices = @transform_11, window_bounds = array<i64: 1, 48, 64>}, {transform_indices = @transform_12, window_bounds = array<i64: 1, 16, 64>}, {transform_indices = @transform_13, window_bounds = array<i64: 1, 1, 64>}, {transform_indices = @transform_14, window_bounds = array<i64: 1, 16, 36>}, {transform_indices = @transform_15, window_bounds = array<i64: 1, 16, 36>}]} {
    %c0 = arith.constant 0 : index
    %c0_0 = arith.constant 0 : index
    %0 = vector.load %arg1[%c0, %c0_0] : memref<16x16xf32, #tpu.memory_space<vmem>>, vector<16x16xf32>
    %1 = arith.truncf %0 : vector<16x16xf32> to vector<16x16xbf16>
    %c0_1 = arith.constant 0 : index
    %c0_2 = arith.constant 0 : index
    %2 = vector.load %arg6[%c0_1, %c0_2] : memref<16x16xbf16, #tpu.memory_space<vmem>>, vector<16x16xbf16>
    %cst = arith.constant dense<0.000000e+00> : vector<16x16xf32>
    %3 = tpu.matmul %1, %2, %cst {dimension_numbers = #tpu.dot_dimension_numbers<[1], [0], [0], [1], [0, 0, 1, 1], [], []>} : vector<16x16xbf16>, vector<16x16xbf16>, vector<16x16xf32> -> vector<16x16xf32>
    %c0_3 = arith.constant 0 : index
    %c0_4 = arith.constant 0 : index
    %4 = vector.load %arg2[%c0_3, %c0_4] : memref<16x16xf32, #tpu.memory_space<vmem>>, vector<16x16xf32>
    %5 = arith.truncf %4 : vector<16x16xf32> to vector<16x16xbf16>
    %c0_5 = arith.constant 0 : index
    %c0_6 = arith.constant 0 : index
    %6 = vector.load %arg7[%c0_5, %c0_6] : memref<16x16xbf16, #tpu.memory_space<vmem>>, vector<16x16xbf16>
    %cst_7 = arith.constant dense<0.000000e+00> : vector<16x16xf32>
    %7 = tpu.matmul %5, %6, %cst_7 {dimension_numbers = #tpu.dot_dimension_numbers<[1], [0], [0], [1], [0, 0, 1, 1], [], []>} : vector<16x16xbf16>, vector<16x16xbf16>, vector<16x16xf32> -> vector<16x16xf32>
    %8 = arith.addf %3, %7 : vector<16x16xf32>
    %c0_8 = arith.constant 0 : index
    %c0_9 = arith.constant 0 : index
    %9 = vector.load %arg8[%c0_8, %c0_9] : memref<1x16xf32, #tpu.memory_space<vmem>>, vector<1x16xf32>
    %10 = vector.broadcast %9 : vector<1x16xf32> to vector<16x16xf32>
    %11 = arith.addf %8, %10 : vector<16x16xf32>
    %c0_10 = arith.constant 0 : index
    %c0_11 = arith.constant 0 : index
    %12 = vector.load %arg3[%c0_10, %c0_11] : memref<16x16xf32, #tpu.memory_space<vmem>>, vector<16x16xf32>
    %13 = arith.truncf %12 : vector<16x16xf32> to vector<16x16xbf16>
    %c0_12 = arith.constant 0 : index
    %c0_13 = arith.constant 0 : index
    %14 = vector.load %arg9[%c0_12, %c0_13] : memref<16x16xbf16, #tpu.memory_space<vmem>>, vector<16x16xbf16>
    %cst_14 = arith.constant dense<0.000000e+00> : vector<16x16xf32>
    %15 = tpu.matmul %13, %14, %cst_14 {dimension_numbers = #tpu.dot_dimension_numbers<[1], [0], [0], [1], [0, 0, 1, 1], [], []>} : vector<16x16xbf16>, vector<16x16xbf16>, vector<16x16xf32> -> vector<16x16xf32>
    %c0_15 = arith.constant 0 : index
    %c0_16 = arith.constant 0 : index
    %16 = vector.load %arg4[%c0_15, %c0_16] : memref<16x16xf32, #tpu.memory_space<vmem>>, vector<16x16xf32>
    %17 = arith.truncf %16 : vector<16x16xf32> to vector<16x16xbf16>
    %c0_17 = arith.constant 0 : index
    %c0_18 = arith.constant 0 : index
    %18 = vector.load %arg10[%c0_17, %c0_18] : memref<16x16xbf16, #tpu.memory_space<vmem>>, vector<16x16xbf16>
    %cst_19 = arith.constant dense<0.000000e+00> : vector<16x16xf32>
    %19 = tpu.matmul %17, %18, %cst_19 {dimension_numbers = #tpu.dot_dimension_numbers<[1], [0], [0], [1], [0, 0, 1, 1], [], []>} : vector<16x16xbf16>, vector<16x16xbf16>, vector<16x16xf32> -> vector<16x16xf32>
    %20 = arith.addf %15, %19 : vector<16x16xf32>
    %c0_20 = arith.constant 0 : index
    %c0_21 = arith.constant 0 : index
    %21 = vector.load %arg11[%c0_20, %c0_21] : memref<1x16xf32, #tpu.memory_space<vmem>>, vector<1x16xf32>
    %22 = vector.broadcast %21 : vector<1x16xf32> to vector<16x16xf32>
    %23 = arith.addf %20, %22 : vector<16x16xf32>
    %cst_22 = arith.constant 0.000000e+00 : f32
    %24 = vector.broadcast %cst_22 : f32 to vector<16x16xf32>
    %25 = arith.maximumf %23, %24 : vector<16x16xf32>
    %c0_23 = arith.constant 0 : index
    %c0_24 = arith.constant 0 : index
    %26 = vector.load %arg5[%c0_23, %c0_24] : memref<16x16xf32, #tpu.memory_space<vmem>>, vector<16x16xf32>
    %27 = tpu.concatenate %11, %25, %26 in 1 : vector<16x16xf32>, vector<16x16xf32>, vector<16x16xf32> -> vector<16x48xf32>
    %28 = arith.truncf %27 : vector<16x48xf32> to vector<16x48xbf16>
    %c0_25 = arith.constant 0 : index
    %c0_26 = arith.constant 0 : index
    %c0_27 = arith.constant 0 : index
    %29 = vector.load %arg12[%c0_25, %c0_26, %c0_27] : memref<1x48x64xbf16, #tpu.memory_space<vmem>>, vector<1x48x64xbf16>
    %30 = vector.shape_cast %29 : vector<1x48x64xbf16> to vector<48x64xbf16>
    %cst_28 = arith.constant dense<0.000000e+00> : vector<16x64xf32>
    %31 = tpu.matmul %28, %30, %cst_28 {dimension_numbers = #tpu.dot_dimension_numbers<[1], [0], [0], [1], [0, 0, 1, 1], [], []>} : vector<16x48xbf16>, vector<48x64xbf16>, vector<16x64xf32> -> vector<16x64xf32>
    %c0_29 = arith.constant 0 : index
    %c0_30 = arith.constant 0 : index
    %c0_31 = arith.constant 0 : index
    %32 = vector.load %arg14[%c0_29, %c0_30, %c0_31] : memref<1x1x64xf32, #tpu.memory_space<vmem>>, vector<1x1x64xf32>
    %33 = vector.shape_cast %32 : vector<1x1x64xf32> to vector<1x64xf32>
    %34 = vector.broadcast %33 : vector<1x64xf32> to vector<16x64xf32>
    %35 = arith.addf %31, %34 : vector<16x64xf32>
    %c0_32 = arith.constant 0 : index
    %c0_33 = arith.constant 0 : index
    %c0_34 = arith.constant 0 : index
    %36 = vector.load %arg13[%c0_32, %c0_33, %c0_34] : memref<1x16x64xbf16, #tpu.memory_space<vmem>>, vector<1x16x64xbf16>
    %37 = vector.shape_cast %36 : vector<1x16x64xbf16> to vector<16x64xbf16>
    %c0_35 = arith.constant 0 : index
    %c0_36 = arith.constant 0 : index
    %c0_37 = arith.constant 0 : index
    %38 = vector.load %arg15[%c0_35, %c0_36, %c0_37] : memref<1x16x36xbf16, #tpu.memory_space<vmem>>, vector<1x16x36xbf16>
    %39 = vector.shape_cast %38 : vector<1x16x36xbf16> to vector<16x36xbf16>
    %c0_i32 = arith.constant 0 : i32
    %40 = arith.cmpi eq, %arg0, %c0_i32 : i32
    %41 = arith.extui %40 : i1 to i32
    %c0_i32_38 = arith.constant 0 : i32
    %42 = arith.cmpi ne, %41, %c0_i32_38 : i32
    scf.if %42 {
      %cst_40 = arith.constant 0.000000e+00 : f32
      %46 = vector.broadcast %cst_40 : f32 to vector<2x16xf32>
      %cst_41 = arith.constant 0.000000e+00 : f32
      %47 = vector.broadcast %cst_41 : f32 to vector<2x16xf32>
      %48 = vector.extract_strided_slice %35 {offsets = [0, 0], sizes = [2, 64], strides = [1, 1]} : vector<16x64xf32> to vector<2x64xf32>
      %49 = arith.truncf %46 : vector<2x16xf32> to vector<2x16xbf16>
      %cst_42 = arith.constant dense<0.000000e+00> : vector<2x64xf32>
      %50 = tpu.matmul %49, %37, %cst_42 {dimension_numbers = #tpu.dot_dimension_numbers<[1], [0], [0], [1], [0, 0, 1, 1], [], []>} : vector<2x16xbf16>, vector<16x64xbf16>, vector<2x64xf32> -> vector<2x64xf32>
      %51 = arith.addf %48, %50 : vector<2x64xf32>
      %52 = vector.extract_strided_slice %51 {offsets = [0, 0], sizes = [2, 48], strides = [1, 1]} : vector<2x64xf32> to vector<2x48xf32>
      %53 = arith.negf %52 : vector<2x48xf32>
      %54 = math.exp %53 : vector<2x48xf32>
      %cst_43 = arith.constant 1.000000e+00 : f32
      %55 = vector.broadcast %cst_43 : f32 to vector<2x48xf32>
      %56 = arith.addf %55, %54 : vector<2x48xf32>
      %57 = arith.divf %55, %56 : vector<2x48xf32>
      %58 = vector.extract_strided_slice %57 {offsets = [0, 0], sizes = [2, 16], strides = [1, 1]} : vector<2x48xf32> to vector<2x16xf32>
      %59 = vector.extract_strided_slice %57 {offsets = [0, 16], sizes = [2, 16], strides = [1, 1]} : vector<2x48xf32> to vector<2x16xf32>
      %60 = vector.extract_strided_slice %57 {offsets = [0, 32], sizes = [2, 16], strides = [1, 1]} : vector<2x48xf32> to vector<2x16xf32>
      %61 = vector.extract_strided_slice %51 {offsets = [0, 48], sizes = [2, 16], strides = [1, 1]} : vector<2x64xf32> to vector<2x16xf32>
      %62 = math.tanh %61 : vector<2x16xf32>
      %63 = arith.mulf %59, %47 : vector<2x16xf32>
      %64 = arith.mulf %58, %62 : vector<2x16xf32>
      %65 = arith.addf %63, %64 : vector<2x16xf32>
      %66 = math.tanh %65 : vector<2x16xf32>
      %67 = arith.mulf %60, %66 : vector<2x16xf32>
      %68 = vector.extract_strided_slice %35 {offsets = [2, 0], sizes = [2, 64], strides = [1, 1]} : vector<16x64xf32> to vector<2x64xf32>
      %69 = arith.truncf %67 : vector<2x16xf32> to vector<2x16xbf16>
      %cst_44 = arith.constant dense<0.000000e+00> : vector<2x64xf32>
      %70 = tpu.matmul %69, %37, %cst_44 {dimension_numbers = #tpu.dot_dimension_numbers<[1], [0], [0], [1], [0, 0, 1, 1], [], []>} : vector<2x16xbf16>, vector<16x64xbf16>, vector<2x64xf32> -> vector<2x64xf32>
      %71 = arith.addf %68, %70 : vector<2x64xf32>
      %72 = vector.extract_strided_slice %71 {offsets = [0, 0], sizes = [2, 48], strides = [1, 1]} : vector<2x64xf32> to vector<2x48xf32>
      %73 = arith.negf %72 : vector<2x48xf32>
      %74 = math.exp %73 : vector<2x48xf32>
      %cst_45 = arith.constant 1.000000e+00 : f32
      %75 = vector.broadcast %cst_45 : f32 to vector<2x48xf32>
      %76 = arith.addf %75, %74 : vector<2x48xf32>
      %77 = arith.divf %75, %76 : vector<2x48xf32>
      %78 = vector.extract_strided_slice %77 {offsets = [0, 0], sizes = [2, 16], strides = [1, 1]} : vector<2x48xf32> to vector<2x16xf32>
      %79 = vector.extract_strided_slice %77 {offsets = [0, 16], sizes = [2, 16], strides = [1, 1]} : vector<2x48xf32> to vector<2x16xf32>
      %80 = vector.extract_strided_slice %77 {offsets = [0, 32], sizes = [2, 16], strides = [1, 1]} : vector<2x48xf32> to vector<2x16xf32>
      %81 = vector.extract_strided_slice %71 {offsets = [0, 48], sizes = [2, 16], strides = [1, 1]} : vector<2x64xf32> to vector<2x16xf32>
      %82 = math.tanh %81 : vector<2x16xf32>
      %83 = arith.mulf %79, %65 : vector<2x16xf32>
      %84 = arith.mulf %78, %82 : vector<2x16xf32>
      %85 = arith.addf %83, %84 : vector<2x16xf32>
      %86 = math.tanh %85 : vector<2x16xf32>
      %87 = arith.mulf %80, %86 : vector<2x16xf32>
      %88 = vector.extract_strided_slice %35 {offsets = [4, 0], sizes = [2, 64], strides = [1, 1]} : vector<16x64xf32> to vector<2x64xf32>
      %89 = arith.truncf %87 : vector<2x16xf32> to vector<2x16xbf16>
      %cst_46 = arith.constant dense<0.000000e+00> : vector<2x64xf32>
      %90 = tpu.matmul %89, %37, %cst_46 {dimension_numbers = #tpu.dot_dimension_numbers<[1], [0], [0], [1], [0, 0, 1, 1], [], []>} : vector<2x16xbf16>, vector<16x64xbf16>, vector<2x64xf32> -> vector<2x64xf32>
      %91 = arith.addf %88, %90 : vector<2x64xf32>
      %92 = vector.extract_strided_slice %91 {offsets = [0, 0], sizes = [2, 48], strides = [1, 1]} : vector<2x64xf32> to vector<2x48xf32>
      %93 = arith.negf %92 : vector<2x48xf32>
      %94 = math.exp %93 : vector<2x48xf32>
      %cst_47 = arith.constant 1.000000e+00 : f32
      %95 = vector.broadcast %cst_47 : f32 to vector<2x48xf32>
      %96 = arith.addf %95, %94 : vector<2x48xf32>
      %97 = arith.divf %95, %96 : vector<2x48xf32>
      %98 = vector.extract_strided_slice %97 {offsets = [0, 0], sizes = [2, 16], strides = [1, 1]} : vector<2x48xf32> to vector<2x16xf32>
      %99 = vector.extract_strided_slice %97 {offsets = [0, 16], sizes = [2, 16], strides = [1, 1]} : vector<2x48xf32> to vector<2x16xf32>
      %100 = vector.extract_strided_slice %97 {offsets = [0, 32], sizes = [2, 16], strides = [1, 1]} : vector<2x48xf32> to vector<2x16xf32>
      %101 = vector.extract_strided_slice %91 {offsets = [0, 48], sizes = [2, 16], strides = [1, 1]} : vector<2x64xf32> to vector<2x16xf32>
      %102 = math.tanh %101 : vector<2x16xf32>
      %103 = arith.mulf %99, %85 : vector<2x16xf32>
      %104 = arith.mulf %98, %102 : vector<2x16xf32>
      %105 = arith.addf %103, %104 : vector<2x16xf32>
      %106 = math.tanh %105 : vector<2x16xf32>
      %107 = arith.mulf %100, %106 : vector<2x16xf32>
      %108 = vector.extract_strided_slice %35 {offsets = [6, 0], sizes = [2, 64], strides = [1, 1]} : vector<16x64xf32> to vector<2x64xf32>
      %109 = arith.truncf %107 : vector<2x16xf32> to vector<2x16xbf16>
      %cst_48 = arith.constant dense<0.000000e+00> : vector<2x64xf32>
      %110 = tpu.matmul %109, %37, %cst_48 {dimension_numbers = #tpu.dot_dimension_numbers<[1], [0], [0], [1], [0, 0, 1, 1], [], []>} : vector<2x16xbf16>, vector<16x64xbf16>, vector<2x64xf32> -> vector<2x64xf32>
      %111 = arith.addf %108, %110 : vector<2x64xf32>
      %112 = vector.extract_strided_slice %111 {offsets = [0, 0], sizes = [2, 48], strides = [1, 1]} : vector<2x64xf32> to vector<2x48xf32>
      %113 = arith.negf %112 : vector<2x48xf32>
      %114 = math.exp %113 : vector<2x48xf32>
      %cst_49 = arith.constant 1.000000e+00 : f32
      %115 = vector.broadcast %cst_49 : f32 to vector<2x48xf32>
      %116 = arith.addf %115, %114 : vector<2x48xf32>
      %117 = arith.divf %115, %116 : vector<2x48xf32>
      %118 = vector.extract_strided_slice %117 {offsets = [0, 0], sizes = [2, 16], strides = [1, 1]} : vector<2x48xf32> to vector<2x16xf32>
      %119 = vector.extract_strided_slice %117 {offsets = [0, 16], sizes = [2, 16], strides = [1, 1]} : vector<2x48xf32> to vector<2x16xf32>
      %120 = vector.extract_strided_slice %117 {offsets = [0, 32], sizes = [2, 16], strides = [1, 1]} : vector<2x48xf32> to vector<2x16xf32>
      %121 = vector.extract_strided_slice %111 {offsets = [0, 48], sizes = [2, 16], strides = [1, 1]} : vector<2x64xf32> to vector<2x16xf32>
      %122 = math.tanh %121 : vector<2x16xf32>
      %123 = arith.mulf %119, %105 : vector<2x16xf32>
      %124 = arith.mulf %118, %122 : vector<2x16xf32>
      %125 = arith.addf %123, %124 : vector<2x16xf32>
      %126 = math.tanh %125 : vector<2x16xf32>
      %127 = arith.mulf %120, %126 : vector<2x16xf32>
      %128 = vector.extract_strided_slice %35 {offsets = [8, 0], sizes = [2, 64], strides = [1, 1]} : vector<16x64xf32> to vector<2x64xf32>
      %129 = arith.truncf %127 : vector<2x16xf32> to vector<2x16xbf16>
      %cst_50 = arith.constant dense<0.000000e+00> : vector<2x64xf32>
      %130 = tpu.matmul %129, %37, %cst_50 {dimension_numbers = #tpu.dot_dimension_numbers<[1], [0], [0], [1], [0, 0, 1, 1], [], []>} : vector<2x16xbf16>, vector<16x64xbf16>, vector<2x64xf32> -> vector<2x64xf32>
      %131 = arith.addf %128, %130 : vector<2x64xf32>
      %132 = vector.extract_strided_slice %131 {offsets = [0, 0], sizes = [2, 48], strides = [1, 1]} : vector<2x64xf32> to vector<2x48xf32>
      %133 = arith.negf %132 : vector<2x48xf32>
      %134 = math.exp %133 : vector<2x48xf32>
      %cst_51 = arith.constant 1.000000e+00 : f32
      %135 = vector.broadcast %cst_51 : f32 to vector<2x48xf32>
      %136 = arith.addf %135, %134 : vector<2x48xf32>
      %137 = arith.divf %135, %136 : vector<2x48xf32>
      %138 = vector.extract_strided_slice %137 {offsets = [0, 0], sizes = [2, 16], strides = [1, 1]} : vector<2x48xf32> to vector<2x16xf32>
      %139 = vector.extract_strided_slice %137 {offsets = [0, 16], sizes = [2, 16], strides = [1, 1]} : vector<2x48xf32> to vector<2x16xf32>
      %140 = vector.extract_strided_slice %137 {offsets = [0, 32], sizes = [2, 16], strides = [1, 1]} : vector<2x48xf32> to vector<2x16xf32>
      %141 = vector.extract_strided_slice %131 {offsets = [0, 48], sizes = [2, 16], strides = [1, 1]} : vector<2x64xf32> to vector<2x16xf32>
      %142 = math.tanh %141 : vector<2x16xf32>
      %143 = arith.mulf %139, %125 : vector<2x16xf32>
      %144 = arith.mulf %138, %142 : vector<2x16xf32>
      %145 = arith.addf %143, %144 : vector<2x16xf32>
      %146 = math.tanh %145 : vector<2x16xf32>
      %147 = arith.mulf %140, %146 : vector<2x16xf32>
      %148 = vector.extract_strided_slice %35 {offsets = [10, 0], sizes = [2, 64], strides = [1, 1]} : vector<16x64xf32> to vector<2x64xf32>
      %149 = arith.truncf %147 : vector<2x16xf32> to vector<2x16xbf16>
      %cst_52 = arith.constant dense<0.000000e+00> : vector<2x64xf32>
      %150 = tpu.matmul %149, %37, %cst_52 {dimension_numbers = #tpu.dot_dimension_numbers<[1], [0], [0], [1], [0, 0, 1, 1], [], []>} : vector<2x16xbf16>, vector<16x64xbf16>, vector<2x64xf32> -> vector<2x64xf32>
      %151 = arith.addf %148, %150 : vector<2x64xf32>
      %152 = vector.extract_strided_slice %151 {offsets = [0, 0], sizes = [2, 48], strides = [1, 1]} : vector<2x64xf32> to vector<2x48xf32>
      %153 = arith.negf %152 : vector<2x48xf32>
      %154 = math.exp %153 : vector<2x48xf32>
      %cst_53 = arith.constant 1.000000e+00 : f32
      %155 = vector.broadcast %cst_53 : f32 to vector<2x48xf32>
      %156 = arith.addf %155, %154 : vector<2x48xf32>
      %157 = arith.divf %155, %156 : vector<2x48xf32>
      %158 = vector.extract_strided_slice %157 {offsets = [0, 0], sizes = [2, 16], strides = [1, 1]} : vector<2x48xf32> to vector<2x16xf32>
      %159 = vector.extract_strided_slice %157 {offsets = [0, 16], sizes = [2, 16], strides = [1, 1]} : vector<2x48xf32> to vector<2x16xf32>
      %160 = vector.extract_strided_slice %157 {offsets = [0, 32], sizes = [2, 16], strides = [1, 1]} : vector<2x48xf32> to vector<2x16xf32>
      %161 = vector.extract_strided_slice %151 {offsets = [0, 48], sizes = [2, 16], strides = [1, 1]} : vector<2x64xf32> to vector<2x16xf32>
      %162 = math.tanh %161 : vector<2x16xf32>
      %163 = arith.mulf %159, %145 : vector<2x16xf32>
      %164 = arith.mulf %158, %162 : vector<2x16xf32>
      %165 = arith.addf %163, %164 : vector<2x16xf32>
      %166 = math.tanh %165 : vector<2x16xf32>
      %167 = arith.mulf %160, %166 : vector<2x16xf32>
      %168 = vector.extract_strided_slice %35 {offsets = [12, 0], sizes = [2, 64], strides = [1, 1]} : vector<16x64xf32> to vector<2x64xf32>
      %169 = arith.truncf %167 : vector<2x16xf32> to vector<2x16xbf16>
      %cst_54 = arith.constant dense<0.000000e+00> : vector<2x64xf32>
      %170 = tpu.matmul %169, %37, %cst_54 {dimension_numbers = #tpu.dot_dimension_numbers<[1], [0], [0], [1], [0, 0, 1, 1], [], []>} : vector<2x16xbf16>, vector<16x64xbf16>, vector<2x64xf32> -> vector<2x64xf32>
      %171 = arith.addf %168, %170 : vector<2x64xf32>
      %172 = vector.extract_strided_slice %171 {offsets = [0, 0], sizes = [2, 48], strides = [1, 1]} : vector<2x64xf32> to vector<2x48xf32>
      %173 = arith.negf %172 : vector<2x48xf32>
      %174 = math.exp %173 : vector<2x48xf32>
      %cst_55 = arith.constant 1.000000e+00 : f32
      %175 = vector.broadcast %cst_55 : f32 to vector<2x48xf32>
      %176 = arith.addf %175, %174 : vector<2x48xf32>
      %177 = arith.divf %175, %176 : vector<2x48xf32>
      %178 = vector.extract_strided_slice %177 {offsets = [0, 0], sizes = [2, 16], strides = [1, 1]} : vector<2x48xf32> to vector<2x16xf32>
      %179 = vector.extract_strided_slice %177 {offsets = [0, 16], sizes = [2, 16], strides = [1, 1]} : vector<2x48xf32> to vector<2x16xf32>
      %180 = vector.extract_strided_slice %177 {offsets = [0, 32], sizes = [2, 16], strides = [1, 1]} : vector<2x48xf32> to vector<2x16xf32>
      %181 = vector.extract_strided_slice %171 {offsets = [0, 48], sizes = [2, 16], strides = [1, 1]} : vector<2x64xf32> to vector<2x16xf32>
      %182 = math.tanh %181 : vector<2x16xf32>
      %183 = arith.mulf %179, %165 : vector<2x16xf32>
      %184 = arith.mulf %178, %182 : vector<2x16xf32>
      %185 = arith.addf %183, %184 : vector<2x16xf32>
      %186 = math.tanh %185 : vector<2x16xf32>
      %187 = arith.mulf %180, %186 : vector<2x16xf32>
      %188 = vector.extract_strided_slice %35 {offsets = [14, 0], sizes = [2, 64], strides = [1, 1]} : vector<16x64xf32> to vector<2x64xf32>
      %189 = arith.truncf %187 : vector<2x16xf32> to vector<2x16xbf16>
      %cst_56 = arith.constant dense<0.000000e+00> : vector<2x64xf32>
      %190 = tpu.matmul %189, %37, %cst_56 {dimension_numbers = #tpu.dot_dimension_numbers<[1], [0], [0], [1], [0, 0, 1, 1], [], []>} : vector<2x16xbf16>, vector<16x64xbf16>, vector<2x64xf32> -> vector<2x64xf32>
      %191 = arith.addf %188, %190 : vector<2x64xf32>
      %192 = vector.extract_strided_slice %191 {offsets = [0, 0], sizes = [2, 48], strides = [1, 1]} : vector<2x64xf32> to vector<2x48xf32>
      %193 = arith.negf %192 : vector<2x48xf32>
      %194 = math.exp %193 : vector<2x48xf32>
      %cst_57 = arith.constant 1.000000e+00 : f32
      %195 = vector.broadcast %cst_57 : f32 to vector<2x48xf32>
      %196 = arith.addf %195, %194 : vector<2x48xf32>
      %197 = arith.divf %195, %196 : vector<2x48xf32>
      %198 = vector.extract_strided_slice %197 {offsets = [0, 0], sizes = [2, 16], strides = [1, 1]} : vector<2x48xf32> to vector<2x16xf32>
      %199 = vector.extract_strided_slice %197 {offsets = [0, 16], sizes = [2, 16], strides = [1, 1]} : vector<2x48xf32> to vector<2x16xf32>
      %200 = vector.extract_strided_slice %197 {offsets = [0, 32], sizes = [2, 16], strides = [1, 1]} : vector<2x48xf32> to vector<2x16xf32>
      %201 = vector.extract_strided_slice %191 {offsets = [0, 48], sizes = [2, 16], strides = [1, 1]} : vector<2x64xf32> to vector<2x16xf32>
      %202 = math.tanh %201 : vector<2x16xf32>
      %203 = arith.mulf %199, %185 : vector<2x16xf32>
      %204 = arith.mulf %198, %202 : vector<2x16xf32>
      %205 = arith.addf %203, %204 : vector<2x16xf32>
      %206 = math.tanh %205 : vector<2x16xf32>
      %207 = arith.mulf %200, %206 : vector<2x16xf32>
      %208 = tpu.concatenate %67, %87, %107, %127, %147, %167, %187, %207 in 0 : vector<2x16xf32>, vector<2x16xf32>, vector<2x16xf32>, vector<2x16xf32>, vector<2x16xf32>, vector<2x16xf32>, vector<2x16xf32>, vector<2x16xf32> -> vector<16x16xf32>
      %209 = arith.truncf %208 : vector<16x16xf32> to vector<16x16xbf16>
      %cst_58 = arith.constant dense<0.000000e+00> : vector<16x36xf32>
      %210 = tpu.matmul %209, %39, %cst_58 {dimension_numbers = #tpu.dot_dimension_numbers<[1], [0], [0], [1], [0, 0, 1, 1], [], []>} : vector<16x16xbf16>, vector<16x36xbf16>, vector<16x36xf32> -> vector<16x36xf32>
      %c0_59 = arith.constant 0 : index
      %c0_60 = arith.constant 0 : index
      %c0_61 = arith.constant 0 : index
      %211 = vector.load %arg16[%c0_59, %c0_60, %c0_61] : memref<1x16x36xf32, #tpu.memory_space<vmem>>, vector<1x16x36xf32>
      %212 = vector.shape_cast %211 : vector<1x16x36xf32> to vector<16x36xf32>
      %213 = vector.shape_cast %210 : vector<16x36xf32> to vector<1x16x36xf32>
      tpu.vector_store %arg16[%c0_59, %c0_60, %c0_61], %213 {strides = array<i32>} : memref<1x16x36xf32, #tpu.memory_space<vmem>>, vector<1x16x36xf32>,
    } else {
    }
    %c1_i32 = arith.constant 1 : i32
    %43 = arith.cmpi eq, %arg0, %c1_i32 : i32
    %44 = arith.extui %43 : i1 to i32
    %c0_i32_39 = arith.constant 0 : i32
    %45 = arith.cmpi ne, %44, %c0_i32_39 : i32
    scf.if %45 {
      %cst_40 = arith.constant 0.000000e+00 : f32
      %46 = vector.broadcast %cst_40 : f32 to vector<2x16xf32>
      %cst_41 = arith.constant 0.000000e+00 : f32
      %47 = vector.broadcast %cst_41 : f32 to vector<2x16xf32>
      %48 = vector.extract_strided_slice %35 {offsets = [14, 0], sizes = [2, 64], strides = [1, 1]} : vector<16x64xf32> to vector<2x64xf32>
      %49 = arith.truncf %46 : vector<2x16xf32> to vector<2x16xbf16>
      %cst_42 = arith.constant dense<0.000000e+00> : vector<2x64xf32>
      %50 = tpu.matmul %49, %37, %cst_42 {dimension_numbers = #tpu.dot_dimension_numbers<[1], [0], [0], [1], [0, 0, 1, 1], [], []>} : vector<2x16xbf16>, vector<16x64xbf16>, vector<2x64xf32> -> vector<2x64xf32>
      %51 = arith.addf %48, %50 : vector<2x64xf32>
      %52 = vector.extract_strided_slice %51 {offsets = [0, 0], sizes = [2, 48], strides = [1, 1]} : vector<2x64xf32> to vector<2x48xf32>
      %53 = arith.negf %52 : vector<2x48xf32>
      %54 = math.exp %53 : vector<2x48xf32>
      %cst_43 = arith.constant 1.000000e+00 : f32
      %55 = vector.broadcast %cst_43 : f32 to vector<2x48xf32>
      %56 = arith.addf %55, %54 : vector<2x48xf32>
      %57 = arith.divf %55, %56 : vector<2x48xf32>
      %58 = vector.extract_strided_slice %57 {offsets = [0, 0], sizes = [2, 16], strides = [1, 1]} : vector<2x48xf32> to vector<2x16xf32>
      %59 = vector.extract_strided_slice %57 {offsets = [0, 16], sizes = [2, 16], strides = [1, 1]} : vector<2x48xf32> to vector<2x16xf32>
      %60 = vector.extract_strided_slice %57 {offsets = [0, 32], sizes = [2, 16], strides = [1, 1]} : vector<2x48xf32> to vector<2x16xf32>
      %61 = vector.extract_strided_slice %51 {offsets = [0, 48], sizes = [2, 16], strides = [1, 1]} : vector<2x64xf32> to vector<2x16xf32>
      %62 = math.tanh %61 : vector<2x16xf32>
      %63 = arith.mulf %59, %47 : vector<2x16xf32>
      %64 = arith.mulf %58, %62 : vector<2x16xf32>
      %65 = arith.addf %63, %64 : vector<2x16xf32>
      %66 = math.tanh %65 : vector<2x16xf32>
      %67 = arith.mulf %60, %66 : vector<2x16xf32>
      %68 = vector.extract_strided_slice %35 {offsets = [12, 0], sizes = [2, 64], strides = [1, 1]} : vector<16x64xf32> to vector<2x64xf32>
      %69 = arith.truncf %67 : vector<2x16xf32> to vector<2x16xbf16>
      %cst_44 = arith.constant dense<0.000000e+00> : vector<2x64xf32>
      %70 = tpu.matmul %69, %37, %cst_44 {dimension_numbers = #tpu.dot_dimension_numbers<[1], [0], [0], [1], [0, 0, 1, 1], [], []>} : vector<2x16xbf16>, vector<16x64xbf16>, vector<2x64xf32> -> vector<2x64xf32>
      %71 = arith.addf %68, %70 : vector<2x64xf32>
      %72 = vector.extract_strided_slice %71 {offsets = [0, 0], sizes = [2, 48], strides = [1, 1]} : vector<2x64xf32> to vector<2x48xf32>
      %73 = arith.negf %72 : vector<2x48xf32>
      %74 = math.exp %73 : vector<2x48xf32>
      %cst_45 = arith.constant 1.000000e+00 : f32
      %75 = vector.broadcast %cst_45 : f32 to vector<2x48xf32>
      %76 = arith.addf %75, %74 : vector<2x48xf32>
      %77 = arith.divf %75, %76 : vector<2x48xf32>
      %78 = vector.extract_strided_slice %77 {offsets = [0, 0], sizes = [2, 16], strides = [1, 1]} : vector<2x48xf32> to vector<2x16xf32>
      %79 = vector.extract_strided_slice %77 {offsets = [0, 16], sizes = [2, 16], strides = [1, 1]} : vector<2x48xf32> to vector<2x16xf32>
      %80 = vector.extract_strided_slice %77 {offsets = [0, 32], sizes = [2, 16], strides = [1, 1]} : vector<2x48xf32> to vector<2x16xf32>
      %81 = vector.extract_strided_slice %71 {offsets = [0, 48], sizes = [2, 16], strides = [1, 1]} : vector<2x64xf32> to vector<2x16xf32>
      %82 = math.tanh %81 : vector<2x16xf32>
      %83 = arith.mulf %79, %65 : vector<2x16xf32>
      %84 = arith.mulf %78, %82 : vector<2x16xf32>
      %85 = arith.addf %83, %84 : vector<2x16xf32>
      %86 = math.tanh %85 : vector<2x16xf32>
      %87 = arith.mulf %80, %86 : vector<2x16xf32>
      %88 = vector.extract_strided_slice %35 {offsets = [10, 0], sizes = [2, 64], strides = [1, 1]} : vector<16x64xf32> to vector<2x64xf32>
      %89 = arith.truncf %87 : vector<2x16xf32> to vector<2x16xbf16>
      %cst_46 = arith.constant dense<0.000000e+00> : vector<2x64xf32>
      %90 = tpu.matmul %89, %37, %cst_46 {dimension_numbers = #tpu.dot_dimension_numbers<[1], [0], [0], [1], [0, 0, 1, 1], [], []>} : vector<2x16xbf16>, vector<16x64xbf16>, vector<2x64xf32> -> vector<2x64xf32>
      %91 = arith.addf %88, %90 : vector<2x64xf32>
      %92 = vector.extract_strided_slice %91 {offsets = [0, 0], sizes = [2, 48], strides = [1, 1]} : vector<2x64xf32> to vector<2x48xf32>
      %93 = arith.negf %92 : vector<2x48xf32>
      %94 = math.exp %93 : vector<2x48xf32>
      %cst_47 = arith.constant 1.000000e+00 : f32
      %95 = vector.broadcast %cst_47 : f32 to vector<2x48xf32>
      %96 = arith.addf %95, %94 : vector<2x48xf32>
      %97 = arith.divf %95, %96 : vector<2x48xf32>
      %98 = vector.extract_strided_slice %97 {offsets = [0, 0], sizes = [2, 16], strides = [1, 1]} : vector<2x48xf32> to vector<2x16xf32>
      %99 = vector.extract_strided_slice %97 {offsets = [0, 16], sizes = [2, 16], strides = [1, 1]} : vector<2x48xf32> to vector<2x16xf32>
      %100 = vector.extract_strided_slice %97 {offsets = [0, 32], sizes = [2, 16], strides = [1, 1]} : vector<2x48xf32> to vector<2x16xf32>
      %101 = vector.extract_strided_slice %91 {offsets = [0, 48], sizes = [2, 16], strides = [1, 1]} : vector<2x64xf32> to vector<2x16xf32>
      %102 = math.tanh %101 : vector<2x16xf32>
      %103 = arith.mulf %99, %85 : vector<2x16xf32>
      %104 = arith.mulf %98, %102 : vector<2x16xf32>
      %105 = arith.addf %103, %104 : vector<2x16xf32>
      %106 = math.tanh %105 : vector<2x16xf32>
      %107 = arith.mulf %100, %106 : vector<2x16xf32>
      %108 = vector.extract_strided_slice %35 {offsets = [8, 0], sizes = [2, 64], strides = [1, 1]} : vector<16x64xf32> to vector<2x64xf32>
      %109 = arith.truncf %107 : vector<2x16xf32> to vector<2x16xbf16>
      %cst_48 = arith.constant dense<0.000000e+00> : vector<2x64xf32>
      %110 = tpu.matmul %109, %37, %cst_48 {dimension_numbers = #tpu.dot_dimension_numbers<[1], [0], [0], [1], [0, 0, 1, 1], [], []>} : vector<2x16xbf16>, vector<16x64xbf16>, vector<2x64xf32> -> vector<2x64xf32>
      %111 = arith.addf %108, %110 : vector<2x64xf32>
      %112 = vector.extract_strided_slice %111 {offsets = [0, 0], sizes = [2, 48], strides = [1, 1]} : vector<2x64xf32> to vector<2x48xf32>
      %113 = arith.negf %112 : vector<2x48xf32>
      %114 = math.exp %113 : vector<2x48xf32>
      %cst_49 = arith.constant 1.000000e+00 : f32
      %115 = vector.broadcast %cst_49 : f32 to vector<2x48xf32>
      %116 = arith.addf %115, %114 : vector<2x48xf32>
      %117 = arith.divf %115, %116 : vector<2x48xf32>
      %118 = vector.extract_strided_slice %117 {offsets = [0, 0], sizes = [2, 16], strides = [1, 1]} : vector<2x48xf32> to vector<2x16xf32>
      %119 = vector.extract_strided_slice %117 {offsets = [0, 16], sizes = [2, 16], strides = [1, 1]} : vector<2x48xf32> to vector<2x16xf32>
      %120 = vector.extract_strided_slice %117 {offsets = [0, 32], sizes = [2, 16], strides = [1, 1]} : vector<2x48xf32> to vector<2x16xf32>
      %121 = vector.extract_strided_slice %111 {offsets = [0, 48], sizes = [2, 16], strides = [1, 1]} : vector<2x64xf32> to vector<2x16xf32>
      %122 = math.tanh %121 : vector<2x16xf32>
      %123 = arith.mulf %119, %105 : vector<2x16xf32>
      %124 = arith.mulf %118, %122 : vector<2x16xf32>
      %125 = arith.addf %123, %124 : vector<2x16xf32>
      %126 = math.tanh %125 : vector<2x16xf32>
      %127 = arith.mulf %120, %126 : vector<2x16xf32>
      %128 = vector.extract_strided_slice %35 {offsets = [6, 0], sizes = [2, 64], strides = [1, 1]} : vector<16x64xf32> to vector<2x64xf32>
      %129 = arith.truncf %127 : vector<2x16xf32> to vector<2x16xbf16>
      %cst_50 = arith.constant dense<0.000000e+00> : vector<2x64xf32>
      %130 = tpu.matmul %129, %37, %cst_50 {dimension_numbers = #tpu.dot_dimension_numbers<[1], [0], [0], [1], [0, 0, 1, 1], [], []>} : vector<2x16xbf16>, vector<16x64xbf16>, vector<2x64xf32> -> vector<2x64xf32>
      %131 = arith.addf %128, %130 : vector<2x64xf32>
      %132 = vector.extract_strided_slice %131 {offsets = [0, 0], sizes = [2, 48], strides = [1, 1]} : vector<2x64xf32> to vector<2x48xf32>
      %133 = arith.negf %132 : vector<2x48xf32>
      %134 = math.exp %133 : vector<2x48xf32>
      %cst_51 = arith.constant 1.000000e+00 : f32
      %135 = vector.broadcast %cst_51 : f32 to vector<2x48xf32>
      %136 = arith.addf %135, %134 : vector<2x48xf32>
      %137 = arith.divf %135, %136 : vector<2x48xf32>
      %138 = vector.extract_strided_slice %137 {offsets = [0, 0], sizes = [2, 16], strides = [1, 1]} : vector<2x48xf32> to vector<2x16xf32>
      %139 = vector.extract_strided_slice %137 {offsets = [0, 16], sizes = [2, 16], strides = [1, 1]} : vector<2x48xf32> to vector<2x16xf32>
      %140 = vector.extract_strided_slice %137 {offsets = [0, 32], sizes = [2, 16], strides = [1, 1]} : vector<2x48xf32> to vector<2x16xf32>
      %141 = vector.extract_strided_slice %131 {offsets = [0, 48], sizes = [2, 16], strides = [1, 1]} : vector<2x64xf32> to vector<2x16xf32>
      %142 = math.tanh %141 : vector<2x16xf32>
      %143 = arith.mulf %139, %125 : vector<2x16xf32>
      %144 = arith.mulf %138, %142 : vector<2x16xf32>
      %145 = arith.addf %143, %144 : vector<2x16xf32>
      %146 = math.tanh %145 : vector<2x16xf32>
      %147 = arith.mulf %140, %146 : vector<2x16xf32>
      %148 = vector.extract_strided_slice %35 {offsets = [4, 0], sizes = [2, 64], strides = [1, 1]} : vector<16x64xf32> to vector<2x64xf32>
      %149 = arith.truncf %147 : vector<2x16xf32> to vector<2x16xbf16>
      %cst_52 = arith.constant dense<0.000000e+00> : vector<2x64xf32>
      %150 = tpu.matmul %149, %37, %cst_52 {dimension_numbers = #tpu.dot_dimension_numbers<[1], [0], [0], [1], [0, 0, 1, 1], [], []>} : vector<2x16xbf16>, vector<16x64xbf16>, vector<2x64xf32> -> vector<2x64xf32>
      %151 = arith.addf %148, %150 : vector<2x64xf32>
      %152 = vector.extract_strided_slice %151 {offsets = [0, 0], sizes = [2, 48], strides = [1, 1]} : vector<2x64xf32> to vector<2x48xf32>
      %153 = arith.negf %152 : vector<2x48xf32>
      %154 = math.exp %153 : vector<2x48xf32>
      %cst_53 = arith.constant 1.000000e+00 : f32
      %155 = vector.broadcast %cst_53 : f32 to vector<2x48xf32>
      %156 = arith.addf %155, %154 : vector<2x48xf32>
      %157 = arith.divf %155, %156 : vector<2x48xf32>
      %158 = vector.extract_strided_slice %157 {offsets = [0, 0], sizes = [2, 16], strides = [1, 1]} : vector<2x48xf32> to vector<2x16xf32>
      %159 = vector.extract_strided_slice %157 {offsets = [0, 16], sizes = [2, 16], strides = [1, 1]} : vector<2x48xf32> to vector<2x16xf32>
      %160 = vector.extract_strided_slice %157 {offsets = [0, 32], sizes = [2, 16], strides = [1, 1]} : vector<2x48xf32> to vector<2x16xf32>
      %161 = vector.extract_strided_slice %151 {offsets = [0, 48], sizes = [2, 16], strides = [1, 1]} : vector<2x64xf32> to vector<2x16xf32>
      %162 = math.tanh %161 : vector<2x16xf32>
      %163 = arith.mulf %159, %145 : vector<2x16xf32>
      %164 = arith.mulf %158, %162 : vector<2x16xf32>
      %165 = arith.addf %163, %164 : vector<2x16xf32>
      %166 = math.tanh %165 : vector<2x16xf32>
      %167 = arith.mulf %160, %166 : vector<2x16xf32>
      %168 = vector.extract_strided_slice %35 {offsets = [2, 0], sizes = [2, 64], strides = [1, 1]} : vector<16x64xf32> to vector<2x64xf32>
      %169 = arith.truncf %167 : vector<2x16xf32> to vector<2x16xbf16>
      %cst_54 = arith.constant dense<0.000000e+00> : vector<2x64xf32>
      %170 = tpu.matmul %169, %37, %cst_54 {dimension_numbers = #tpu.dot_dimension_numbers<[1], [0], [0], [1], [0, 0, 1, 1], [], []>} : vector<2x16xbf16>, vector<16x64xbf16>, vector<2x64xf32> -> vector<2x64xf32>
      %171 = arith.addf %168, %170 : vector<2x64xf32>
      %172 = vector.extract_strided_slice %171 {offsets = [0, 0], sizes = [2, 48], strides = [1, 1]} : vector<2x64xf32> to vector<2x48xf32>
      %173 = arith.negf %172 : vector<2x48xf32>
      %174 = math.exp %173 : vector<2x48xf32>
      %cst_55 = arith.constant 1.000000e+00 : f32
      %175 = vector.broadcast %cst_55 : f32 to vector<2x48xf32>
      %176 = arith.addf %175, %174 : vector<2x48xf32>
      %177 = arith.divf %175, %176 : vector<2x48xf32>
      %178 = vector.extract_strided_slice %177 {offsets = [0, 0], sizes = [2, 16], strides = [1, 1]} : vector<2x48xf32> to vector<2x16xf32>
      %179 = vector.extract_strided_slice %177 {offsets = [0, 16], sizes = [2, 16], strides = [1, 1]} : vector<2x48xf32> to vector<2x16xf32>
      %180 = vector.extract_strided_slice %177 {offsets = [0, 32], sizes = [2, 16], strides = [1, 1]} : vector<2x48xf32> to vector<2x16xf32>
      %181 = vector.extract_strided_slice %171 {offsets = [0, 48], sizes = [2, 16], strides = [1, 1]} : vector<2x64xf32> to vector<2x16xf32>
      %182 = math.tanh %181 : vector<2x16xf32>
      %183 = arith.mulf %179, %165 : vector<2x16xf32>
      %184 = arith.mulf %178, %182 : vector<2x16xf32>
      %185 = arith.addf %183, %184 : vector<2x16xf32>
      %186 = math.tanh %185 : vector<2x16xf32>
      %187 = arith.mulf %180, %186 : vector<2x16xf32>
      %188 = vector.extract_strided_slice %35 {offsets = [0, 0], sizes = [2, 64], strides = [1, 1]} : vector<16x64xf32> to vector<2x64xf32>
      %189 = arith.truncf %187 : vector<2x16xf32> to vector<2x16xbf16>
      %cst_56 = arith.constant dense<0.000000e+00> : vector<2x64xf32>
      %190 = tpu.matmul %189, %37, %cst_56 {dimension_numbers = #tpu.dot_dimension_numbers<[1], [0], [0], [1], [0, 0, 1, 1], [], []>} : vector<2x16xbf16>, vector<16x64xbf16>, vector<2x64xf32> -> vector<2x64xf32>
      %191 = arith.addf %188, %190 : vector<2x64xf32>
      %192 = vector.extract_strided_slice %191 {offsets = [0, 0], sizes = [2, 48], strides = [1, 1]} : vector<2x64xf32> to vector<2x48xf32>
      %193 = arith.negf %192 : vector<2x48xf32>
      %194 = math.exp %193 : vector<2x48xf32>
      %cst_57 = arith.constant 1.000000e+00 : f32
      %195 = vector.broadcast %cst_57 : f32 to vector<2x48xf32>
      %196 = arith.addf %195, %194 : vector<2x48xf32>
      %197 = arith.divf %195, %196 : vector<2x48xf32>
      %198 = vector.extract_strided_slice %197 {offsets = [0, 0], sizes = [2, 16], strides = [1, 1]} : vector<2x48xf32> to vector<2x16xf32>
      %199 = vector.extract_strided_slice %197 {offsets = [0, 16], sizes = [2, 16], strides = [1, 1]} : vector<2x48xf32> to vector<2x16xf32>
      %200 = vector.extract_strided_slice %197 {offsets = [0, 32], sizes = [2, 16], strides = [1, 1]} : vector<2x48xf32> to vector<2x16xf32>
      %201 = vector.extract_strided_slice %191 {offsets = [0, 48], sizes = [2, 16], strides = [1, 1]} : vector<2x64xf32> to vector<2x16xf32>
      %202 = math.tanh %201 : vector<2x16xf32>
      %203 = arith.mulf %199, %185 : vector<2x16xf32>
      %204 = arith.mulf %198, %202 : vector<2x16xf32>
      %205 = arith.addf %203, %204 : vector<2x16xf32>
      %206 = math.tanh %205 : vector<2x16xf32>
      %207 = arith.mulf %200, %206 : vector<2x16xf32>
      %208 = tpu.concatenate %207, %187, %167, %147, %127, %107, %87, %67 in 0 : vector<2x16xf32>, vector<2x16xf32>, vector<2x16xf32>, vector<2x16xf32>, vector<2x16xf32>, vector<2x16xf32>, vector<2x16xf32>, vector<2x16xf32> -> vector<16x16xf32>
      %209 = arith.truncf %208 : vector<16x16xf32> to vector<16x16xbf16>
      %cst_58 = arith.constant dense<0.000000e+00> : vector<16x36xf32>
      %210 = tpu.matmul %209, %39, %cst_58 {dimension_numbers = #tpu.dot_dimension_numbers<[1], [0], [0], [1], [0, 0, 1, 1], [], []>} : vector<16x16xbf16>, vector<16x36xbf16>, vector<16x36xf32> -> vector<16x36xf32>
      %c0_59 = arith.constant 0 : index
      %c0_60 = arith.constant 0 : index
      %c0_61 = arith.constant 0 : index
      %211 = vector.load %arg16[%c0_59, %c0_60, %c0_61] : memref<1x16x36xf32, #tpu.memory_space<vmem>>, vector<1x16x36xf32>
      %212 = vector.shape_cast %211 : vector<1x16x36xf32> to vector<16x36xf32>
      %213 = vector.shape_cast %210 : vector<16x36xf32> to vector<1x16x36xf32>
      tpu.vector_store %arg16[%c0_59, %c0_60, %c0_61], %213 {strides = array<i32>} : memref<1x16x36xf32, #tpu.memory_space<vmem>>, vector<1x16x36xf32>,
    } else {
    }
    return
  }
  func.func @transform_0(%arg0: i32) -> (i32, i32) {
    %c0_i32 = arith.constant 0 : i32
    %c0_i32_0 = arith.constant 0 : i32
    %c0_i32_1 = arith.constant 0 : i32
    return %c0_i32, %c0_i32_0 : i32, i32
  }
  func.func @transform_1(%arg0: i32) -> (i32, i32) {
    %c0_i32 = arith.constant 0 : i32
    %c0_i32_0 = arith.constant 0 : i32
    %c0_i32_1 = arith.constant 0 : i32
    return %c0_i32, %c0_i32_0 : i32, i32
  }
  func.func @transform_2(%arg0: i32) -> (i32, i32) {
    %c0_i32 = arith.constant 0 : i32
    %c0_i32_0 = arith.constant 0 : i32
    %c0_i32_1 = arith.constant 0 : i32
    return %c0_i32, %c0_i32_0 : i32, i32
  }
  func.func @transform_3(%arg0: i32) -> (i32, i32) {
    %c0_i32 = arith.constant 0 : i32
    %c0_i32_0 = arith.constant 0 : i32
    %c0_i32_1 = arith.constant 0 : i32
    return %c0_i32, %c0_i32_0 : i32, i32
  }
  func.func @transform_4(%arg0: i32) -> (i32, i32) {
    %c0_i32 = arith.constant 0 : i32
    %c0_i32_0 = arith.constant 0 : i32
    %c0_i32_1 = arith.constant 0 : i32
    return %c0_i32, %c0_i32_0 : i32, i32
  }
  func.func @transform_5(%arg0: i32) -> (i32, i32) {
    %c0_i32 = arith.constant 0 : i32
    %c0_i32_0 = arith.constant 0 : i32
    %c0_i32_1 = arith.constant 0 : i32
    return %c0_i32, %c0_i32_0 : i32, i32
  }
  func.func @transform_6(%arg0: i32) -> (i32, i32) {
    %c0_i32 = arith.constant 0 : i32
    %c0_i32_0 = arith.constant 0 : i32
    %c0_i32_1 = arith.constant 0 : i32
    return %c0_i32, %c0_i32_0 : i32, i32
  }
  func.func @transform_7(%arg0: i32) -> (i32, i32) {
    %c0_i32 = arith.constant 0 : i32
    %c0_i32_0 = arith.constant 0 : i32
    %c0_i32_1 = arith.constant 0 : i32
    return %c0_i32, %c0_i32_0 : i32, i32
  }
  func.func @transform_8(%arg0: i32) -> (i32, i32) {
    %c0_i32 = arith.constant 0 : i32
    %c0_i32_0 = arith.constant 0 : i32
    %c0_i32_1 = arith.constant 0 : i32
    return %c0_i32, %c0_i32_0 : i32, i32
  }
  func.func @transform_9(%arg0: i32) -> (i32, i32) {
    %c0_i32 = arith.constant 0 : i32
    %c0_i32_0 = arith.constant 0 : i32
    %c0_i32_1 = arith.constant 0 : i32
    return %c0_i32, %c0_i32_0 : i32, i32
  }
  func.func @transform_10(%arg0: i32) -> (i32, i32) {
    %c0_i32 = arith.constant 0 : i32
    %c0_i32_0 = arith.constant 0 : i32
    %c0_i32_1 = arith.constant 0 : i32
    return %c0_i32, %c0_i32_0 : i32, i32
  }
  func.func @transform_11(%arg0: i32) -> (i32, i32, i32) {
    %c0_i32 = arith.constant 0 : i32
    %c0_i32_0 = arith.constant 0 : i32
    %c0_i32_1 = arith.constant 0 : i32
    return %arg0, %c0_i32, %c0_i32_0 : i32, i32, i32
  }
  func.func @transform_12(%arg0: i32) -> (i32, i32, i32) {
    %c0_i32 = arith.constant 0 : i32
    %c0_i32_0 = arith.constant 0 : i32
    %c0_i32_1 = arith.constant 0 : i32
    return %arg0, %c0_i32, %c0_i32_0 : i32, i32, i32
  }
  func.func @transform_13(%arg0: i32) -> (i32, i32, i32) {
    %c0_i32 = arith.constant 0 : i32
    %c0_i32_0 = arith.constant 0 : i32
    %c0_i32_1 = arith.constant 0 : i32
    return %arg0, %c0_i32, %c0_i32_0 : i32, i32, i32
  }
  func.func @transform_14(%arg0: i32) -> (i32, i32, i32) {
    %c0_i32 = arith.constant 0 : i32
    %c0_i32_0 = arith.constant 0 : i32
    %c0_i32_1 = arith.constant 0 : i32
    return %arg0, %c0_i32, %c0_i32_0 : i32, i32, i32
  }
  func.func @transform_15(%arg0: i32) -> (i32, i32, i32) {
    %c0_i32 = arith.constant 0 : i32
    %c0_i32_0 = arith.constant 0 : i32
    %c0_i32_1 = arith.constant 0 : i32
    return %arg0, %c0_i32, %c0_i32_0 : i32, i32, i32
  }
}

</mosaic_0001>

<bundles_post_ra>
// kernel: seqlabel_forward.4
= control target key start
LH: loop header
LB: loop body
LE: loop exit
PB: predicated region body
PF: predicated region fallthrough
CT: control target
= control target key end

     0   :  { %s1276_s15 = smov 0   ;;  %s1422_s0 = inlined_call_operand.vmem [shape: f32[2,16,16], index: 0, kind: input, shape index: {}]   ;;  %s1423_s1 = inlined_call_operand.vmem [shape: bf16[2,16,64], index: 1, kind: input, shape index: {}]   ;;  %s1424_s2 = inlined_call_operand.vmem [shape: bf16[2,16,64], index: 2, kind: input, shape index: {}]   ;;  %s1425_s3 = inlined_call_operand.vmem [shape: f32[2,1,64], index: 3, kind: input, shape index: {}]   ;;  %s1426_s4 = inlined_call_operand.vmem [shape: f32[2,16,16], index: 4, kind: output, shape index: {}]  }
   0x1 LB: > { %s1047_s16 = sadd.s32 4294967295, %s1243_s15   ;;  %p1051_p0 = scmp.ge.s32.totalorder %s1243_s15, 1  ;;  %s1243_s15 = sphi %s1276_s15, %s14_s15  }
   0x2   : > { %p190_p1 = scmp.lt.s32.totalorder %s1243_s15, 3 }
   0x4   : > { %p191_p2 = pnand %p1051_p0, %p190_p1 }
   0x5   : > { %p229_p3 = scmp.lt.s32.totalorder (!%p191_p2), %s1047_s16, 1  ;;  %v1245_v0 = vmov (!%p191_p2), 0.0   ;;  %vm1246_vm0 = vmmov (!%p191_p2), 0   ;;  %vm271_vm1 = vcmask (!%p191_p2), 130048   ;;  %v1247_v6 = vmov (!%p191_p2), 0   ;;  %s1248_s5 = smov (!%p191_p2), 80  }
   0x6   : > { %194 = sbr.rel (%p191_p2) target bundleno = 5677 (0x162d), region = 36  ;;  %1103 = vmatprep.subr.bf16.mxu0 (!%p191_p2), %v1245_v0  ;;  %1109 = vmatprep.subr.bf16.mxu1 (!%p191_p2), %v1245_v0  ;;  %s1249_s6 = smov (!%p191_p2), 16   ;;  %vm940_vm2 = vcmask (!%p191_p2), 1041408   ;;  %vm942_vm3 = vcmask (!%p191_p2), 1043456   ;;  %vm944_vm4 = vcmask (!%p191_p2), 1045504  }
   0x7   : > { %1105 = vmatprep.mubr.msk.bf16.mxu0 (!%p191_p2), %vm1246_vm0, %v1245_v0  ;;  %1111 = vmatprep.mubr.msk.bf16.mxu1 (!%p191_p2), %vm1246_vm0, %v1245_v0  ;;  %s1250_s7 = smov (!%p191_p2), 96  }
   0xd   : > { %s1428_s16 = smov (!%p229_p3, %s1047_s16), 1 }
   0xe   : > { %s1082_s17 = sshll.u32 %s1428_s16, 3  ;;  %s1081_s18 = sshll.u32 %s1428_s16, 4 }
   0xf   : > { %s238_s21 = scalar_lea.vmem %s1423_s1, %s1082_s17  ;;  %s243_s24 = scalar_lea.vmem %s1424_s2, %s1082_s17 }
  0x10   : > { %v1171_v1 = vld [vmem:[%s238_s21] sm:$0xff]   ;;  %s233_s27 = scalar_lea.vmem %s1422_s0, %s1081_s18  ;;  %s246_s30 = scalar_lea.vmem %s1425_s3, %s1428_s16 }
  0x11   : > { %v1305_v2 = vld [vmem:[%s243_s24] sm:$0xff]   ;;  %1104 = vmatpush3.bf16.msra.mxu0 %v1171_v1  ;;  %v254_v4 = vld [vmem:[%s233_s27 + $0x8] sm:$0xff]  ;;  %s251_s10 = scalar_lea.vmem %s1426_s4, %s1081_s18 }
  0x12   : > { %v253_v3 = vld [vmem:[%s233_s27] sm:$0xff]  ;;  %1110 = vmatpush3.bf16.msra.mxu1 %v1305_v2  ;;  %1115 = vmatprep.subr.bf16.mxu0 %v1245_v0 }
  0x13   : > { %v255_v5 = vpack.c.bf16 %v254_v4, %v253_v3  ;;  %1121 = vmatprep.subr.bf16.mxu1 %v1245_v0  ;;  %v1060_v7 = vld [vmem:[%s246_s30] ss:$0 sm:$0xff] }
  0x15   : > { %1106 = vmatmul.mubr.msk.bf16.vlgmr.msra.gmra.mrb[0].mxu0 %vm271_vm1, %v255_v5  ;;  %1112 = vmatmul.mubr.bf16.vlgmr.msra.gmra.mrb[0].mxu1 %v1247_v6 }
  0x16   : > { %1116 = vmatpush3.bf16.msra.mxu0 %v1305_v2  ;;  %1117 = vmatprep.mubr.msk.bf16.mxu0 %vm1246_vm0, %v1245_v0 }
  0x17   : > { %1122 = vmatpush3.bf16.msra.mxu1 %v1305_v2  ;;  %1123 = vmatprep.mubr.msk.bf16.mxu1 %vm1246_vm0, %v1245_v0 }
  0x18   : > { %1127 = vmatprep.subr.bf16.mxu0 %v1245_v0  ;;  %1133 = vmatprep.subr.bf16.mxu1 %v1245_v0 }
  0xe8   : > { %v309_v8 = vpop.f32.mrb[0].mxu0  ;;  %v361_v10 = vpop.f32.mrb[0].mxu1 }
  0xe9   : > { %v1323_v9 = vadd.f32 %v1060_v7, %v309_v8  ;;  %v1107_v11 = vpop.f32.mrb[1].mxu0  ;;  %v1113_v12 = vpop.f32.mrb[1].mxu1 }
  0xea   : > { %v312_v13 = vpop.f32.mrb[2].mxu0  ;;  %v364_v16 = vpop.f32.mrb[2].mxu1 }
  0xeb   : > { %v367_v14 = vadd.f32 %v361_v10, %v1323_v9  ;;  %v1326_v15 = vadd.f32 %v1060_v7, %v312_v13  ;;  %v1108_v17 = vpop.f32.mrb[3].mxu0  ;;  %v1114_v18 = vpop.f32.mrb[3].mxu1 }
  0xed   : > { %1173 = vtanh.f32 %v367_v14  ;;  %v1064_v20 = vmul.f32 -1.442695, %v367_v14 }
  0xef   : > { %1175 = vpow2.f32 %v1064_v20 }
  0xf7   : > { %v1174_v19 = vpop.eup %1173 }
  0xf8   : > { %377 = vrot.lane.b32.xlu0 %v1174_v19, %s1248_s5 }
  0xf9   : > { %v1176_v21 = vpop.eup %1175 }
  0xfa   : > { %v371_v22 = vadd.f32 1.0, %v1176_v21 }
  0xfc   : > { %1177 = vrcp.f32 %v371_v22 }
 0x106   : > { %v1178_v23 = vpop.eup %1177 }
 0x107   : > { %v375_v26 = vmul.f32 0.0, %v1178_v23 }
 0x16a   : > { %v378_v24 = vpop.permute.xlu0 %377 }
 0x16b   : > { %v380_v25 = vmul.f32 %v1178_v23, %v378_v24 }
 0x16d   : > { %382 = vrot.lane.b32.xlu0 %v380_v25, %s1249_s6 }
 0x1df   : > { %v383_v27 = vpop.permute.xlu0 %382 }
 0x1e0   : > { %v385_v28 = vadd.f32 %v383_v27, %v375_v26 }
 0x1e2   : > { %1179 = vtanh.f32 %v385_v28  ;;  %v451_v47 = vrot.slane %v385_v28, 6 }
 0x1ec   : > { %v1180_v29 = vpop.eup %1179 }
 0x1ed   : > { %388 = vrot.lane.b32.xlu1 %v1180_v29, %s1249_s6 }
 0x25f   : > { %v389_v30 = vpop.permute.xlu1 %388 }
 0x260   : > { %v1331_v31 = vmul.f32 %v1178_v23, %v389_v30 }
 0x262   : > { %v392_v32 = vpack.c.bf16 %v1331_v31, %v1331_v31 }
 0x264   : > { %394 = vrot.lane.b32.xlu1 %v392_v32, %s1250_s7 }
 0x2d6   : > { %v395_v33 = vpop.permute.xlu1 %394 }
 0x2d7   : > { %1118 = vmatmul.mubr.msk.bf16.vlgmr.msra.gmra.mrb[4].mxu0 %vm271_vm1, %v395_v33 }
 0x2d8   : > { %1128 = vmatpush3.bf16.msra.mxu0 %v1305_v2  ;;  %1129 = vmatprep.mubr.msk.bf16.mxu0 %vm1246_vm0, %v1245_v0 }
 0x2d9   : > { %1139 = vmatprep.subr.bf16.mxu0 %v1245_v0 }
 0x3aa   : > { %v433_v34 = vpop.f32.mrb[4].mxu0 }
 0x3ab   : > { %v440_v35 = vrot.slane %v433_v34, 6  ;;  %v1119_v36 = vpop.f32.mrb[5].mxu0 }
 0x3ac   : > { %v436_v37 = vpop.f32.mrb[6].mxu0 }
 0x3ad   : > { %v442_v38 = vadd.f32 %v440_v35, %v1323_v9  ;;  %v1120_v39 = vpop.f32.mrb[7].mxu0 }
 0x3af   : > { %1181 = vtanh.f32 %v442_v38  ;;  %v1066_v41 = vmul.f32 -1.442695, %v442_v38 }
 0x3b1   : > { %1183 = vpow2.f32 %v1066_v41 }
 0x3b9   : > { %v1182_v40 = vpop.eup %1181 }
 0x3ba   : > { %455 = vrot.lane.b32.xlu0 %v1182_v40, %s1248_s5 }
 0x3bb   : > { %v1184_v42 = vpop.eup %1183 }
 0x3bc   : > { %v446_v43 = vadd.f32 1.0, %v1184_v42 }
 0x3be   : > { %1185 = vrcp.f32 %v446_v43 }
 0x3c8   : > { %v1186_v44 = vpop.eup %1185 }
 0x3c9   : > { %v453_v48 = vmul.f32 %v1186_v44, %v451_v47 }
 0x42c   : > { %v456_v45 = vpop.permute.xlu0 %455 }
 0x42d   : > { %v458_v46 = vmul.f32 %v1186_v44, %v456_v45 }
 0x42f   : > { %460 = vrot.lane.b32.xlu1 %v458_v46, %s1249_s6 }
 0x4a1   : > { %v461_v49 = vpop.permute.xlu1 %460 }
 0x4a2   : > { %v463_v50 = vadd.f32 %v461_v49, %v453_v48 }
 0x4a4   : > { %1187 = vtanh.f32 %v463_v50  ;;  %v530_v8 = vrot.slane %v463_v50, 6 }
 0x4ae   : > { %v1188_v51 = vpop.eup %1187 }
 0x4af   : > { %466 = vrot.lane.b32.xlu0 %v1188_v51, %s1249_s6 }
 0x521   : > { %v467_v52 = vpop.permute.xlu0 %466 }
 0x522   : > { %v469_v53 = vmul.f32 %v1186_v44, %v467_v52 }
 0x524   : > { %v470_v54 = vpack.c.bf16 %v469_v53, %v469_v53  ;;  %v941_v17 = vsel %vm940_vm2, %v1331_v31, %v469_v53 }
 0x526   : > { %v472_v55 = vrot.slane %v470_v54, 1 }
 0x528   : > { %473 = vrot.lane.b32.xlu1 %v472_v55, %s1250_s7 }
 0x59a   : > { %v474_v56 = vpop.permute.xlu1 %473 }
 0x59b   : > { %1124 = vmatmul.mubr.msk.bf16.vlgmr.msra.gmra.mrb[4].mxu1 %vm271_vm1, %v474_v56 }
 0x59c   : > { %1134 = vmatpush3.bf16.msra.mxu1 %v1305_v2  ;;  %1135 = vmatprep.mubr.msk.bf16.mxu1 %vm1246_vm0, %v1245_v0 }
 0x59d   : > { %1145 = vmatprep.subr.bf16.mxu1 %v1245_v0 }
 0x66e   : > { %v512_v57 = vpop.f32.mrb[4].mxu1 }
 0x66f   : > { %v519_v58 = vrot.slane %v512_v57, 4  ;;  %v1125_v59 = vpop.f32.mrb[5].mxu1 }
 0x670   : > { %v515_v60 = vpop.f32.mrb[6].mxu1 }
 0x671   : > { %v521_v61 = vadd.f32 %v519_v58, %v1323_v9  ;;  %v1126_v62 = vpop.f32.mrb[7].mxu1 }
 0x673   : > { %1189 = vtanh.f32 %v521_v61  ;;  %v1068_v1 = vmul.f32 -1.442695, %v521_v61 }
 0x675   : > { %1191 = vpow2.f32 %v1068_v1 }
 0x67d   : > { %v1190_v63 = vpop.eup %1189 }
 0x67e   : > { %534 = vrot.lane.b32.xlu0 %v1190_v63, %s1248_s5 }
 0x67f   : > { %v1192_v3 = vpop.eup %1191 }
 0x680   : > { %v525_v4 = vadd.f32 1.0, %v1192_v3 }
 0x682   : > { %1193 = vrcp.f32 %v525_v4 }
 0x68c   : > { %v1194_v5 = vpop.eup %1193 }
 0x68d   : > { %v532_v10 = vmul.f32 %v1194_v5, %v530_v8 }
 0x6f0   : > { %v535_v6 = vpop.permute.xlu0 %534 }
 0x6f1   : > { %v537_v7 = vmul.f32 %v1194_v5, %v535_v6 }
 0x6f3   : > { %539 = vrot.lane.b32.xlu1 %v537_v7, %s1249_s6 }
 0x765   : > { %v540_v11 = vpop.permute.xlu1 %539 }
 0x766   : > { %v542_v12 = vadd.f32 %v540_v11, %v532_v10 }
 0x768   : > { %1195 = vtanh.f32 %v542_v12  ;;  %v609_v35 = vrot.slane %v542_v12, 6 }
 0x772   : > { %v1196_v13 = vpop.eup %1195 }
 0x773   : > { %545 = vrot.lane.b32.xlu0 %v1196_v13, %s1249_s6 }
 0x7e5   : > { %v546_v14 = vpop.permute.xlu0 %545 }
 0x7e6   : > { %v548_v16 = vmul.f32 %v1194_v5, %v546_v14 }
 0x7e8   : > { %v549_v18 = vpack.c.bf16 %v548_v16, %v548_v16  ;;  %v943_v19 = vsel %vm942_vm3, %v941_v17, %v548_v16 }
 0x7ea   : > { %v551_v20 = vrot.slane %v549_v18, 2 }
 0x7ec   : > { %552 = vrot.lane.b32.xlu1 %v551_v20, %s1250_s7 }
 0x85e   : > { %v553_v21 = vpop.permute.xlu1 %552 }
 0x85f   : > { %1130 = vmatmul.mubr.msk.bf16.vlgmr.msra.gmra.mrb[8].mxu0 %vm271_vm1, %v553_v21 }
 0x860   : > { %1140 = vmatpush3.bf16.msra.mxu0 %v1305_v2  ;;  %1141 = vmatprep.mubr.msk.bf16.mxu0 %vm1246_vm0, %v1245_v0 }
 0x861   : > { %1151 = vmatprep.subr.bf16.mxu0 %v1245_v0 }
 0x932   : > { %v591_v22 = vpop.f32.mrb[8].mxu0 }
 0x933   : > { %v598_v23 = vrot.slane %v591_v22, 2  ;;  %v1131_v24 = vpop.f32.mrb[9].mxu0 }
 0x934   : > { %v594_v25 = vpop.f32.mrb[10].mxu0 }
 0x935   : > { %v600_v26 = vadd.f32 %v598_v23, %v1323_v9  ;;  %v1132_v27 = vpop.f32.mrb[11].mxu0 }
 0x937   : > { %1197 = vtanh.f32 %v600_v26  ;;  %v1070_v29 = vmul.f32 -1.442695, %v600_v26 }
 0x939   : > { %1199 = vpow2.f32 %v1070_v29 }
 0x941   : > { %v1198_v28 = vpop.eup %1197 }
 0x942   : > { %613 = vrot.lane.b32.xlu0 %v1198_v28, %s1248_s5 }
 0x943   : > { %v1200_v30 = vpop.eup %1199 }
 0x944   : > { %v604_v31 = vadd.f32 1.0, %v1200_v30 }
 0x946   : > { %1201 = vrcp.f32 %v604_v31 }
 0x950   : > { %v1202_v32 = vpop.eup %1201 }
 0x951   : > { %v611_v36 = vmul.f32 %v1202_v32, %v609_v35 }
 0x9b4   : > { %v614_v33 = vpop.permute.xlu0 %613 }
 0x9b5   : > { %v616_v34 = vmul.f32 %v1202_v32, %v614_v33 }
 0x9b7   : > { %618 = vrot.lane.b32.xlu1 %v616_v34, %s1249_s6 }
 0xa29   : > { %v619_v37 = vpop.permute.xlu1 %618 }
 0xa2a   : > { %v621_v38 = vadd.f32 %v619_v37, %v611_v36 }
 0xa2c   : > { %1203 = vtanh.f32 %v621_v38  ;;  %v685_v57 = vrot.slane %v621_v38, 6 }
 0xa36   : > { %v1204_v9 = vpop.eup %1203 }
 0xa37   : > { %624 = vrot.lane.b32.xlu0 %v1204_v9, %s1249_s6 }
 0xaa9   : > { %v625_v39 = vpop.permute.xlu0 %624 }
 0xaaa   : > { %v627_v40 = vmul.f32 %v1202_v32, %v625_v39 }
 0xaac   : > { %v628_v41 = vpack.c.bf16 %v627_v40, %v627_v40  ;;  %v1369_v42 = vsel %vm944_vm4, %v943_v19, %v627_v40 }
 0xaae   : > { %v630_v43 = vrot.slane %v628_v41, 3 }
 0xab0   : > { %631 = vrot.lane.b32.xlu1 %v630_v43, %s1250_s7 }
 0xb22   : > { %v632_v44 = vpop.permute.xlu1 %631 }
 0xb23   : > { %1136 = vmatmul.mubr.msk.bf16.vlgmr.msra.gmra.mrb[8].mxu1 %vm271_vm1, %v632_v44 }
 0xb24   : > { %1146 = vmatpush3.bf16.msra.mxu1 %v1305_v2  ;;  %1147 = vmatprep.mubr.msk.bf16.mxu1 %vm1246_vm0, %v1245_v0 }
 0xbf6   : > { %v670_v45 = vpop.f32.mrb[8].mxu1 }
 0xbf7   : > { %v676_v46 = vadd.f32 %v670_v45, %v1326_v15  ;;  %v1137_v47 = vpop.f32.mrb[9].mxu1 }
 0xbf8   : > { %v673_v48 = vpop.f32.mrb[10].mxu1 }
 0xbf9   : > { %1205 = vtanh.f32 %v676_v46  ;;  %v1138_v49 = vpop.f32.mrb[11].mxu1  ;;  %v1072_v51 = vmul.f32 -1.442695, %v676_v46 }
 0xbfb   : > { %1207 = vpow2.f32 %v1072_v51 }
 0xc03   : > { %v1206_v50 = vpop.eup %1205 }
 0xc04   : > { %689 = vrot.lane.b32.xlu0 %v1206_v50, %s1248_s5 }
 0xc05   : > { %v1208_v52 = vpop.eup %1207 }
 0xc06   : > { %v680_v53 = vadd.f32 1.0, %v1208_v52 }
 0xc08   : > { %1209 = vrcp.f32 %v680_v53 }
 0xc12   : > { %v1210_v54 = vpop.eup %1209 }
 0xc13   : > { %v687_v58 = vmul.f32 %v1210_v54, %v685_v57 }
 0xc76   : > { %v690_v55 = vpop.permute.xlu0 %689 }
 0xc77   : > { %v692_v56 = vmul.f32 %v1210_v54, %v690_v55 }
 0xc79   : > { %694 = vrot.lane.b32.xlu1 %v692_v56, %s1249_s6 }
 0xceb   : > { %v695_v59 = vpop.permute.xlu1 %694 }
 0xcec   : > { %v697_v60 = vadd.f32 %v695_v59, %v687_v58 }
 0xcee   : > { %1211 = vtanh.f32 %v697_v60 }
 0xcf8   : > { %v1212_v61 = vpop.eup %1211 }
 0xcf9   : > { %700 = vrot.lane.b32.xlu0 %v1212_v61, %s1249_s6 }
 0xd6b   : > { %v701_v62 = vpop.permute.xlu0 %700 }
 0xd6c   : > { %v1380_v63 = vmul.f32 %v1210_v54, %v701_v62 }
 0xd6e   : > { %v704_v1 = vpack.c.bf16 %v1380_v63, %v1380_v63 }
 0xd70   : > { %706 = vrot.lane.b32.xlu1 %v704_v1, %s1250_s7 }
 0xde2   : > { %v707_v3 = vpop.permute.xlu1 %706 }
 0xde3   : > { %1142 = vmatmul.mubr.msk.bf16.vlgmr.msra.gmra.mrb[12].mxu0 %vm271_vm1, %v707_v3 }
 0xde4   : > { %1152 = vmatpush3.bf16.msra.mxu0 %v1305_v2  ;;  %1153 = vmatprep.mubr.msk.bf16.mxu0 %vm1246_vm0, %v1245_v0  ;;  %v763_v0 = vrot.slane %v697_v60, 6 }
 0xeb6   : > { %v745_v4 = vpop.f32.mrb[12].mxu0 }
 0xeb7   : > { %v752_v5 = vrot.slane %v745_v4, 6  ;;  %v1143_v6 = vpop.f32.mrb[13].mxu0 }
 0xeb8   : > { %v748_v7 = vpop.f32.mrb[14].mxu0 }
 0xeb9   : > { %v754_v8 = vadd.f32 %v752_v5, %v1326_v15  ;;  %v1144_v10 = vpop.f32.mrb[15].mxu0 }
 0xebb   : > { %1213 = vtanh.f32 %v754_v8  ;;  %v1074_v12 = vmul.f32 -1.442695, %v754_v8 }
 0xebd   : > { %1215 = vpow2.f32 %v1074_v12 }
 0xec5   : > { %v1214_v11 = vpop.eup %1213 }
 0xec6   : > { %767 = vrot.lane.b32.xlu0 %v1214_v11, %s1248_s5 }
 0xec7   : > { %v1216_v13 = vpop.eup %1215 }
 0xec8   : > { %v758_v14 = vadd.f32 1.0, %v1216_v13 }
 0xeca   : > { %1217 = vrcp.f32 %v758_v14 }
 0xed4   : > { %v1218_v2 = vpop.eup %1217 }
 0xed5   : > { %v765_v18 = vmul.f32 %v1218_v2, %v763_v0 }
 0xf38   : > { %v768_v16 = vpop.permute.xlu0 %767 }
 0xf39   : > { %v770_v17 = vmul.f32 %v1218_v2, %v768_v16 }
 0xf3b   : > { %772 = vrot.lane.b32.xlu1 %v770_v17, %s1249_s6 }
 0xfad   : > { %v773_v19 = vpop.permute.xlu1 %772 }
 0xfae   : > { %v775_v20 = vadd.f32 %v773_v19, %v765_v18 }
 0xfb0   : > { %1219 = vtanh.f32 %v775_v20  ;;  %v842_v39 = vrot.slane %v775_v20, 6 }
 0xfba   : > { %v1220_v21 = vpop.eup %1219 }
 0xfbb   : > { %778 = vrot.lane.b32.xlu0 %v1220_v21, %s1249_s6 }
0x102d   : > { %v779_v22 = vpop.permute.xlu0 %778 }
0x102e   : > { %v781_v23 = vmul.f32 %v1218_v2, %v779_v22 }
0x1030   : > { %v782_v24 = vpack.c.bf16 %v781_v23, %v781_v23  ;;  %v946_v47 = vsel %vm940_vm2, %v1380_v63, %v781_v23 }
0x1032   : > { %v784_v25 = vrot.slane %v782_v24, 1 }
0x1034   : > { %785 = vrot.lane.b32.xlu1 %v784_v25, %s1250_s7 }
0x10a6   : > { %v786_v26 = vpop.permute.xlu1 %785 }
0x10a7   : > { %1148 = vmatmul.mubr.msk.bf16.vlgmr.msra.gmra.mrb[12].mxu1 %vm271_vm1, %v786_v26 }
0x117a   : > { %v824_v27 = vpop.f32.mrb[12].mxu1 }
0x117b   : > { %v831_v28 = vrot.slane %v824_v27, 4  ;;  %v1149_v29 = vpop.f32.mrb[13].mxu1 }
0x117c   : > { %v827_v30 = vpop.f32.mrb[14].mxu1 }
0x117d   : > { %v833_v31 = vadd.f32 %v831_v28, %v1326_v15  ;;  %v1150_v32 = vpop.f32.mrb[15].mxu1 }
0x117f   : > { %1221 = vtanh.f32 %v833_v31  ;;  %v1076_v34 = vmul.f32 -1.442695, %v833_v31 }
0x1181   : > { %1223 = vpow2.f32 %v1076_v34 }
0x1189   : > { %v1222_v33 = vpop.eup %1221 }
0x118a   : > { %846 = vrot.lane.b32.xlu0 %v1222_v33, %s1248_s5 }
0x118b   : > { %v1224_v35 = vpop.eup %1223 }
0x118c   : > { %v837_v36 = vadd.f32 1.0, %v1224_v35 }
0x118e   : > { %1225 = vrcp.f32 %v837_v36 }
0x1198   : > { %v1226_v37 = vpop.eup %1225 }
0x1199   : > { %v844_v40 = vmul.f32 %v1226_v37, %v842_v39 }
0x11fc   : > { %v847_v38 = vpop.permute.xlu0 %846 }
0x11fd   : > { %v849_v9 = vmul.f32 %v1226_v37, %v847_v38 }
0x11ff   : > { %851 = vrot.lane.b32.xlu1 %v849_v9, %s1249_s6 }
0x1271   : > { %v852_v41 = vpop.permute.xlu1 %851 }
0x1272   : > { %v854_v43 = vadd.f32 %v852_v41, %v844_v40 }
0x1274   : > { %1227 = vtanh.f32 %v854_v43 }
0x127e   : > { %v1228_v44 = vpop.eup %1227 }
0x127f   : > { %857 = vrot.lane.b32.xlu0 %v1228_v44, %s1249_s6 }
0x12f1   : > { %v858_v45 = vpop.permute.xlu0 %857 }
0x12f2   : > { %v860_v46 = vmul.f32 %v1226_v37, %v858_v45 }
0x12f4   : > { %v861_v48 = vpack.c.bf16 %v860_v46, %v860_v46  ;;  %v947_v49 = vsel %vm942_vm3, %v946_v47, %v860_v46 }
0x12f6   : > { %v863_v50 = vrot.slane %v861_v48, 2 }
0x12f8   : > { %864 = vrot.lane.b32.xlu1 %v863_v50, %s1250_s7 }
0x136a   : > { %v865_v51 = vpop.permute.xlu1 %864 }
0x136b   : > { %1154 = vmatmul.mubr.msk.bf16.vlgmr.msra.gmra.mrb[16].mxu0 %vm271_vm1, %v865_v51 }
0x143e   : > { %v903_v52 = vpop.f32.mrb[16].mxu0 }
0x143f   : > { %v910_v53 = vrot.slane %v903_v52, 2  ;;  %v1155_v54 = vpop.f32.mrb[17].mxu0 }
0x1440   : > { %v906_v55 = vpop.f32.mrb[18].mxu0 }
0x1441   : > { %v912_v56 = vadd.f32 %v910_v53, %v1326_v15  ;;  %v1156_v57 = vpop.f32.mrb[19].mxu0  ;;  %v921_v15 = vrot.slane %v854_v43, 6 }
0x1443   : > { %1229 = vtanh.f32 %v912_v56  ;;  %v1078_v59 = vmul.f32 -1.442695, %v912_v56 }
0x1445   : > { %1231 = vpow2.f32 %v1078_v59 }
0x144d   : > { %v1230_v58 = vpop.eup %1229 }
0x144e   : > { %925 = vrot.lane.b32.xlu0 %v1230_v58, %s1248_s5 }
0x144f   : > { %v1232_v60 = vpop.eup %1231 }
0x1450   : > { %v916_v61 = vadd.f32 1.0, %v1232_v60 }
0x1452   : > { %1233 = vrcp.f32 %v916_v61 }
0x145c   : > { %v1234_v62 = vpop.eup %1233 }
0x145d   : > { %v923_v3 = vmul.f32 %v1234_v62, %v921_v15 }
0x14c0   : > { %v926_v63 = vpop.permute.xlu0 %925 }
0x14c1   : > { %v928_v1 = vmul.f32 %v1234_v62, %v926_v63 }
0x14c3   : > { %930 = vrot.lane.b32.xlu1 %v928_v1, %s1249_s6 }
0x14c7   : > { %951 = vrot.lane.b32.xlu1 %v1369_v42, %s1250_s7 }
0x1535   : > { %v931_v4 = vpop.permute.xlu1 %930 }
0x1536   : > { %v933_v5 = vadd.f32 %v931_v4, %v923_v3 }
0x1538   : > { %1235 = vtanh.f32 %v933_v5 }
0x1539   : > { %v952_v6 = vpop.permute.xlu1 %951 }
0x153a   : > { %957 = vst.msk [vmem:[%s251_s10] sm:$0xff] %vm271_vm1, %v952_v6 }
0x1542   : > { %v1236_v7 = vpop.eup %1235 }
0x1543   : > { %936 = vrot.lane.b32.xlu0 %v1236_v7, %s1249_s6 }
0x15b5   : > { %v937_v8 = vpop.permute.xlu0 %936 }
0x15b6   : > { %v939_v10 = vmul.f32 %v1234_v62, %v937_v8 }
0x15b8   : > { %v948_v42 = vsel %vm944_vm4, %v947_v49, %v939_v10 }
0x15b9   : > { %953 = vrot.lane.b32.xlu0 %v948_v42, %s1250_s7 }
0x162b   : > { %v954_v11 = vpop.permute.xlu0 %953 }
0x162c   : > { %958 = vst.msk [vmem:[%s251_s10 + $0x8] sm:$0xff] %vm271_vm1, %v954_v11 }
0x162d PF: > { %s14_s15 = sadd.s32 1, %s1243_s15  }
0x162e   : > { %p11_p4 = scmp.ge.s32.totalorder %s14_s15, 4  }
0x1630   :  { %13 = sbr.rel (!%p11_p4) target bundleno = 1 (0x1), region = 75 }

// kernel: seqlabel_forward.3
= control target key start
LH: loop header
LB: loop body
LE: loop exit
PB: predicated region body
PF: predicated region fallthrough
CT: control target
= control target key end

     0   :  { %s2883_s15 = smov 0   ;;  %s3298_s0 = inlined_call_operand.vmem [shape: f32[2,48,16], index: 0, kind: input, shape index: {}]   ;;  %s3299_s1 = inlined_call_operand.vmem [shape: bf16[2,16,64], index: 1, kind: input, shape index: {}]   ;;  %s3300_s2 = inlined_call_operand.vmem [shape: bf16[2,16,64], index: 2, kind: input, shape index: {}]   ;;  %s3301_s3 = inlined_call_operand.vmem [shape: f32[2,1,64], index: 3, kind: input, shape index: {}]   ;;  %s3302_s4 = inlined_call_operand.vmem [shape: f32[2,48,16], index: 4, kind: output, shape index: {}]  }
   0x1 LB: > { %s2355_s16 = sadd.s32 4294967295, %s2850_s15   ;;  %p2359_p0 = scmp.ge.s32.totalorder %s2850_s15, 1  ;;  %s2850_s15 = sphi %s2883_s15, %s14_s15  }
   0x2   : > { %p190_p1 = scmp.lt.s32.totalorder %s2850_s15, 3 }
   0x4   : > { %p191_p2 = pnand %p2359_p0, %p190_p1 }
   0x5   : > { %p229_p3 = scmp.lt.s32.totalorder (!%p191_p2), %s2355_s16, 1  ;;  %v2852_v0 = vmov (!%p191_p2), 0.0   ;;  %vm2853_vm0 = vmmov (!%p191_p2), 0   ;;  %vm277_vm1 = vcmask (!%p191_p2), 130048   ;;  %v2854_v6 = vmov (!%p191_p2), 0   ;;  %s2855_s5 = smov (!%p191_p2), 80  }
   0x6   : > { %194 = sbr.rel (%p191_p2) target bundleno = 16989 (0x425d), region = 36  ;;  %2475 = vmatprep.subr.bf16.mxu0 (!%p191_p2), %v2852_v0  ;;  %2489 = vmatprep.subr.bf16.mxu1 (!%p191_p2), %v2852_v0  ;;  %s2856_s6 = smov (!%p191_p2), 16   ;;  %vm2216_vm2 = vcmask (!%p191_p2), 1041408   ;;  %vm2218_vm3 = vcmask (!%p191_p2), 1043456   ;;  %vm2220_vm4 = vcmask (!%p191_p2), 1045504  }
   0x7   : > { %2477 = vmatprep.mubr.msk.bf16.mxu0 (!%p191_p2), %vm2853_vm0, %v2852_v0  ;;  %2491 = vmatprep.mubr.msk.bf16.mxu1 (!%p191_p2), %vm2853_vm0, %v2852_v0  ;;  %s2857_s7 = smov (!%p191_p2), 96  }
   0xd   : > { %s3304_s16 = smov (!%p229_p3, %s2355_s16), 1 }
   0xe   : > { %s2633_s17 = smul.u32 48, %s3304_s16  ;;  %s2421_s18 = sshll.u32 %s3304_s16, 3 }
   0xf   : > { %s238_s21 = scalar_lea.vmem %s3299_s1, %s2421_s18  ;;  %s2907_s24 = scalar_lea.vmem %s3300_s2, %s2421_s18 }
  0x10   : > { %s2914_s27 = scalar_lea.vmem %s3298_s0, %s2633_s17  ;;  %v2648_v1 = vld [vmem:[%s238_s21] sm:$0xff]   ;;  %s2937_s30 = scalar_lea.vmem %s3301_s3, %s3304_s16 }
  0x11   : > { %v2917_v2 = vld [vmem:[%s2907_s24] sm:$0xff]   ;;  %2476 = vmatpush3.bf16.msra.mxu0 %v2648_v1  ;;  %v254_v4 = vld [vmem:[%s2914_s27 + $0x8] sm:$0xff]  ;;  %s251_s10 = scalar_lea.vmem %s3302_s4, %s2633_s17 }
  0x12   : > { %v253_v3 = vld [vmem:[%s2914_s27] sm:$0xff]  ;;  %2490 = vmatpush3.bf16.msra.mxu1 %v2917_v2  ;;  %2507 = vmatprep.subr.bf16.mxu0 %v2852_v0 }
  0x13   : > { %v259_v5 = vpack.c.bf16 %v254_v4, %v253_v3  ;;  %2495 = vmatprep.subr.bf16.mxu1 %v2852_v0  ;;  %v2940_v7 = vld [vmem:[%s2937_s30] ss:$0 sm:$0xff] }
  0x15   : > { %2478 = vmatmul.mubr.msk.bf16.vlgmr.msra.gmra.mrb[0].mxu0 %vm277_vm1, %v259_v5  ;;  %2492 = vmatmul.mubr.bf16.vlgmr.msra.gmra.mrb[0].mxu1 %v2854_v6 }
  0x16   : > { %2508 = vmatpush3.bf16.msra.mxu0 %v2917_v2  ;;  %2496 = vmatpush3.bf16.msra.mxu1 %v2917_v2 }
  0x17   : > { %2497 = vmatprep.mubr.msk.bf16.mxu1 %vm2853_vm0, %v2852_v0  ;;  %2501 = vmatprep.subr.bf16.mxu1 %v2852_v0 }
  0x18   : > { %2481 = vmatprep.mubr.msk.bf16.mxu0 %vm2853_vm0, %v2852_v0  ;;  %2519 = vmatprep.subr.bf16.mxu0 %v2852_v0 }
  0xe8   : > { %v321_v8 = vpop.f32.mrb[0].mxu0  ;;  %v389_v10 = vpop.f32.mrb[0].mxu1 }
  0xe9   : > { %v2943_v9 = vadd.f32 %v2940_v7, %v321_v8  ;;  %v2479_v11 = vpop.f32.mrb[1].mxu0  ;;  %v2493_v12 = vpop.f32.mrb[1].mxu1 }
  0xea   : > { %v2945_v13 = vpop.f32.mrb[2].mxu0  ;;  %v392_v15 = vpop.f32.mrb[2].mxu1 }
  0xeb   : > { %v395_v14 = vadd.f32 %v389_v10, %v2943_v9  ;;  %v2480_v16 = vpop.f32.mrb[3].mxu0  ;;  %v2494_v17 = vpop.f32.mrb[3].mxu1  ;;  %v256_v15 = vld [vmem:[%s2914_s27 + $0x18] sm:$0xff] }
  0xec   : > { %v257_v17 = vld [vmem:[%s2914_s27 + $0x20] sm:$0xff] }
  0xed   : > { %2650 = vtanh.f32 %v395_v14  ;;  %v2372_v19 = vmul.f32 -1.442695, %v395_v14  ;;  %v255_v14 = vld [vmem:[%s2914_s27 + $0x10] sm:$0xff] }
  0xee   : > { %v260_v16 = vpack.c.bf16 %v256_v15, %v255_v14 }
  0xef   : > { %2652 = vpow2.f32 %v2372_v19 }
  0xf0   : > { %2482 = vmatmul.mubr.msk.bf16.gmra.mrb[4].mxu0 %vm277_vm1, %v260_v16 }
  0xf1   : > { %2485 = vmatprep.mubr.msk.bf16.mxu0 %vm2853_vm0, %v2852_v0 }
  0xf7   : > { %v2651_v18 = vpop.eup %2650 }
  0xf8   : > { %405 = vrot.lane.b32.xlu0 %v2651_v18, %s2855_s5  ;;  %v258_v18 = vld [vmem:[%s2914_s27 + $0x28] sm:$0xff] }
  0xf9   : > { %v2653_v20 = vpop.eup %2652 }
  0xfa   : > { %v399_v21 = vadd.f32 1.0, %v2653_v20  ;;  %v261_v20 = vpack.c.bf16 %v258_v18, %v257_v17 }
  0xfc   : > { %2654 = vrcp.f32 %v399_v21  ;;  %2486 = vmatmul.mubr.msk.bf16.gmra.mrb[8].mxu0 %vm277_vm1, %v261_v20 }
  0xfd   : > { %2509 = vmatprep.mubr.msk.bf16.mxu0 %vm2853_vm0, %v2852_v0 }
 0x106   : > { %v2655_v22 = vpop.eup %2654 }
 0x107   : > { %v403_v25 = vmul.f32 0.0, %v2655_v22 }
 0x16a   : > { %v406_v23 = vpop.permute.xlu0 %405 }
 0x16b   : > { %v408_v24 = vmul.f32 %v2655_v22, %v406_v23 }
 0x16d   : > { %410 = vrot.lane.b32.xlu0 %v408_v24, %s2856_s6 }
 0x1df   : > { %v411_v26 = vpop.permute.xlu0 %410 }
 0x1e0   : > { %v413_v27 = vadd.f32 %v411_v26, %v403_v25 }
 0x1e2   : > { %2656 = vtanh.f32 %v413_v27  ;;  %v479_v46 = vrot.slane %v413_v27, 6  ;;  %v2989_v27 = vpop.f32.mrb[4].mxu0 }
 0x1ec   : > { %v2657_v28 = vpop.eup %2656 }
 0x1ed   : > { %416 = vrot.lane.b32.xlu1 %v2657_v28, %s2856_s6  ;;  %v2483_v28 = vpop.f32.mrb[5].mxu0 }
 0x25f   : > { %v417_v29 = vpop.permute.xlu1 %416 }
 0x260   : > { %v2951_v30 = vmul.f32 %v2655_v22, %v417_v29  ;;  %v2991_v29 = vpop.f32.mrb[6].mxu0 }
 0x262   : > { %v420_v31 = vpack.c.bf16 %v2951_v30, %v2951_v30 }
 0x264   : > { %422 = vrot.lane.b32.xlu1 %v420_v31, %s2857_s7  ;;  %v2484_v31 = vpop.f32.mrb[7].mxu0 }
 0x2d6   : > { %v423_v32 = vpop.permute.xlu1 %422 }
 0x2d7   : > { %2498 = vmatmul.mubr.msk.bf16.vlgmr.msra.gmra.mrb[4].mxu1 %vm277_vm1, %v423_v32  ;;  %v2993_v32 = vpop.f32.mrb[8].mxu0 }
 0x2d8   : > { %2502 = vmatpush3.bf16.msra.mxu1 %v2917_v2  ;;  %2503 = vmatprep.mubr.msk.bf16.mxu1 %vm2853_vm0, %v2852_v0 }
 0x2d9   : > { %2513 = vmatprep.subr.bf16.mxu1 %v2852_v0 }
 0x3aa   : > { %v461_v33 = vpop.f32.mrb[4].mxu1 }
 0x3ab   : > { %v468_v34 = vrot.slane %v461_v33, 6  ;;  %v2499_v35 = vpop.f32.mrb[5].mxu1  ;;  %v2487_v33 = vpop.f32.mrb[9].mxu0 }
 0x3ac   : > { %v464_v36 = vpop.f32.mrb[6].mxu1 }
 0x3ad   : > { %v470_v37 = vadd.f32 %v468_v34, %v2943_v9  ;;  %v2500_v38 = vpop.f32.mrb[7].mxu1  ;;  %v2995_v34 = vpop.f32.mrb[10].mxu0 }
 0x3ae   : > { %v2488_v35 = vpop.f32.mrb[11].mxu0 }
 0x3af   : > { %2658 = vtanh.f32 %v470_v37  ;;  %v2374_v40 = vmul.f32 -1.442695, %v470_v37 }
 0x3b1   : > { %2660 = vpow2.f32 %v2374_v40 }
 0x3b9   : > { %v2659_v39 = vpop.eup %2658 }
 0x3ba   : > { %483 = vrot.lane.b32.xlu0 %v2659_v39, %s2855_s5 }
 0x3bb   : > { %v2661_v41 = vpop.eup %2660 }
 0x3bc   : > { %v474_v42 = vadd.f32 1.0, %v2661_v41 }
 0x3be   : > { %2662 = vrcp.f32 %v474_v42 }
 0x3c8   : > { %v2663_v43 = vpop.eup %2662 }
 0x3c9   : > { %v481_v47 = vmul.f32 %v2663_v43, %v479_v46 }
 0x42c   : > { %v484_v44 = vpop.permute.xlu0 %483 }
 0x42d   : > { %v486_v45 = vmul.f32 %v2663_v43, %v484_v44 }
 0x42f   : > { %488 = vrot.lane.b32.xlu1 %v486_v45, %s2856_s6 }
 0x4a1   : > { %v489_v48 = vpop.permute.xlu1 %488 }
 0x4a2   : > { %v491_v49 = vadd.f32 %v489_v48, %v481_v47 }
 0x4a4   : > { %2664 = vtanh.f32 %v491_v49  ;;  %v558_v8 = vrot.slane %v491_v49, 6 }
 0x4ae   : > { %v2665_v50 = vpop.eup %2664 }
 0x4af   : > { %494 = vrot.lane.b32.xlu0 %v2665_v50, %s2856_s6 }
 0x521   : > { %v495_v51 = vpop.permute.xlu0 %494 }
 0x522   : > { %v497_v52 = vmul.f32 %v2663_v43, %v495_v51 }
 0x524   : > { %v498_v53 = vpack.c.bf16 %v497_v52, %v497_v52  ;;  %v2217_v23 = vsel %vm2216_vm2, %v2951_v30, %v497_v52 }
 0x526   : > { %v500_v54 = vrot.slane %v498_v53, 1 }
 0x528   : > { %501 = vrot.lane.b32.xlu1 %v500_v54, %s2857_s7 }
 0x59a   : > { %v502_v55 = vpop.permute.xlu1 %501 }
 0x59b   : > { %2504 = vmatmul.mubr.msk.bf16.vlgmr.msra.gmra.mrb[8].mxu1 %vm277_vm1, %v502_v55 }
 0x59c   : > { %2514 = vmatpush3.bf16.msra.mxu1 %v2917_v2  ;;  %2515 = vmatprep.mubr.msk.bf16.mxu1 %vm2853_vm0, %v2852_v0 }
 0x59d   : > { %2525 = vmatprep.subr.bf16.mxu1 %v2852_v0 }
 0x66e   : > { %v540_v56 = vpop.f32.mrb[8].mxu1 }
 0x66f   : > { %v547_v57 = vrot.slane %v540_v56, 4  ;;  %v2505_v58 = vpop.f32.mrb[9].mxu1 }
 0x670   : > { %v543_v59 = vpop.f32.mrb[10].mxu1 }
 0x671   : > { %v549_v60 = vadd.f32 %v547_v57, %v2943_v9  ;;  %v2506_v61 = vpop.f32.mrb[11].mxu1  ;;  %v3017_v59 = vadd.f32 %v2940_v7, %v2945_v13 }
 0x673   : > { %2666 = vtanh.f32 %v549_v60  ;;  %v2376_v63 = vmul.f32 -1.442695, %v549_v60 }
 0x675   : > { %2668 = vpow2.f32 %v2376_v63 }
 0x67d   : > { %v2667_v62 = vpop.eup %2666 }
 0x67e   : > { %562 = vrot.lane.b32.xlu0 %v2667_v62, %s2855_s5 }
 0x67f   : > { %v2669_v1 = vpop.eup %2668 }
 0x680   : > { %v553_v3 = vadd.f32 1.0, %v2669_v1 }
 0x682   : > { %2670 = vrcp.f32 %v553_v3 }
 0x68c   : > { %v2671_v4 = vpop.eup %2670 }
 0x68d   : > { %v560_v10 = vmul.f32 %v2671_v4, %v558_v8 }
 0x6f0   : > { %v563_v5 = vpop.permute.xlu0 %562 }
 0x6f1   : > { %v565_v6 = vmul.f32 %v2671_v4, %v563_v5 }
 0x6f3   : > { %567 = vrot.lane.b32.xlu1 %v565_v6, %s2856_s6 }
 0x765   : > { %v568_v11 = vpop.permute.xlu1 %567 }
 0x766   : > { %v570_v12 = vadd.f32 %v568_v11, %v560_v10 }
 0x768   : > { %2672 = vtanh.f32 %v570_v12  ;;  %v637_v49 = vrot.slane %v570_v12, 6 }
 0x772   : > { %v2673_v19 = vpop.eup %2672 }
 0x773   : > { %573 = vrot.lane.b32.xlu0 %v2673_v19, %s2856_s6 }
 0x7e5   : > { %v574_v21 = vpop.permute.xlu0 %573 }
 0x7e6   : > { %v576_v22 = vmul.f32 %v2671_v4, %v574_v21 }
 0x7e8   : > { %v577_v24 = vpack.c.bf16 %v576_v22, %v576_v22  ;;  %v2219_v25 = vsel %vm2218_vm3, %v2217_v23, %v576_v22 }
 0x7ea   : > { %v579_v26 = vrot.slane %v577_v24, 2 }
 0x7ec   : > { %580 = vrot.lane.b32.xlu1 %v579_v26, %s2857_s7 }
 0x85e   : > { %v581_v36 = vpop.permute.xlu1 %580 }
 0x85f   : > { %2510 = vmatmul.mubr.msk.bf16.vlgmr.msra.gmra.mrb[12].mxu0 %vm277_vm1, %v581_v36 }
 0x860   : > { %2520 = vmatpush3.bf16.msra.mxu0 %v2917_v2  ;;  %2521 = vmatprep.mubr.msk.bf16.mxu0 %vm2853_vm0, %v2852_v0 }
 0x861   : > { %2531 = vmatprep.subr.bf16.mxu0 %v2852_v0 }
 0x932   : > { %v619_v30 = vpop.f32.mrb[12].mxu0 }
 0x933   : > { %v626_v37 = vrot.slane %v619_v30, 2  ;;  %v2511_v38 = vpop.f32.mrb[13].mxu0 }
 0x934   : > { %v622_v39 = vpop.f32.mrb[14].mxu0 }
 0x935   : > { %v628_v40 = vadd.f32 %v626_v37, %v2943_v9  ;;  %v2512_v41 = vpop.f32.mrb[15].mxu0 }
 0x937   : > { %2674 = vtanh.f32 %v628_v40  ;;  %v2378_v43 = vmul.f32 -1.442695, %v628_v40 }
 0x939   : > { %2676 = vpow2.f32 %v2378_v43 }
 0x941   : > { %v2675_v42 = vpop.eup %2674 }
 0x942   : > { %641 = vrot.lane.b32.xlu0 %v2675_v42, %s2855_s5 }
 0x943   : > { %v2677_v44 = vpop.eup %2676 }
 0x944   : > { %v632_v45 = vadd.f32 1.0, %v2677_v44 }
 0x946   : > { %2678 = vrcp.f32 %v632_v45 }
 0x950   : > { %v2679_v46 = vpop.eup %2678 }
 0x951   : > { %v639_v50 = vmul.f32 %v2679_v46, %v637_v49 }
 0x9b4   : > { %v642_v47 = vpop.permute.xlu0 %641 }
 0x9b5   : > { %v644_v48 = vmul.f32 %v2679_v46, %v642_v47 }
 0x9b7   : > { %646 = vrot.lane.b32.xlu1 %v644_v48, %s2856_s6 }
 0xa29   : > { %v647_v51 = vpop.permute.xlu1 %646 }
 0xa2a   : > { %v649_v52 = vadd.f32 %v647_v51, %v639_v50 }
 0xa2c   : > { %2680 = vtanh.f32 %v649_v52  ;;  %v713_v13 = vrot.slane %v649_v52, 6 }
 0xa36   : > { %v2681_v9 = vpop.eup %2680 }
 0xa37   : > { %652 = vrot.lane.b32.xlu0 %v2681_v9, %s2856_s6 }
 0xaa9   : > { %v653_v53 = vpop.permute.xlu0 %652 }
 0xaaa   : > { %v655_v54 = vmul.f32 %v2679_v46, %v653_v53 }
 0xaac   : > { %v656_v55 = vpack.c.bf16 %v655_v54, %v655_v54  ;;  %v3007_v56 = vsel %vm2220_vm4, %v2219_v25, %v655_v54 }
 0xaae   : > { %v658_v57 = vrot.slane %v656_v55, 3 }
 0xab0   : > { %659 = vrot.lane.b32.xlu1 %v658_v57, %s2857_s7 }
 0xb22   : > { %v660_v58 = vpop.permute.xlu1 %659 }
 0xb23   : > { %2516 = vmatmul.mubr.msk.bf16.vlgmr.msra.gmra.mrb[12].mxu1 %vm277_vm1, %v660_v58 }
 0xb24   : > { %2526 = vmatpush3.bf16.msra.mxu1 %v2917_v2  ;;  %2527 = vmatprep.mubr.msk.bf16.mxu1 %vm2853_vm0, %v2852_v0 }
 0xb25   : > { %2537 = vmatprep.subr.bf16.mxu1 %v2852_v0 }
 0xbf6   : > { %v698_v60 = vpop.f32.mrb[12].mxu1 }
 0xbf7   : > { %v704_v61 = vadd.f32 %v698_v60, %v3017_v59  ;;  %v2517_v62 = vpop.f32.mrb[13].mxu1 }
 0xbf8   : > { %v701_v63 = vpop.f32.mrb[14].mxu1 }
 0xbf9   : > { %2682 = vtanh.f32 %v704_v61  ;;  %v2518_v1 = vpop.f32.mrb[15].mxu1  ;;  %v2380_v4 = vmul.f32 -1.442695, %v704_v61 }
 0xbfb   : > { %2684 = vpow2.f32 %v2380_v4 }
 0xc03   : > { %v2683_v3 = vpop.eup %2682 }
 0xc04   : > { %717 = vrot.lane.b32.xlu0 %v2683_v3, %s2855_s5 }
 0xc05   : > { %v2685_v5 = vpop.eup %2684 }
 0xc06   : > { %v708_v6 = vadd.f32 1.0, %v2685_v5 }
 0xc08   : > { %2686 = vrcp.f32 %v708_v6 }
 0xc12   : > { %v2687_v8 = vpop.eup %2686 }
 0xc13   : > { %v715_v12 = vmul.f32 %v2687_v8, %v713_v13 }
 0xc76   : > { %v718_v10 = vpop.permute.xlu0 %717 }
 0xc77   : > { %v720_v11 = vmul.f32 %v2687_v8, %v718_v10 }
 0xc79   : > { %722 = vrot.lane.b32.xlu1 %v720_v11, %s2856_s6 }
 0xceb   : > { %v723_v14 = vpop.permute.xlu1 %722 }
 0xcec   : > { %v725_v15 = vadd.f32 %v723_v14, %v715_v12 }
 0xcee   : > { %2688 = vtanh.f32 %v725_v15  ;;  %v791_v38 = vrot.slane %v725_v15, 6 }
 0xcf8   : > { %v2689_v16 = vpop.eup %2688 }
 0xcf9   : > { %728 = vrot.lane.b32.xlu0 %v2689_v16, %s2856_s6 }
 0xd6b   : > { %v729_v17 = vpop.permute.xlu0 %728 }
 0xd6c   : > { %v3023_v18 = vmul.f32 %v2687_v8, %v729_v17 }
 0xd6e   : > { %v732_v19 = vpack.c.bf16 %v3023_v18, %v3023_v18 }
 0xd70   : > { %734 = vrot.lane.b32.xlu1 %v732_v19, %s2857_s7 }
 0xde2   : > { %v735_v20 = vpop.permute.xlu1 %734 }
 0xde3   : > { %2522 = vmatmul.mubr.msk.bf16.vlgmr.msra.gmra.mrb[16].mxu0 %vm277_vm1, %v735_v20 }
 0xde4   : > { %2532 = vmatpush3.bf16.msra.mxu0 %v2917_v2  ;;  %2533 = vmatprep.mubr.msk.bf16.mxu0 %vm2853_vm0, %v2852_v0 }
 0xde5   : > { %2543 = vmatprep.subr.bf16.mxu0 %v2852_v0 }
 0xeb6   : > { %v773_v21 = vpop.f32.mrb[16].mxu0 }
 0xeb7   : > { %v780_v22 = vrot.slane %v773_v21, 6  ;;  %v2523_v23 = vpop.f32.mrb[17].mxu0 }
 0xeb8   : > { %v776_v24 = vpop.f32.mrb[18].mxu0 }
 0xeb9   : > { %v782_v25 = vadd.f32 %v780_v22, %v3017_v59  ;;  %v2524_v26 = vpop.f32.mrb[19].mxu0 }
 0xebb   : > { %2690 = vtanh.f32 %v782_v25  ;;  %v2382_v31 = vmul.f32 -1.442695, %v782_v25 }
 0xebd   : > { %2692 = vpow2.f32 %v2382_v31 }
 0xec5   : > { %v2691_v28 = vpop.eup %2690 }
 0xec6   : > { %795 = vrot.lane.b32.xlu0 %v2691_v28, %s2855_s5 }
 0xec7   : > { %v2693_v33 = vpop.eup %2692 }
 0xec8   : > { %v786_v35 = vadd.f32 1.0, %v2693_v33 }
 0xeca   : > { %2694 = vrcp.f32 %v786_v35 }
 0xed4   : > { %v2695_v36 = vpop.eup %2694 }
 0xed5   : > { %v793_v39 = vmul.f32 %v2695_v36, %v791_v38 }
 0xf38   : > { %v796_v30 = vpop.permute.xlu0 %795 }
 0xf39   : > { %v798_v37 = vmul.f32 %v2695_v36, %v796_v30 }
 0xf3b   : > { %800 = vrot.lane.b32.xlu1 %v798_v37, %s2856_s6 }
 0xfad   : > { %v801_v40 = vpop.permute.xlu1 %800 }
 0xfae   : > { %v803_v41 = vadd.f32 %v801_v40, %v793_v39 }
 0xfb0   : > { %2696 = vtanh.f32 %v803_v41  ;;  %v870_v62 = vrot.slane %v803_v41, 6  ;;  %v3071_v41 = vadd.f32 %v2940_v7, %v2989_v27 }
 0xfba   : > { %v2697_v42 = vpop.eup %2696 }
 0xfbb   : > { %806 = vrot.lane.b32.xlu0 %v2697_v42, %s2856_s6 }
0x102d   : > { %v807_v43 = vpop.permute.xlu0 %806 }
0x102e   : > { %v809_v44 = vmul.f32 %v2695_v36, %v807_v43 }
0x1030   : > { %v810_v45 = vpack.c.bf16 %v809_v44, %v809_v44  ;;  %v2222_v8 = vsel %vm2216_vm2, %v3023_v18, %v809_v44 }
0x1032   : > { %v812_v46 = vrot.slane %v810_v45, 1 }
0x1034   : > { %813 = vrot.lane.b32.xlu1 %v812_v46, %s2857_s7 }
0x10a6   : > { %v814_v47 = vpop.permute.xlu1 %813 }
0x10a7   : > { %2528 = vmatmul.mubr.msk.bf16.vlgmr.msra.gmra.mrb[16].mxu1 %vm277_vm1, %v814_v47 }
0x10a8   : > { %2538 = vmatpush3.bf16.msra.mxu1 %v2917_v2  ;;  %2539 = vmatprep.mubr.msk.bf16.mxu1 %vm2853_vm0, %v2852_v0 }
0x10a9   : > { %2549 = vmatprep.subr.bf16.mxu1 %v2852_v0 }
0x117a   : > { %v852_v48 = vpop.f32.mrb[16].mxu1 }
0x117b   : > { %v859_v49 = vrot.slane %v852_v48, 4  ;;  %v2529_v50 = vpop.f32.mrb[17].mxu1 }
0x117c   : > { %v855_v51 = vpop.f32.mrb[18].mxu1 }
0x117d   : > { %v861_v52 = vadd.f32 %v859_v49, %v3017_v59  ;;  %v2530_v9 = vpop.f32.mrb[19].mxu1 }
0x117f   : > { %2698 = vtanh.f32 %v861_v52  ;;  %v2384_v54 = vmul.f32 -1.442695, %v861_v52 }
0x1181   : > { %2700 = vpow2.f32 %v2384_v54 }
0x1189   : > { %v2699_v53 = vpop.eup %2698 }
0x118a   : > { %874 = vrot.lane.b32.xlu0 %v2699_v53, %s2855_s5 }
0x118b   : > { %v2701_v55 = vpop.eup %2700 }
0x118c   : > { %v865_v57 = vadd.f32 1.0, %v2701_v55 }
0x118e   : > { %2702 = vrcp.f32 %v865_v57 }
0x1198   : > { %v2703_v58 = vpop.eup %2702 }
0x1199   : > { %v872_v63 = vmul.f32 %v2703_v58, %v870_v62 }
0x11fc   : > { %v875_v60 = vpop.permute.xlu0 %874 }
0x11fd   : > { %v877_v61 = vmul.f32 %v2703_v58, %v875_v60 }
0x11ff   : > { %879 = vrot.lane.b32.xlu1 %v877_v61, %s2856_s6 }
0x1271   : > { %v880_v1 = vpop.permute.xlu1 %879 }
0x1272   : > { %v882_v3 = vadd.f32 %v880_v1, %v872_v63 }
0x1274   : > { %2704 = vtanh.f32 %v882_v3  ;;  %v949_v28 = vrot.slane %v882_v3, 6 }
0x127e   : > { %v2705_v4 = vpop.eup %2704 }
0x127f   : > { %885 = vrot.lane.b32.xlu0 %v2705_v4, %s2856_s6 }
0x12f1   : > { %v886_v5 = vpop.permute.xlu0 %885 }
0x12f2   : > { %v888_v6 = vmul.f32 %v2703_v58, %v886_v5 }
0x12f4   : > { %v889_v10 = vpack.c.bf16 %v888_v6, %v888_v6  ;;  %v2223_v11 = vsel %vm2218_vm3, %v2222_v8, %v888_v6 }
0x12f6   : > { %v891_v13 = vrot.slane %v889_v10, 2 }
0x12f8   : > { %892 = vrot.lane.b32.xlu1 %v891_v13, %s2857_s7 }
0x136a   : > { %v893_v12 = vpop.permute.xlu1 %892 }
0x136b   : > { %2534 = vmatmul.mubr.msk.bf16.vlgmr.msra.gmra.mrb[20].mxu0 %vm277_vm1, %v893_v12 }
0x136c   : > { %2544 = vmatpush3.bf16.msra.mxu0 %v2917_v2  ;;  %2545 = vmatprep.mubr.msk.bf16.mxu0 %vm2853_vm0, %v2852_v0 }
0x136d   : > { %2555 = vmatprep.subr.bf16.mxu0 %v2852_v0 }
0x143e   : > { %v931_v14 = vpop.f32.mrb[20].mxu0 }
0x143f   : > { %v938_v15 = vrot.slane %v931_v14, 2  ;;  %v2535_v16 = vpop.f32.mrb[21].mxu0 }
0x1440   : > { %v934_v17 = vpop.f32.mrb[22].mxu0 }
0x1441   : > { %v940_v18 = vadd.f32 %v938_v15, %v3017_v59  ;;  %v2536_v19 = vpop.f32.mrb[23].mxu0 }
0x1443   : > { %2706 = vtanh.f32 %v940_v18  ;;  %v2386_v21 = vmul.f32 -1.442695, %v940_v18 }
0x1445   : > { %2708 = vpow2.f32 %v2386_v21 }
0x144d   : > { %v2707_v20 = vpop.eup %2706 }
0x144e   : > { %953 = vrot.lane.b32.xlu0 %v2707_v20, %s2855_s5 }
0x144f   : > { %v2709_v22 = vpop.eup %2708 }
0x1450   : > { %v944_v23 = vadd.f32 1.0, %v2709_v22 }
0x1452   : > { %2710 = vrcp.f32 %v944_v23 }
0x145c   : > { %v2711_v24 = vpop.eup %2710 }
0x145d   : > { %v951_v31 = vmul.f32 %v2711_v24, %v949_v28 }
0x14c0   : > { %v954_v25 = vpop.permute.xlu0 %953 }
0x14c1   : > { %v956_v26 = vmul.f32 %v2711_v24, %v954_v25 }
0x14c3   : > { %958 = vrot.lane.b32.xlu1 %v956_v26, %s2856_s6 }
0x1535   : > { %v959_v33 = vpop.permute.xlu1 %958 }
0x1536   : > { %v961_v35 = vadd.f32 %v959_v33, %v951_v31 }
0x1538   : > { %2712 = vtanh.f32 %v961_v35  ;;  %v1025_v27 = vrot.slane %v961_v35, 6 }
0x1542   : > { %v2713_v59 = vpop.eup %2712 }
0x1543   : > { %964 = vrot.lane.b32.xlu0 %v2713_v59, %s2856_s6 }
0x15b5   : > { %v965_v36 = vpop.permute.xlu0 %964 }
0x15b6   : > { %v967_v30 = vmul.f32 %v2711_v24, %v965_v36 }
0x15b8   : > { %v968_v37 = vpack.c.bf16 %v967_v30, %v967_v30  ;;  %v3061_v38 = vsel %vm2220_vm4, %v2223_v11, %v967_v30 }
0x15ba   : > { %v970_v39 = vrot.slane %v968_v37, 3 }
0x15bc   : > { %971 = vrot.lane.b32.xlu1 %v970_v39, %s2857_s7 }
0x162e   : > { %v972_v40 = vpop.permute.xlu1 %971 }
0x162f   : > { %2540 = vmatmul.mubr.msk.bf16.vlgmr.msra.gmra.mrb[20].mxu1 %vm277_vm1, %v972_v40 }
0x1630   : > { %2550 = vmatpush3.bf16.msra.mxu1 %v2917_v2  ;;  %2551 = vmatprep.mubr.msk.bf16.mxu1 %vm2853_vm0, %v2852_v0 }
0x1631   : > { %2561 = vmatprep.subr.bf16.mxu1 %v2852_v0 }
0x1702   : > { %v1010_v42 = vpop.f32.mrb[20].mxu1 }
0x1703   : > { %v1016_v43 = vadd.f32 %v1010_v42, %v3071_v41  ;;  %v2541_v44 = vpop.f32.mrb[21].mxu1 }
0x1704   : > { %v1013_v45 = vpop.f32.mrb[22].mxu1 }
0x1705   : > { %2714 = vtanh.f32 %v1016_v43  ;;  %v2542_v46 = vpop.f32.mrb[23].mxu1  ;;  %v2388_v48 = vmul.f32 -1.442695, %v1016_v43 }
0x1707   : > { %2716 = vpow2.f32 %v2388_v48 }
0x170f   : > { %v2715_v47 = vpop.eup %2714 }
0x1710   : > { %1029 = vrot.lane.b32.xlu0 %v2715_v47, %s2855_s5 }
0x1711   : > { %v2717_v49 = vpop.eup %2716 }
0x1712   : > { %v1020_v50 = vadd.f32 1.0, %v2717_v49 }
0x1714   : > { %2718 = vrcp.f32 %v1020_v50 }
0x171e   : > { %v2719_v51 = vpop.eup %2718 }
0x171f   : > { %v1027_v53 = vmul.f32 %v2719_v51, %v1025_v27 }
0x1782   : > { %v1030_v52 = vpop.permute.xlu0 %1029 }
0x1783   : > { %v1032_v9 = vmul.f32 %v2719_v51, %v1030_v52 }
0x1785   : > { %1034 = vrot.lane.b32.xlu1 %v1032_v9, %s2856_s6 }
0x17f7   : > { %v1035_v54 = vpop.permute.xlu1 %1034 }
0x17f8   : > { %v1037_v55 = vadd.f32 %v1035_v54, %v1027_v53 }
0x17fa   : > { %2720 = vtanh.f32 %v1037_v55  ;;  %v1103_v16 = vrot.slane %v1037_v55, 6 }
0x1804   : > { %v2721_v57 = vpop.eup %2720 }
0x1805   : > { %1040 = vrot.lane.b32.xlu0 %v2721_v57, %s2856_s6 }
0x1877   : > { %v1041_v58 = vpop.permute.xlu0 %1040 }
0x1878   : > { %v3077_v60 = vmul.f32 %v2719_v51, %v1041_v58 }
0x187a   : > { %v1044_v61 = vpack.c.bf16 %v3077_v60, %v3077_v60 }
0x187c   : > { %1046 = vrot.lane.b32.xlu1 %v1044_v61, %s2857_s7 }
0x18ee   : > { %v1047_v62 = vpop.permute.xlu1 %1046 }
0x18ef   : > { %2546 = vmatmul.mubr.msk.bf16.vlgmr.msra.gmra.mrb[24].mxu0 %vm277_vm1, %v1047_v62 }
0x18f0   : > { %2556 = vmatpush3.bf16.msra.mxu0 %v2917_v2  ;;  %2557 = vmatprep.mubr.msk.bf16.mxu0 %vm2853_vm0, %v2852_v0 }
0x18f1   : > { %2567 = vmatprep.subr.bf16.mxu0 %v2852_v0 }
0x19c2   : > { %v1085_v63 = vpop.f32.mrb[24].mxu0 }
0x19c3   : > { %v1092_v1 = vrot.slane %v1085_v63, 6  ;;  %v2547_v3 = vpop.f32.mrb[25].mxu0 }
0x19c4   : > { %v1088_v4 = vpop.f32.mrb[26].mxu0 }
0x19c5   : > { %v1094_v5 = vadd.f32 %v1092_v1, %v3071_v41  ;;  %v2548_v6 = vpop.f32.mrb[27].mxu0 }
0x19c7   : > { %2722 = vtanh.f32 %v1094_v5  ;;  %v2390_v10 = vmul.f32 -1.442695, %v1094_v5 }
0x19c9   : > { %2724 = vpow2.f32 %v2390_v10 }
0x19d1   : > { %v2723_v8 = vpop.eup %2722 }
0x19d2   : > { %1107 = vrot.lane.b32.xlu0 %v2723_v8, %s2855_s5 }
0x19d3   : > { %v2725_v11 = vpop.eup %2724 }
0x19d4   : > { %v1098_v13 = vadd.f32 1.0, %v2725_v11 }
0x19d6   : > { %2726 = vrcp.f32 %v1098_v13 }
0x19e0   : > { %v2727_v12 = vpop.eup %2726 }
0x19e1   : > { %v1105_v17 = vmul.f32 %v2727_v12, %v1103_v16 }
0x1a44   : > { %v1108_v14 = vpop.permute.xlu0 %1107 }
0x1a45   : > { %v1110_v15 = vmul.f32 %v2727_v12, %v1108_v14 }
0x1a47   : > { %1112 = vrot.lane.b32.xlu1 %v1110_v15, %s2856_s6 }
0x1ab9   : > { %v1113_v18 = vpop.permute.xlu1 %1112 }
0x1aba   : > { %v1115_v19 = vadd.f32 %v1113_v18, %v1105_v17 }
0x1abc   : > { %2728 = vtanh.f32 %v1115_v19  ;;  %v1182_v44 = vrot.slane %v1115_v19, 6  ;;  %v3125_v19 = vadd.f32 %v2940_v7, %v2991_v29 }
0x1ac6   : > { %v2729_v20 = vpop.eup %2728 }
0x1ac7   : > { %1118 = vrot.lane.b32.xlu0 %v2729_v20, %s2856_s6 }
0x1b39   : > { %v1119_v21 = vpop.permute.xlu0 %1118 }
0x1b3a   : > { %v1121_v22 = vmul.f32 %v2727_v12, %v1119_v21 }
0x1b3c   : > { %v1122_v23 = vpack.c.bf16 %v1121_v22, %v1121_v22  ;;  %v2225_v51 = vsel %vm2216_vm2, %v3077_v60, %v1121_v22 }
0x1b3e   : > { %v1124_v24 = vrot.slane %v1122_v23, 1 }
0x1b40   : > { %1125 = vrot.lane.b32.xlu1 %v1124_v24, %s2857_s7 }
0x1bb2   : > { %v1126_v25 = vpop.permute.xlu1 %1125 }
0x1bb3   : > { %2552 = vmatmul.mubr.msk.bf16.vlgmr.msra.gmra.mrb[24].mxu1 %vm277_vm1, %v1126_v25 }
0x1bb4   : > { %2562 = vmatpush3.bf16.msra.mxu1 %v2917_v2  ;;  %2563 = vmatprep.mubr.msk.bf16.mxu1 %vm2853_vm0, %v2852_v0 }
0x1bb5   : > { %2573 = vmatprep.subr.bf16.mxu1 %v2852_v0 }
0x1c86   : > { %v1164_v26 = vpop.f32.mrb[24].mxu1 }
0x1c87   : > { %v1171_v28 = vrot.slane %v1164_v26, 4  ;;  %v2553_v31 = vpop.f32.mrb[25].mxu1 }
0x1c88   : > { %v1167_v33 = vpop.f32.mrb[26].mxu1 }
0x1c89   : > { %v1173_v35 = vadd.f32 %v1171_v28, %v3071_v41  ;;  %v2554_v59 = vpop.f32.mrb[27].mxu1 }
0x1c8b   : > { %2730 = vtanh.f32 %v1173_v35  ;;  %v2392_v30 = vmul.f32 -1.442695, %v1173_v35 }
0x1c8d   : > { %2732 = vpow2.f32 %v2392_v30 }
0x1c95   : > { %v2731_v36 = vpop.eup %2730 }
0x1c96   : > { %1186 = vrot.lane.b32.xlu0 %v2731_v36, %s2855_s5 }
0x1c97   : > { %v2733_v37 = vpop.eup %2732 }
0x1c98   : > { %v1177_v39 = vadd.f32 1.0, %v2733_v37 }
0x1c9a   : > { %2734 = vrcp.f32 %v1177_v39 }
0x1ca4   : > { %v2735_v40 = vpop.eup %2734 }
0x1ca5   : > { %v1184_v45 = vmul.f32 %v2735_v40, %v1182_v44 }
0x1d08   : > { %v1187_v42 = vpop.permute.xlu0 %1186 }
0x1d09   : > { %v1189_v43 = vmul.f32 %v2735_v40, %v1187_v42 }
0x1d0b   : > { %1191 = vrot.lane.b32.xlu1 %v1189_v43, %s2856_s6 }
0x1d7d   : > { %v1192_v46 = vpop.permute.xlu1 %1191 }
0x1d7e   : > { %v1194_v47 = vadd.f32 %v1192_v46, %v1184_v45 }
0x1d80   : > { %2736 = vtanh.f32 %v1194_v47  ;;  %v1261_v8 = vrot.slane %v1194_v47, 6 }
0x1d8a   : > { %v2737_v48 = vpop.eup %2736 }
0x1d8b   : > { %1197 = vrot.lane.b32.xlu0 %v2737_v48, %s2856_s6 }
0x1dfd   : > { %v1198_v49 = vpop.permute.xlu0 %1197 }
0x1dfe   : > { %v1200_v50 = vmul.f32 %v2735_v40, %v1198_v49 }
0x1e00   : > { %v1201_v52 = vpack.c.bf16 %v1200_v50, %v1200_v50  ;;  %v2226_v9 = vsel %vm2218_vm3, %v2225_v51, %v1200_v50 }
0x1e02   : > { %v1203_v27 = vrot.slane %v1201_v52, 2 }
0x1e04   : > { %1204 = vrot.lane.b32.xlu1 %v1203_v27, %s2857_s7 }
0x1e76   : > { %v1205_v53 = vpop.permute.xlu1 %1204 }
0x1e77   : > { %2558 = vmatmul.mubr.msk.bf16.vlgmr.msra.gmra.mrb[28].mxu0 %vm277_vm1, %v1205_v53 }
0x1e78   : > { %2568 = vmatpush3.bf16.msra.mxu0 %v2917_v2  ;;  %2569 = vmatprep.mubr.msk.bf16.mxu0 %vm2853_vm0, %v2852_v0 }
0x1e79   : > { %2579 = vmatprep.subr.bf16.mxu0 %v2852_v0 }
0x1f4a   : > { %v1243_v54 = vpop.f32.mrb[28].mxu0 }
0x1f4b   : > { %v1250_v55 = vrot.slane %v1243_v54, 2  ;;  %v2559_v57 = vpop.f32.mrb[29].mxu0 }
0x1f4c   : > { %v1246_v58 = vpop.f32.mrb[30].mxu0 }
0x1f4d   : > { %v1252_v60 = vadd.f32 %v1250_v55, %v3071_v41  ;;  %v2560_v61 = vpop.f32.mrb[31].mxu0 }
0x1f4f   : > { %2738 = vtanh.f32 %v1252_v60  ;;  %v2394_v63 = vmul.f32 -1.442695, %v1252_v60 }
0x1f51   : > { %2740 = vpow2.f32 %v2394_v63 }
0x1f59   : > { %v2739_v62 = vpop.eup %2738 }
0x1f5a   : > { %1265 = vrot.lane.b32.xlu0 %v2739_v62, %s2855_s5 }
0x1f5b   : > { %v2741_v1 = vpop.eup %2740 }
0x1f5c   : > { %v1256_v3 = vadd.f32 1.0, %v2741_v1 }
0x1f5e   : > { %2742 = vrcp.f32 %v1256_v3 }
0x1f68   : > { %v2743_v4 = vpop.eup %2742 }
0x1f69   : > { %v1263_v10 = vmul.f32 %v2743_v4, %v1261_v8 }
0x1fcc   : > { %v1266_v5 = vpop.permute.xlu0 %1265 }
0x1fcd   : > { %v1268_v6 = vmul.f32 %v2743_v4, %v1266_v5 }
0x1fcf   : > { %1270 = vrot.lane.b32.xlu1 %v1268_v6, %s2856_s6 }
0x2041   : > { %v1271_v11 = vpop.permute.xlu1 %1270 }
0x2042   : > { %v1273_v13 = vadd.f32 %v1271_v11, %v1263_v10 }
0x2044   : > { %2744 = vtanh.f32 %v1273_v13  ;;  %v1337_v7 = vrot.slane %v1273_v13, 6 }
0x204e   : > { %v2745_v41 = vpop.eup %2744 }
0x204f   : > { %1276 = vrot.lane.b32.xlu0 %v2745_v41, %s2856_s6 }
0x20c1   : > { %v1277_v12 = vpop.permute.xlu0 %1276 }
0x20c2   : > { %v1279_v14 = vmul.f32 %v2743_v4, %v1277_v12  ;;  %v3148_v4 = vld [vmem:[%s2907_s24] sm:$0xff]  }
0x20c4   : > { %v1280_v15 = vpack.c.bf16 %v1279_v14, %v1279_v14  ;;  %v3115_v16 = vsel %vm2220_vm4, %v2226_v9, %v1279_v14 }
0x20c6   : > { %v1282_v17 = vrot.slane %v1280_v15, 3 }
0x20c8   : > { %1283 = vrot.lane.b32.xlu1 %v1282_v17, %s2857_s7 }
0x213a   : > { %v1284_v18 = vpop.permute.xlu1 %1283 }
0x213b   : > { %2564 = vmatmul.mubr.msk.bf16.vlgmr.msra.gmra.mrb[28].mxu1 %vm277_vm1, %v1284_v18 }
0x213c   : > { %2574 = vmatpush3.bf16.msra.mxu1 %v2917_v2  ;;  %2575 = vmatprep.mubr.msk.bf16.mxu1 %vm2853_vm0, %v2852_v0 }
0x213d   : > { %2585 = vmatprep.subr.bf16.mxu1 %v2852_v0 }
0x220e   : > { %v1322_v20 = vpop.f32.mrb[28].mxu1 }
0x220f   : > { %v1328_v21 = vadd.f32 %v1322_v20, %v3125_v19  ;;  %v2565_v22 = vpop.f32.mrb[29].mxu1 }
0x2210   : > { %v1325_v23 = vpop.f32.mrb[30].mxu1 }
0x2211   : > { %2746 = vtanh.f32 %v1328_v21  ;;  %v2566_v24 = vpop.f32.mrb[31].mxu1  ;;  %v2396_v26 = vmul.f32 -1.442695, %v1328_v21 }
0x2213   : > { %2748 = vpow2.f32 %v2396_v26 }
0x221b   : > { %v2747_v25 = vpop.eup %2746 }
0x221c   : > { %1341 = vrot.lane.b32.xlu0 %v2747_v25, %s2855_s5 }
0x221d   : > { %v2749_v28 = vpop.eup %2748 }
0x221e   : > { %v1332_v31 = vadd.f32 1.0, %v2749_v28 }
0x2220   : > { %2750 = vrcp.f32 %v1332_v31 }
0x222a   : > { %v2751_v33 = vpop.eup %2750 }
0x222b   : > { %v1339_v29 = vmul.f32 %v2751_v33, %v1337_v7 }
0x228e   : > { %v1342_v35 = vpop.permute.xlu0 %1341 }
0x228f   : > { %v1344_v59 = vmul.f32 %v2751_v33, %v1342_v35 }
0x2291   : > { %1346 = vrot.lane.b32.xlu1 %v1344_v59, %s2856_s6 }
0x2303   : > { %v1347_v36 = vpop.permute.xlu1 %1346 }
0x2304   : > { %v1349_v30 = vadd.f32 %v1347_v36, %v1339_v29 }
0x2306   : > { %2752 = vtanh.f32 %v1349_v30  ;;  %v1415_v54 = vrot.slane %v1349_v30, 6 }
0x2310   : > { %v2753_v37 = vpop.eup %2752 }
0x2311   : > { %1352 = vrot.lane.b32.xlu0 %v2753_v37, %s2856_s6 }
0x2383   : > { %v1353_v39 = vpop.permute.xlu0 %1352 }
0x2384   : > { %v3131_v40 = vmul.f32 %v2751_v33, %v1353_v39 }
0x2386   : > { %v1356_v42 = vpack.c.bf16 %v3131_v40, %v3131_v40 }
0x2388   : > { %1358 = vrot.lane.b32.xlu1 %v1356_v42, %s2857_s7 }
0x23fa   : > { %v1359_v43 = vpop.permute.xlu1 %1358 }
0x23fb   : > { %2570 = vmatmul.mubr.msk.bf16.vlgmr.msra.gmra.mrb[32].mxu0 %vm277_vm1, %v1359_v43 }
0x23fc   : > { %2580 = vmatpush3.bf16.msra.mxu0 %v2917_v2  ;;  %2581 = vmatprep.mubr.msk.bf16.mxu0 %vm2853_vm0, %v2852_v0 }
0x23fd   : > { %2591 = vmatprep.subr.bf16.mxu0 %v2852_v0 }
0x24ce   : > { %v1397_v44 = vpop.f32.mrb[32].mxu0 }
0x24cf   : > { %v1404_v45 = vrot.slane %v1397_v44, 6  ;;  %v2571_v46 = vpop.f32.mrb[33].mxu0 }
0x24d0   : > { %v1400_v47 = vpop.f32.mrb[34].mxu0 }
0x24d1   : > { %v1406_v48 = vadd.f32 %v1404_v45, %v3125_v19  ;;  %v2572_v49 = vpop.f32.mrb[35].mxu0 }
0x24d3   : > { %2754 = vtanh.f32 %v1406_v48  ;;  %v2398_v51 = vmul.f32 -1.442695, %v1406_v48 }
0x24d5   : > { %2756 = vpow2.f32 %v2398_v51 }
0x24dd   : > { %v2755_v50 = vpop.eup %2754 }
0x24de   : > { %1419 = vrot.lane.b32.xlu0 %v2755_v50, %s2855_s5 }
0x24df   : > { %v2757_v52 = vpop.eup %2756 }
0x24e0   : > { %v1410_v2 = vadd.f32 1.0, %v2757_v52 }
0x24e2   : > { %2758 = vrcp.f32 %v1410_v2 }
0x24ec   : > { %v2759_v9 = vpop.eup %2758 }
0x24ed   : > { %v1417_v55 = vmul.f32 %v2759_v9, %v1415_v54 }
0x2550   : > { %v1420_v27 = vpop.permute.xlu0 %1419 }
0x2551   : > { %v1422_v53 = vmul.f32 %v2759_v9, %v1420_v27 }
0x2553   : > { %1424 = vrot.lane.b32.xlu1 %v1422_v53, %s2856_s6 }
0x25c5   : > { %v1425_v57 = vpop.permute.xlu1 %1424 }
0x25c6   : > { %v1427_v58 = vadd.f32 %v1425_v57, %v1417_v55  ;;  %v3181_v57 = vld [vmem:[%s2937_s30] ss:$0 sm:$0xff] }
0x25c8   : > { %2760 = vtanh.f32 %v1427_v58  ;;  %v1494_v21 = vrot.slane %v1427_v58, 6  ;;  %v3185_v58 = vadd.f32 %v3181_v57, %v2993_v32 }
0x25d2   : > { %v2761_v60 = vpop.eup %2760 }
0x25d3   : > { %1430 = vrot.lane.b32.xlu0 %v2761_v60, %s2856_s6 }
0x2645   : > { %v1431_v61 = vpop.permute.xlu0 %1430 }
0x2646   : > { %v1433_v62 = vmul.f32 %v2759_v9, %v1431_v61 }
0x2648   : > { %v1434_v63 = vpack.c.bf16 %v1433_v62, %v1433_v62  ;;  %v2228_v31 = vsel %vm2216_vm2, %v3131_v40, %v1433_v62 }
0x264a   : > { %v1436_v1 = vrot.slane %v1434_v63, 1 }
0x264c   : > { %1437 = vrot.lane.b32.xlu1 %v1436_v1, %s2857_s7 }
0x26be   : > { %v1438_v3 = vpop.permute.xlu1 %1437 }
0x26bf   : > { %2576 = vmatmul.mubr.msk.bf16.vlgmr.msra.gmra.mrb[32].mxu1 %vm277_vm1, %v1438_v3 }
0x26c0   : > { %2586 = vmatpush3.bf16.msra.mxu1 %v3148_v4  ;;  %2587 = vmatprep.mubr.msk.bf16.mxu1 %vm2853_vm0, %v2852_v0 }
0x26c1   : > { %2597 = vmatprep.subr.bf16.mxu1 %v2852_v0 }
0x2792   : > { %v1476_v5 = vpop.f32.mrb[32].mxu1 }
0x2793   : > { %v1483_v6 = vrot.slane %v1476_v5, 4  ;;  %v2577_v8 = vpop.f32.mrb[33].mxu1 }
0x2794   : > { %v1479_v10 = vpop.f32.mrb[34].mxu1 }
0x2795   : > { %v1485_v11 = vadd.f32 %v1483_v6, %v3125_v19  ;;  %v2578_v13 = vpop.f32.mrb[35].mxu1 }
0x2797   : > { %2762 = vtanh.f32 %v1485_v11  ;;  %v2400_v12 = vmul.f32 -1.442695, %v1485_v11 }
0x2799   : > { %2764 = vpow2.f32 %v2400_v12 }
0x27a1   : > { %v2763_v41 = vpop.eup %2762 }
0x27a2   : > { %1498 = vrot.lane.b32.xlu0 %v2763_v41, %s2855_s5 }
0x27a3   : > { %v2765_v14 = vpop.eup %2764 }
0x27a4   : > { %v1489_v15 = vadd.f32 1.0, %v2765_v14 }
0x27a6   : > { %2766 = vrcp.f32 %v1489_v15 }
0x27b0   : > { %v2767_v17 = vpop.eup %2766 }
0x27b1   : > { %v1496_v22 = vmul.f32 %v2767_v17, %v1494_v21 }
0x2814   : > { %v1499_v18 = vpop.permute.xlu0 %1498 }
0x2815   : > { %v1501_v20 = vmul.f32 %v2767_v17, %v1499_v18 }
0x2817   : > { %1503 = vrot.lane.b32.xlu1 %v1501_v20, %s2856_s6 }
0x2889   : > { %v1504_v23 = vpop.permute.xlu1 %1503 }
0x288a   : > { %v1506_v24 = vadd.f32 %v1504_v23, %v1496_v22 }
0x288c   : > { %2768 = vtanh.f32 %v1506_v24  ;;  %v1573_v49 = vrot.slane %v1506_v24, 6 }
0x2896   : > { %v2769_v25 = vpop.eup %2768 }
0x2897   : > { %1509 = vrot.lane.b32.xlu0 %v2769_v25, %s2856_s6 }
0x2909   : > { %v1510_v26 = vpop.permute.xlu0 %1509 }
0x290a   : > { %v1512_v28 = vmul.f32 %v2767_v17, %v1510_v26 }
0x290c   : > { %v1513_v33 = vpack.c.bf16 %v1512_v28, %v1512_v28  ;;  %v2229_v35 = vsel %vm2218_vm3, %v2228_v31, %v1512_v28 }
0x290e   : > { %v1515_v59 = vrot.slane %v1513_v33, 2 }
0x2910   : > { %1516 = vrot.lane.b32.xlu1 %v1515_v59, %s2857_s7 }
0x2982   : > { %v1517_v7 = vpop.permute.xlu1 %1516 }
0x2983   : > { %2582 = vmatmul.mubr.msk.bf16.vlgmr.msra.gmra.mrb[36].mxu0 %vm277_vm1, %v1517_v7 }
0x2984   : > { %2592 = vmatpush3.bf16.msra.mxu0 %v3148_v4  ;;  %2593 = vmatprep.mubr.msk.bf16.mxu0 %vm2853_vm0, %v2852_v0 }
0x2985   : > { %2603 = vmatprep.subr.bf16.mxu0 %v2852_v0 }
0x2a56   : > { %v1555_v29 = vpop.f32.mrb[36].mxu0 }
0x2a57   : > { %v1562_v36 = vrot.slane %v1555_v29, 2  ;;  %v2583_v30 = vpop.f32.mrb[37].mxu0 }
0x2a58   : > { %v1558_v37 = vpop.f32.mrb[38].mxu0 }
0x2a59   : > { %v1564_v39 = vadd.f32 %v1562_v36, %v3125_v19  ;;  %v2584_v40 = vpop.f32.mrb[39].mxu0 }
0x2a5b   : > { %2770 = vtanh.f32 %v1564_v39  ;;  %v2402_v43 = vmul.f32 -1.442695, %v1564_v39 }
0x2a5d   : > { %2772 = vpow2.f32 %v2402_v43 }
0x2a65   : > { %v2771_v42 = vpop.eup %2770 }
0x2a66   : > { %1577 = vrot.lane.b32.xlu0 %v2771_v42, %s2855_s5 }
0x2a67   : > { %v2773_v44 = vpop.eup %2772 }
0x2a68   : > { %v1568_v45 = vadd.f32 1.0, %v2773_v44 }
0x2a6a   : > { %2774 = vrcp.f32 %v1568_v45 }
0x2a74   : > { %v2775_v46 = vpop.eup %2774 }
0x2a75   : > { %v1575_v50 = vmul.f32 %v2775_v46, %v1573_v49 }
0x2ad8   : > { %v1578_v47 = vpop.permute.xlu0 %1577 }
0x2ad9   : > { %v1580_v48 = vmul.f32 %v2775_v46, %v1578_v47 }
0x2adb   : > { %1582 = vrot.lane.b32.xlu1 %v1580_v48, %s2856_s6 }
0x2b4d   : > { %v1583_v51 = vpop.permute.xlu1 %1582 }
0x2b4e   : > { %v1585_v19 = vadd.f32 %v1583_v51, %v1575_v50 }
0x2b50   : > { %2776 = vtanh.f32 %v1585_v19  ;;  %v1649_v32 = vrot.slane %v1585_v19, 6 }
0x2b5a   : > { %v2777_v52 = vpop.eup %2776 }
0x2b5b   : > { %1588 = vrot.lane.b32.xlu0 %v2777_v52, %s2856_s6 }
0x2bcd   : > { %v1589_v2 = vpop.permute.xlu0 %1588 }
0x2bce   : > { %v1591_v9 = vmul.f32 %v2775_v46, %v1589_v2 }
0x2bd0   : > { %v1592_v27 = vpack.c.bf16 %v1591_v9, %v1591_v9  ;;  %v3172_v53 = vsel %vm2220_vm4, %v2229_v35, %v1591_v9 }
0x2bd2   : > { %v1594_v54 = vrot.slane %v1592_v27, 3 }
0x2bd4   : > { %1595 = vrot.lane.b32.xlu1 %v1594_v54, %s2857_s7 }
0x2c46   : > { %v1596_v55 = vpop.permute.xlu1 %1595 }
0x2c47   : > { %2588 = vmatmul.mubr.msk.bf16.vlgmr.msra.gmra.mrb[36].mxu1 %vm277_vm1, %v1596_v55 }
0x2c48   : > { %2598 = vmatpush3.bf16.msra.mxu1 %v3148_v4  ;;  %2599 = vmatprep.mubr.msk.bf16.mxu1 %vm2853_vm0, %v2852_v0 }
0x2c49   : > { %2609 = vmatprep.subr.bf16.mxu1 %v2852_v0 }
0x2d1a   : > { %v1634_v60 = vpop.f32.mrb[36].mxu1 }
0x2d1b   : > { %v1640_v61 = vadd.f32 %v1634_v60, %v3185_v58  ;;  %v2589_v62 = vpop.f32.mrb[37].mxu1 }
0x2d1c   : > { %v1637_v63 = vpop.f32.mrb[38].mxu1 }
0x2d1d   : > { %2778 = vtanh.f32 %v1640_v61  ;;  %v2590_v1 = vpop.f32.mrb[39].mxu1  ;;  %v2404_v5 = vmul.f32 -1.442695, %v1640_v61 }
0x2d1f   : > { %2780 = vpow2.f32 %v2404_v5 }
0x2d27   : > { %v2779_v3 = vpop.eup %2778 }
0x2d28   : > { %1653 = vrot.lane.b32.xlu0 %v2779_v3, %s2855_s5 }
0x2d29   : > { %v2781_v6 = vpop.eup %2780 }
0x2d2a   : > { %v1644_v8 = vadd.f32 1.0, %v2781_v6 }
0x2d2c   : > { %2782 = vrcp.f32 %v1644_v8 }
0x2d36   : > { %v2783_v10 = vpop.eup %2782 }
0x2d37   : > { %v1651_v41 = vmul.f32 %v2783_v10, %v1649_v32 }
0x2d9a   : > { %v1654_v11 = vpop.permute.xlu0 %1653 }
0x2d9b   : > { %v1656_v13 = vmul.f32 %v2783_v10, %v1654_v11 }
0x2d9d   : > { %1658 = vrot.lane.b32.xlu1 %v1656_v13, %s2856_s6 }
0x2e0f   : > { %v1659_v12 = vpop.permute.xlu1 %1658 }
0x2e10   : > { %v1661_v14 = vadd.f32 %v1659_v12, %v1651_v41 }
0x2e12   : > { %2784 = vtanh.f32 %v1661_v14  ;;  %v1727_v30 = vrot.slane %v1661_v14, 6 }
0x2e1c   : > { %v2785_v15 = vpop.eup %2784 }
0x2e1d   : > { %1664 = vrot.lane.b32.xlu0 %v2785_v15, %s2856_s6 }
0x2e8f   : > { %v1665_v17 = vpop.permute.xlu0 %1664 }
0x2e90   : > { %v3191_v18 = vmul.f32 %v2783_v10, %v1665_v17 }
0x2e92   : > { %v1668_v20 = vpack.c.bf16 %v3191_v18, %v3191_v18 }
0x2e94   : > { %1670 = vrot.lane.b32.xlu1 %v1668_v20, %s2857_s7 }
0x2f06   : > { %v1671_v21 = vpop.permute.xlu1 %1670 }
0x2f07   : > { %2594 = vmatmul.mubr.msk.bf16.vlgmr.msra.gmra.mrb[40].mxu0 %vm277_vm1, %v1671_v21 }
0x2f08   : > { %2604 = vmatpush3.bf16.msra.mxu0 %v3148_v4  ;;  %2605 = vmatprep.mubr.msk.bf16.mxu0 %vm2853_vm0, %v2852_v0 }
0x2f09   : > { %2615 = vmatprep.subr.bf16.mxu0 %v2852_v0 }
0x2fda   : > { %v1709_v22 = vpop.f32.mrb[40].mxu0 }
0x2fdb   : > { %v1716_v23 = vrot.slane %v1709_v22, 6  ;;  %v2595_v24 = vpop.f32.mrb[41].mxu0 }
0x2fdc   : > { %v1712_v25 = vpop.f32.mrb[42].mxu0 }
0x2fdd   : > { %v1718_v26 = vadd.f32 %v1716_v23, %v3185_v58  ;;  %v2596_v28 = vpop.f32.mrb[43].mxu0 }
0x2fdf   : > { %2786 = vtanh.f32 %v1718_v26  ;;  %v2406_v33 = vmul.f32 -1.442695, %v1718_v26 }
0x2fe1   : > { %2788 = vpow2.f32 %v2406_v33 }
0x2fe9   : > { %v2787_v31 = vpop.eup %2786 }
0x2fea   : > { %1731 = vrot.lane.b32.xlu0 %v2787_v31, %s2855_s5 }
0x2feb   : > { %v2789_v35 = vpop.eup %2788 }
0x2fec   : > { %v1722_v59 = vadd.f32 1.0, %v2789_v35 }
0x2fee   : > { %2790 = vrcp.f32 %v1722_v59 }
0x2ff8   : > { %v2791_v7 = vpop.eup %2790 }
0x2ff9   : > { %v1729_v37 = vmul.f32 %v2791_v7, %v1727_v30 }
0x305c   : > { %v1732_v29 = vpop.permute.xlu0 %1731 }
0x305d   : > { %v1734_v36 = vmul.f32 %v2791_v7, %v1732_v29 }
0x305f   : > { %1736 = vrot.lane.b32.xlu1 %v1734_v36, %s2856_s6 }
0x30d1   : > { %v1737_v39 = vpop.permute.xlu1 %1736 }
0x30d2   : > { %v1739_v40 = vadd.f32 %v1737_v39, %v1729_v37 }
0x30d4   : > { %2792 = vtanh.f32 %v1739_v40  ;;  %v1806_v62 = vrot.slane %v1739_v40, 6  ;;  %v3238_v40 = vadd.f32 %v3181_v57, %v2995_v34 }
0x30de   : > { %v2793_v42 = vpop.eup %2792 }
0x30df   : > { %1742 = vrot.lane.b32.xlu0 %v2793_v42, %s2856_s6 }
0x3151   : > { %v1743_v43 = vpop.permute.xlu0 %1742 }
0x3152   : > { %v1745_v44 = vmul.f32 %v2791_v7, %v1743_v43 }
0x3154   : > { %v1746_v45 = vpack.c.bf16 %v1745_v44, %v1745_v44  ;;  %v2231_v10 = vsel %vm2216_vm2, %v3191_v18, %v1745_v44 }
0x3156   : > { %v1748_v46 = vrot.slane %v1746_v45, 1 }
0x3158   : > { %1749 = vrot.lane.b32.xlu1 %v1748_v46, %s2857_s7 }
0x31ca   : > { %v1750_v47 = vpop.permute.xlu1 %1749 }
0x31cb   : > { %2600 = vmatmul.mubr.msk.bf16.vlgmr.msra.gmra.mrb[40].mxu1 %vm277_vm1, %v1750_v47 }
0x31cc   : > { %2610 = vmatpush3.bf16.msra.mxu1 %v3148_v4  ;;  %2611 = vmatprep.mubr.msk.bf16.mxu1 %vm2853_vm0, %v2852_v0 }
0x31cd   : > { %2621 = vmatprep.subr.bf16.mxu1 %v2852_v0 }
0x329e   : > { %v1788_v48 = vpop.f32.mrb[40].mxu1 }
0x329f   : > { %v1795_v49 = vrot.slane %v1788_v48, 4  ;;  %v2601_v50 = vpop.f32.mrb[41].mxu1 }
0x32a0   : > { %v1791_v51 = vpop.f32.mrb[42].mxu1 }
0x32a1   : > { %v1797_v19 = vadd.f32 %v1795_v49, %v3185_v58  ;;  %v2602_v52 = vpop.f32.mrb[43].mxu1 }
0x32a3   : > { %2794 = vtanh.f32 %v1797_v19  ;;  %v2408_v9 = vmul.f32 -1.442695, %v1797_v19 }
0x32a5   : > { %2796 = vpow2.f32 %v2408_v9 }
0x32ad   : > { %v2795_v2 = vpop.eup %2794 }
0x32ae   : > { %1810 = vrot.lane.b32.xlu0 %v2795_v2, %s2855_s5 }
0x32af   : > { %v2797_v27 = vpop.eup %2796 }
0x32b0   : > { %v1801_v54 = vadd.f32 1.0, %v2797_v27 }
0x32b2   : > { %2798 = vrcp.f32 %v1801_v54 }
0x32bc   : > { %v2799_v55 = vpop.eup %2798 }
0x32bd   : > { %v1808_v63 = vmul.f32 %v2799_v55, %v1806_v62 }
0x3320   : > { %v1811_v60 = vpop.permute.xlu0 %1810 }
0x3321   : > { %v1813_v61 = vmul.f32 %v2799_v55, %v1811_v60 }
0x3323   : > { %1815 = vrot.lane.b32.xlu1 %v1813_v61, %s2856_s6 }
0x3395   : > { %v1816_v1 = vpop.permute.xlu1 %1815 }
0x3396   : > { %v1818_v3 = vadd.f32 %v1816_v1, %v1808_v63 }
0x3398   : > { %2800 = vtanh.f32 %v1818_v3  ;;  %v1885_v31 = vrot.slane %v1818_v3, 6 }
0x33a2   : > { %v2801_v5 = vpop.eup %2800 }
0x33a3   : > { %1821 = vrot.lane.b32.xlu0 %v2801_v5, %s2856_s6 }
0x3415   : > { %v1822_v6 = vpop.permute.xlu0 %1821 }
0x3416   : > { %v1824_v8 = vmul.f32 %v2799_v55, %v1822_v6 }
0x3418   : > { %v1825_v11 = vpack.c.bf16 %v1824_v8, %v1824_v8  ;;  %v2232_v13 = vsel %vm2218_vm3, %v2231_v10, %v1824_v8 }
0x341a   : > { %v1827_v32 = vrot.slane %v1825_v11, 2 }
0x341c   : > { %1828 = vrot.lane.b32.xlu1 %v1827_v32, %s2857_s7 }
0x348e   : > { %v1829_v41 = vpop.permute.xlu1 %1828 }
0x348f   : > { %2606 = vmatmul.mubr.msk.bf16.vlgmr.msra.gmra.mrb[44].mxu0 %vm277_vm1, %v1829_v41 }
0x3490   : > { %2616 = vmatpush3.bf16.msra.mxu0 %v3148_v4  ;;  %2617 = vmatprep.mubr.msk.bf16.mxu0 %vm2853_vm0, %v2852_v0 }
0x3491   : > { %2627 = vmatprep.subr.bf16.mxu0 %v2852_v0 }
0x3562   : > { %v1867_v12 = vpop.f32.mrb[44].mxu0 }
0x3563   : > { %v1874_v14 = vrot.slane %v1867_v12, 2  ;;  %v2607_v15 = vpop.f32.mrb[45].mxu0 }
0x3564   : > { %v1870_v17 = vpop.f32.mrb[46].mxu0 }
0x3565   : > { %v1876_v18 = vadd.f32 %v1874_v14, %v3185_v58  ;;  %v2608_v20 = vpop.f32.mrb[47].mxu0 }
0x3567   : > { %2802 = vtanh.f32 %v1876_v18  ;;  %v2410_v22 = vmul.f32 -1.442695, %v1876_v18 }
0x3569   : > { %2804 = vpow2.f32 %v2410_v22 }
0x3571   : > { %v2803_v21 = vpop.eup %2802 }
0x3572   : > { %1889 = vrot.lane.b32.xlu0 %v2803_v21, %s2855_s5 }
0x3573   : > { %v2805_v23 = vpop.eup %2804 }
0x3574   : > { %v1880_v24 = vadd.f32 1.0, %v2805_v23 }
0x3576   : > { %2806 = vrcp.f32 %v1880_v24 }
0x3580   : > { %v2807_v25 = vpop.eup %2806 }
0x3581   : > { %v1887_v33 = vmul.f32 %v2807_v25, %v1885_v31 }
0x35e4   : > { %v1890_v26 = vpop.permute.xlu0 %1889 }
0x35e5   : > { %v1892_v28 = vmul.f32 %v2807_v25, %v1890_v26 }
0x35e7   : > { %1894 = vrot.lane.b32.xlu1 %v1892_v28, %s2856_s6 }
0x3659   : > { %v1895_v35 = vpop.permute.xlu1 %1894 }
0x365a   : > { %v1897_v59 = vadd.f32 %v1895_v35, %v1887_v33 }
0x365c   : > { %2808 = vtanh.f32 %v1897_v59  ;;  %v1961_v34 = vrot.slane %v1897_v59, 6 }
0x3666   : > { %v2809_v58 = vpop.eup %2808 }
0x3667   : > { %1900 = vrot.lane.b32.xlu0 %v2809_v58, %s2856_s6 }
0x36d9   : > { %v1901_v7 = vpop.permute.xlu0 %1900 }
0x36da   : > { %v1903_v29 = vmul.f32 %v2807_v25, %v1901_v7 }
0x36dc   : > { %v1904_v36 = vpack.c.bf16 %v1903_v29, %v1903_v29  ;;  %v3229_v30 = vsel %vm2220_vm4, %v2232_v13, %v1903_v29 }
0x36de   : > { %v1906_v37 = vrot.slane %v1904_v36, 3 }
0x36e0   : > { %1907 = vrot.lane.b32.xlu1 %v1906_v37, %s2857_s7 }
0x3752   : > { %v1908_v39 = vpop.permute.xlu1 %1907 }
0x3753   : > { %2612 = vmatmul.mubr.msk.bf16.vlgmr.msra.gmra.mrb[44].mxu1 %vm277_vm1, %v1908_v39 }
0x3754   : > { %2622 = vmatpush3.bf16.msra.mxu1 %v3148_v4  ;;  %2623 = vmatprep.mubr.msk.bf16.mxu1 %vm2853_vm0, %v2852_v0 }
0x3826   : > { %v1946_v42 = vpop.f32.mrb[44].mxu1 }
0x3827   : > { %v1952_v43 = vadd.f32 %v1946_v42, %v3238_v40  ;;  %v2613_v44 = vpop.f32.mrb[45].mxu1 }
0x3828   : > { %v1949_v45 = vpop.f32.mrb[46].mxu1 }
0x3829   : > { %2810 = vtanh.f32 %v1952_v43  ;;  %v2614_v46 = vpop.f32.mrb[47].mxu1  ;;  %v2412_v48 = vmul.f32 -1.442695, %v1952_v43 }
0x382b   : > { %2812 = vpow2.f32 %v2412_v48 }
0x3833   : > { %v2811_v47 = vpop.eup %2810 }
0x3834   : > { %1965 = vrot.lane.b32.xlu0 %v2811_v47, %s2855_s5 }
0x3835   : > { %v2813_v49 = vpop.eup %2812 }
0x3836   : > { %v1956_v50 = vadd.f32 1.0, %v2813_v49 }
0x3838   : > { %2814 = vrcp.f32 %v1956_v50 }
0x3842   : > { %v2815_v51 = vpop.eup %2814 }
0x3843   : > { %v1963_v57 = vmul.f32 %v2815_v51, %v1961_v34 }
0x38a6   : > { %v1966_v19 = vpop.permute.xlu0 %1965 }
0x38a7   : > { %v1968_v52 = vmul.f32 %v2815_v51, %v1966_v19 }
0x38a9   : > { %1970 = vrot.lane.b32.xlu1 %v1968_v52, %s2856_s6 }
0x391b   : > { %v1971_v2 = vpop.permute.xlu1 %1970 }
0x391c   : > { %v1973_v9 = vadd.f32 %v1971_v2, %v1963_v57 }
0x391e   : > { %2816 = vtanh.f32 %v1973_v9 }
0x3928   : > { %v2817_v27 = vpop.eup %2816 }
0x3929   : > { %1976 = vrot.lane.b32.xlu0 %v2817_v27, %s2856_s6 }
0x399b   : > { %v1977_v54 = vpop.permute.xlu0 %1976 }
0x399c   : > { %v3244_v55 = vmul.f32 %v2815_v51, %v1977_v54 }
0x399e   : > { %v1980_v60 = vpack.c.bf16 %v3244_v55, %v3244_v55 }
0x39a0   : > { %1982 = vrot.lane.b32.xlu1 %v1980_v60, %s2857_s7 }
0x3a12   : > { %v1983_v61 = vpop.permute.xlu1 %1982 }
0x3a13   : > { %2618 = vmatmul.mubr.msk.bf16.vlgmr.msra.gmra.mrb[48].mxu0 %vm277_vm1, %v1983_v61 }
0x3a14   : > { %2628 = vmatpush3.bf16.msra.mxu0 %v3148_v4  ;;  %2629 = vmatprep.mubr.msk.bf16.mxu0 %vm2853_vm0, %v2852_v0  ;;  %v2039_v0 = vrot.slane %v1973_v9, 6 }
0x3ae6   : > { %v2021_v62 = vpop.f32.mrb[48].mxu0 }
0x3ae7   : > { %v2028_v63 = vrot.slane %v2021_v62, 6  ;;  %v2619_v1 = vpop.f32.mrb[49].mxu0 }
0x3ae8   : > { %v2024_v3 = vpop.f32.mrb[50].mxu0 }
0x3ae9   : > { %v2030_v5 = vadd.f32 %v2028_v63, %v3238_v40  ;;  %v2620_v6 = vpop.f32.mrb[51].mxu0 }
0x3aeb   : > { %2818 = vtanh.f32 %v2030_v5  ;;  %v2414_v10 = vmul.f32 -1.442695, %v2030_v5 }
0x3aed   : > { %2820 = vpow2.f32 %v2414_v10 }
0x3af5   : > { %v2819_v8 = vpop.eup %2818 }
0x3af6   : > { %2043 = vrot.lane.b32.xlu0 %v2819_v8, %s2855_s5 }
0x3af7   : > { %v2821_v11 = vpop.eup %2820 }
0x3af8   : > { %v2034_v13 = vadd.f32 1.0, %v2821_v11 }
0x3afa   : > { %2822 = vrcp.f32 %v2034_v13 }
0x3b04   : > { %v2823_v4 = vpop.eup %2822 }
0x3b05   : > { %v2041_v12 = vmul.f32 %v2823_v4, %v2039_v0 }
0x3b68   : > { %v2044_v32 = vpop.permute.xlu0 %2043 }
0x3b69   : > { %v2046_v41 = vmul.f32 %v2823_v4, %v2044_v32 }
0x3b6b   : > { %2048 = vrot.lane.b32.xlu1 %v2046_v41, %s2856_s6 }
0x3bdd   : > { %v2049_v14 = vpop.permute.xlu1 %2048 }
0x3bde   : > { %v2051_v15 = vadd.f32 %v2049_v14, %v2041_v12 }
0x3be0   : > { %2824 = vtanh.f32 %v2051_v15  ;;  %v2118_v39 = vrot.slane %v2051_v15, 6 }
0x3bea   : > { %v2825_v17 = vpop.eup %2824 }
0x3beb   : > { %2054 = vrot.lane.b32.xlu0 %v2825_v17, %s2856_s6 }
0x3c5d   : > { %v2055_v18 = vpop.permute.xlu0 %2054 }
0x3c5e   : > { %v2057_v20 = vmul.f32 %v2823_v4, %v2055_v18 }
0x3c60   : > { %v2058_v21 = vpack.c.bf16 %v2057_v20, %v2057_v20  ;;  %v2234_v48 = vsel %vm2216_vm2, %v3244_v55, %v2057_v20 }
0x3c62   : > { %v2060_v22 = vrot.slane %v2058_v21, 1 }
0x3c64   : > { %2061 = vrot.lane.b32.xlu1 %v2060_v22, %s2857_s7 }
0x3cd6   : > { %v2062_v23 = vpop.permute.xlu1 %2061 }
0x3cd7   : > { %2624 = vmatmul.mubr.msk.bf16.vlgmr.msra.gmra.mrb[48].mxu1 %vm277_vm1, %v2062_v23 }
0x3daa   : > { %v2100_v24 = vpop.f32.mrb[48].mxu1 }
0x3dab   : > { %v2107_v25 = vrot.slane %v2100_v24, 4  ;;  %v2625_v26 = vpop.f32.mrb[49].mxu1 }
0x3dac   : > { %v2103_v28 = vpop.f32.mrb[50].mxu1 }
0x3dad   : > { %v2109_v31 = vadd.f32 %v2107_v25, %v3238_v40  ;;  %v2626_v33 = vpop.f32.mrb[51].mxu1 }
0x3daf   : > { %2826 = vtanh.f32 %v2109_v31  ;;  %v2416_v59 = vmul.f32 -1.442695, %v2109_v31 }
0x3db1   : > { %2828 = vpow2.f32 %v2416_v59 }
0x3db9   : > { %v2827_v35 = vpop.eup %2826 }
0x3dba   : > { %2122 = vrot.lane.b32.xlu0 %v2827_v35, %s2855_s5 }
0x3dbb   : > { %v2829_v58 = vpop.eup %2828 }
0x3dbc   : > { %v2113_v7 = vadd.f32 1.0, %v2829_v58 }
0x3dbe   : > { %2830 = vrcp.f32 %v2113_v7 }
0x3dc8   : > { %v2831_v29 = vpop.eup %2830 }
0x3dc9   : > { %v2120_v42 = vmul.f32 %v2831_v29, %v2118_v39 }
0x3e2c   : > { %v2123_v36 = vpop.permute.xlu0 %2122 }
0x3e2d   : > { %v2125_v37 = vmul.f32 %v2831_v29, %v2123_v36 }
0x3e2f   : > { %2127 = vrot.lane.b32.xlu1 %v2125_v37, %s2856_s6 }
0x3ea1   : > { %v2128_v43 = vpop.permute.xlu1 %2127 }
0x3ea2   : > { %v2130_v44 = vadd.f32 %v2128_v43, %v2120_v42 }
0x3ea4   : > { %2832 = vtanh.f32 %v2130_v44 }
0x3eae   : > { %v2833_v45 = vpop.eup %2832 }
0x3eaf   : > { %2133 = vrot.lane.b32.xlu0 %v2833_v45, %s2856_s6 }
0x3f21   : > { %v2134_v46 = vpop.permute.xlu0 %2133 }
0x3f22   : > { %v2136_v47 = vmul.f32 %v2831_v29, %v2134_v46 }
0x3f24   : > { %v2137_v49 = vpack.c.bf16 %v2136_v47, %v2136_v47  ;;  %v2235_v50 = vsel %vm2218_vm3, %v2234_v48, %v2136_v47 }
0x3f26   : > { %v2139_v51 = vrot.slane %v2137_v49, 2 }
0x3f28   : > { %2140 = vrot.lane.b32.xlu1 %v2139_v51, %s2857_s7 }
0x3f9a   : > { %v2141_v19 = vpop.permute.xlu1 %2140 }
0x3f9b   : > { %2630 = vmatmul.mubr.msk.bf16.vlgmr.msra.gmra.mrb[52].mxu0 %vm277_vm1, %v2141_v19 }
0x406e   : > { %v2179_v52 = vpop.f32.mrb[52].mxu0 }
0x406f   : > { %v2186_v34 = vrot.slane %v2179_v52, 2  ;;  %v2631_v57 = vpop.f32.mrb[53].mxu0 }
0x4070   : > { %v2182_v2 = vpop.f32.mrb[54].mxu0 }
0x4071   : > { %v2188_v9 = vadd.f32 %v2186_v34, %v3238_v40  ;;  %v2632_v27 = vpop.f32.mrb[55].mxu0  ;;  %v2197_v40 = vrot.slane %v2130_v44, 6 }
0x4073   : > { %2834 = vtanh.f32 %v2188_v9  ;;  %v2418_v55 = vmul.f32 -1.442695, %v2188_v9 }
0x4075   : > { %2836 = vpow2.f32 %v2418_v55 }
0x407d   : > { %v2835_v54 = vpop.eup %2834 }
0x407e   : > { %2201 = vrot.lane.b32.xlu0 %v2835_v54, %s2855_s5 }
0x407f   : > { %v2837_v60 = vpop.eup %2836 }
0x4080   : > { %v2192_v61 = vadd.f32 1.0, %v2837_v60 }
0x4082   : > { %2838 = vrcp.f32 %v2192_v61 }
0x408c   : > { %v2839_v62 = vpop.eup %2838 }
0x408d   : > { %v2199_v3 = vmul.f32 %v2839_v62, %v2197_v40 }
0x40f0   : > { %v2202_v63 = vpop.permute.xlu0 %2201 }
0x40f1   : > { %v2204_v1 = vmul.f32 %v2839_v62, %v2202_v63 }
0x40f3   : > { %2206 = vrot.lane.b32.xlu1 %v2204_v1, %s2856_s6 }
0x40f7   : > { %2243 = vrot.lane.b32.xlu1 %v3007_v56, %s2857_s7 }
0x40fb   : > { %2247 = vrot.lane.b32.xlu1 %v3115_v16, %s2857_s7 }
0x40ff   : > { %2251 = vrot.lane.b32.xlu1 %v3229_v30, %s2857_s7 }
0x4165   : > { %v2207_v5 = vpop.permute.xlu1 %2206 }
0x4166   : > { %v2209_v6 = vadd.f32 %v2207_v5, %v2199_v3 }
0x4168   : > { %2840 = vtanh.f32 %v2209_v6 }
0x4169   : > { %v2244_v8 = vpop.permute.xlu1 %2243 }
0x416a   : > { %2261 = vst.msk [vmem:[%s251_s10] sm:$0xff] %vm277_vm1, %v2244_v8 }
0x416d   : > { %v2248_v56 = vpop.permute.xlu1 %2247 }
0x416e   : > { %2263 = vst.msk [vmem:[%s251_s10 + $0x10] sm:$0xff] %vm277_vm1, %v2248_v56 }
0x4171   : > { %v2252_v16 = vpop.permute.xlu1 %2251 }
0x4172   : > { %v2841_v10 = vpop.eup %2840  ;;  %2265 = vst.msk [vmem:[%s251_s10 + $0x20] sm:$0xff] %vm277_vm1, %v2252_v16 }
0x4173   : > { %2212 = vrot.lane.b32.xlu0 %v2841_v10, %s2856_s6 }
0x4177   : > { %2245 = vrot.lane.b32.xlu0 %v3061_v38, %s2857_s7 }
0x417b   : > { %2249 = vrot.lane.b32.xlu0 %v3172_v53, %s2857_s7 }
0x41e5   : > { %v2213_v30 = vpop.permute.xlu0 %2212 }
0x41e6   : > { %v2215_v11 = vmul.f32 %v2839_v62, %v2213_v30 }
0x41e8   : > { %v2236_v13 = vsel %vm2220_vm4, %v2235_v50, %v2215_v11 }
0x41e9   : > { %2253 = vrot.lane.b32.xlu0 %v2236_v13, %s2857_s7  ;;  %v2246_v4 = vpop.permute.xlu0 %2245 }
0x41ea   : > { %2262 = vst.msk [vmem:[%s251_s10 + $0x8] sm:$0xff] %vm277_vm1, %v2246_v4 }
0x41ed   : > { %v2250_v32 = vpop.permute.xlu0 %2249 }
0x41ee   : > { %2264 = vst.msk [vmem:[%s251_s10 + $0x18] sm:$0xff] %vm277_vm1, %v2250_v32 }
0x425b   : > { %v2254_v41 = vpop.permute.xlu0 %2253 }
0x425c   : > { %2266 = vst.msk [vmem:[%s251_s10 + $0x28] sm:$0xff] %vm277_vm1, %v2254_v41 }
0x425d PF: > { %s14_s15 = sadd.s32 1, %s2850_s15  }
0x425e   : > { %p11_p4 = scmp.ge.s32.totalorder %s14_s15, 4  }
0x4260   :  { %13 = sbr.rel (!%p11_p4) target bundleno = 1 (0x1), region = 75 }

// kernel: seqlabel_forward.5
= control target key start
LH: loop header
LB: loop body
LE: loop exit
PB: predicated region body
PF: predicated region fallthrough
CT: control target
= control target key end

     0   :  { %s2902_s18 = smov 0   ;;  %s3261_s0 = inlined_call_operand.vmem [shape: f32[16,16], index: 0, kind: input, shape index: {}]   ;;  %s3262_s1 = inlined_call_operand.vmem [shape: f32[16,16], index: 1, kind: input, shape index: {}]   ;;  %s3263_s2 = inlined_call_operand.vmem [shape: f32[16,16], index: 2, kind: input, shape index: {}]   ;;  %s3264_s3 = inlined_call_operand.vmem [shape: f32[16,16], index: 3, kind: input, shape index: {}]   ;;  %s3265_s4 = inlined_call_operand.vmem [shape: f32[16,16], index: 4, kind: input, shape index: {}]   ;;  %s3266_s5 = inlined_call_operand.vmem [shape: bf16[16,16], index: 5, kind: input, shape index: {}]   ;;  %s3267_s6 = inlined_call_operand.vmem [shape: bf16[16,16], index: 6, kind: input, shape index: {}]   ;;  %s3268_s7 = inlined_call_operand.vmem [shape: f32[1,16], index: 7, kind: input, shape index: {}]   ;;  %s3269_s8 = inlined_call_operand.vmem [shape: bf16[16,16], index: 8, kind: input, shape index: {}]   ;;  %s3270_s9 = inlined_call_operand.vmem [shape: bf16[16,16], index: 9, kind: input, shape index: {}]   ;;  %s3271_s10 = inlined_call_operand.vmem [shape: f32[1,16], index: 10, kind: input, shape index: {}]   ;;  %s3272_s11 = inlined_call_operand.vmem [shape: bf16[2,48,64], index: 11, kind: input, shape index: {}]   ;;  %s3273_s12 = inlined_call_operand.vmem [shape: bf16[2,16,64], index: 12, kind: input, shape index: {}]   ;;  %s3274_s13 = inlined_call_operand.vmem [shape: f32[2,1,64], index: 13, kind: input, shape index: {}]   ;;  %s3275_s14 = inlined_call_operand.vmem [shape: bf16[2,16,36], index: 14, kind: input, shape index: {}]   ;;  %s3276_s15 = inlined_call_operand.vmem [shape: f32[2,16,36], index: 15, kind: output, shape index: {}]  }
   0x1   :  { %3277 = sst [smem:[#allocation2_spill]] %s3261_s0 }
   0x2   :  { %3278 = sst [smem:[#allocation3_spill]] %s3262_s1 }
   0x3 LB: > { %s2908_s19 = sadd.s32 4294967295, %s2804_s18   ;;  %p2372_p0 = scmp.ge.s32.totalorder %s2804_s18, 1  ;;  %s2804_s18 = sphi %s2902_s18, %s25_s18  }
   0x4   : > { %p465_p1 = scmp.lt.s32.totalorder %s2804_s18, 3 }
   0x6   : > { %p466_p2 = pnand %p2372_p0, %p465_p1 }
   0x7   : > { %v2663_v0 = vld [vmem:[%s3267_s6] sm:$0xff] (!%p466_p2)   ;;  %v2806_v1 = vmov (!%p466_p2), 0.0   ;;  %s3279_s1 = sld [smem:[#allocation3_spill]] (!%p466_p2)  ;;  %vm2807_vm0 = vmmov (!%p466_p2), 0   ;;  %vm566_vm1 = vcmask (!%p466_p2), 130048   ;;  %v676_v8 = vld [vmem:[%s3264_s3 + $0x8] sm:$0xff] (!%p466_p2) }
   0x8   : > { %469 = sbr.rel (%p466_p2) target bundleno = 12136 (0x2f68), region = 80  ;;  %2486 = vmatprep.subr.bf16.mxu1 (!%p466_p2), %v2806_v1  ;;  %2498 = vmatprep.subr.bf16.mxu0 (!%p466_p2), %v2806_v1  ;;  %v2664_v5 = vld [vmem:[%s3266_s5] sm:$0xff] (!%p466_p2)   ;;  %s3280_s0 = sld [smem:[#allocation2_spill]] (!%p466_p2)  ;;  %v671_v15 = vld [vmem:[%s3263_s2 + $0x8] sm:$0xff] (!%p466_p2)  ;;  %vm811_vm2 = vcmask (!%p466_p2), 261120   ;;  %vm846_vm3 = vcmask (!%p466_p2), 392192  }
   0x9   : > { %2487 = vmatpush3.bf16.msra.mxu1 (!%p466_p2), %v2663_v0  ;;  %2488 = vmatprep.mubr.msk.bf16.mxu1 (!%p466_p2), %vm2807_vm0, %v2806_v1  ;;  %v2666_v6 = vld [vmem:[%s3270_s9] sm:$0xff] (!%p466_p2)   ;;  %p526_p3 = scmp.lt.s32.totalorder (!%p466_p2), %s2908_s19, 1  ;;  %v792_v50 = vld [vmem:[%s3265_s4 + $0x8] sm:$0xff] (!%p466_p2)  ;;  %s2808_s24 = smov (!%p466_p2), 16  }
   0xa   : > { %2492 = vmatprep.subr.bf16.mxu1 (!%p466_p2), %v2806_v1  ;;  %2500 = vmatprep.mubr.msk.bf16.mxu0 (!%p466_p2), %vm2807_vm0, %v2806_v1  ;;  %v675_v7 = vld [vmem:[%s3264_s3] sm:$0xff] (!%p466_p2)  ;;  %s2809_s25 = smov (!%p466_p2), 32   ;;  %p2395_p4 = scmp.ne.s32.totalorder (!%p466_p2), %s2908_s19, 0 }
   0xb   : > { %v677_v11 = vpack.c.bf16 (!%p466_p2), %v676_v8, %v675_v7  ;;  %2499 = vmatpush3.bf16.msra.mxu0 (!%p466_p2), %v2666_v6  ;;  %v2665_v13 = vld [vmem:[%s3269_s8] sm:$0xff] (!%p466_p2)  }
   0xc   : > { %2510 = vmatprep.subr.bf16.mxu0 (!%p466_p2), %v2806_v1  ;;  %v670_v14 = vld [vmem:[%s3263_s2] sm:$0xff] (!%p466_p2) }
   0xd   : > { %v555_v2 = vld [vmem:[%s3279_s1] sm:$0xff] (!%p466_p2)  ;;  %v556_v3 = vld [vmem:[%s3279_s1 + $0x8] sm:$0xff] (!%p466_p2)  ;;  %v672_v16 = vpack.c.bf16 (!%p466_p2), %v671_v15, %v670_v14 }
   0xe   : > { %v557_v4 = vpack.c.bf16 (!%p466_p2), %v556_v3, %v555_v2  ;;  %v550_v9 = vld [vmem:[%s3280_s0] sm:$0xff] (!%p466_p2)  ;;  %v551_v10 = vld [vmem:[%s3280_s0 + $0x8] sm:$0xff] (!%p466_p2)  ;;  %2501 = vmatmul.mubr.msk.bf16.vlgmr.msra.gmra.mrb[0].mxu0 (!%p466_p2), %vm566_vm1, %v677_v11 }
   0xf   : > { %v552_v12 = vpack.c.bf16 %v551_v10, %v550_v9  ;;  %2516 = vmatprep.mubr.msk.bf16.mxu0 %vm2807_vm0, %v2806_v1  ;;  %s2969_s16 = scalar_select %p526_p3, %s2908_s19, 1  ;;  %v2389_v38 = vld [vmem:[%s3271_s10] ss:$0 sm:$0xff] }
  0x10   : > { %2489 = vmatmul.mubr.msk.bf16.vlgmr.msra.gmra.mrb[0].mxu1 %vm566_vm1, %v557_v4  ;;  %v791_v49 = vld [vmem:[%s3265_s4] sm:$0xff]  ;;  %v2810_v11 = vmov (!%p2395_p4), 0.0   ;;  %vm2811_vm4 = vmmov (!%p2395_p4), 0   ;;  %s2814_s0 = smov (!%p2395_p4), 16   ;;  %s2815_s1 = smov (!%p2395_p4), 96   ;;  %vm1521_vm5 = vcmask (!%p2395_p4), 1041408  }
  0x11   : > { %2493 = vmatpush3.bf16.msra.mxu1 %v2664_v5  ;;  %2494 = vmatprep.mubr.msk.bf16.mxu1 %vm2807_vm0, %v2806_v1  ;;  %s2628_s17 = smul.u32 24, %s2969_s16  ;;  %s2435_s20 = sshll.u32 %s2969_s16, 3  ;;  %v2658_v52 = vpack.i.bf16 %v792_v50, %v791_v49  ;;  %v2384_v54 = vld [vmem:[%s3268_s7] ss:$0 sm:$0xff]  ;;  %vm1523_vm6 = vcmask (!%p2395_p4), 1043456   ;;  %vm1525_vm7 = vcmask (!%p2395_p4), 1045504  }
  0x12   : > { %2504 = vmatprep.subr.bf16.mxu1 %v2806_v1  ;;  %s535_s23 = scalar_lea.vmem %s3273_s12, %s2435_s20  ;;  %s543_s26 = scalar_lea.vmem %s3275_s14, %s2435_s20  ;;  %vm1584_vm8 = vcmask (!%p2395_p4), 293888  }
  0x13   : > { %s2982_s29 = scalar_lea.vmem %s3272_s11, %s2628_s17  ;;  %s2437_s30 = sshll.u32 %s2969_s16, 4  ;;  %v2985_v17 = vld [vmem:[%s535_s23] sm:$0xf]  ;;  %v2987_v18 = vld [vmem:[%s535_s23 + $0x4] sm:$0xf] }
  0x14   : > { %s2992_s21 = scalar_lea.vmem %s3276_s15, %s2437_s30  ;;  %v2667_v19 = vld [vmem:[%s2982_s29] sm:$0xff]   ;;  %v2668_v36 = vld [vmem:[%s2982_s29 + $0x8] sm:$0xff]   ;;  %v2669_v42 = vld [vmem:[%s2982_s29 + $0x10] sm:$0xff]   ;;  %s538_s30 = scalar_lea.vmem %s3274_s13, %s2969_s16  ;;  %v3028_v10 = vcombine.low (!%p2395_p4), %v2985_v17, %v2987_v18 }
  0x15   : > { %v2995_v20 = vld [vmem:[%s543_s26] sm:$0xf]  ;;  %v2997_v21 = vld [vmem:[%s543_s26 + $0x4] sm:$0xf]  ;;  %2511 = vmatpush3.bf16.msra.mxu0 %v2667_v19  ;;  %s2813_s16 = smov (!%p2395_p4), 80  }
  0x16   : > { %2512 = vmatprep.subr.bf16.mxu0 %v2806_v1  ;;  %v2390_v3 = vld [vmem:[%s538_s30] ss:$0 sm:$0xff] }
  0x18   : > { %2495 = vmatmul.mubr.msk.bf16.vlgmr.msra.gmra.mrb[4].mxu1 %vm566_vm1, %v552_v12  ;;  %v2812_v12 = vmov (!%p2395_p4), 0  }
  0x19   : > { %2505 = vmatpush3.bf16.msra.mxu1 %v2665_v13  ;;  %2506 = vmatprep.mubr.msk.bf16.mxu1 %vm2807_vm0, %v2806_v1 }
  0x1a   : > { %2513 = vmatpush3.bf16.msra.mxu0 %v2668_v36  ;;  %2526 = vmatprep.subr.bf16.mxu1 (!%p2395_p4), %v2810_v11 }
  0x1b   : > { %2514 = vmatprep.subr.bf16.mxu0 %v2806_v1 }
  0x1e   : > { %2515 = vmatpush3.bf16.msra.mxu0 %v2669_v42 }
  0x1f   : > { %2520 = vmatprep.subr.bf16.mxu0 (!%p2395_p4), %v2810_v11 }
  0x20   : > { %2507 = vmatmul.mubr.msk.bf16.vlgmr.msra.gmra.mrb[8].mxu1 %vm566_vm1, %v672_v16 }
  0x21   : > { %2527 = vmatpush3.bf16.msra.mxu1 (!%p2395_p4), %v3028_v10  ;;  %2528 = vmatprep.mubr.msk.bf16.mxu1 (!%p2395_p4), %vm2811_vm4, %v2810_v11 }
  0x22   : > { %2538 = vmatprep.subr.bf16.mxu1 (!%p2395_p4), %v2810_v11 }
  0xe1   : > { %v723_v26 = vpop.f32.mrb[0].mxu0 }
  0xe2   : > { %v2502_v27 = vpop.f32.mrb[1].mxu0 }
  0xe3   : > { %v604_v22 = vpop.f32.mrb[0].mxu1  ;;  %v726_v28 = vpop.f32.mrb[2].mxu0 }
  0xe4   : > { %v2490_v23 = vpop.f32.mrb[1].mxu1  ;;  %v2503_v30 = vpop.f32.mrb[3].mxu0 }
  0xe5   : > { %v607_v24 = vpop.f32.mrb[2].mxu1 }
  0xe6   : > { %v2491_v25 = vpop.f32.mrb[3].mxu1 }
  0xeb   : > { %v654_v29 = vpop.f32.mrb[4].mxu1 }
  0xec   : > { %v655_v31 = vadd.f32 %v654_v29, %v604_v22  ;;  %v2496_v32 = vpop.f32.mrb[5].mxu1 }
  0xed   : > { %v657_v33 = vpop.f32.mrb[6].mxu1 }
  0xee   : > { %v658_v34 = vadd.f32 %v657_v33, %v607_v24  ;;  %v2497_v35 = vpop.f32.mrb[7].mxu1  ;;  %v668_v57 = vadd.f32 %v2384_v54, %v655_v31 }
  0xf0   : > { %v669_v58 = vadd.f32 %v2384_v54, %v658_v34 }
  0xf3   : > { %v773_v37 = vpop.f32.mrb[8].mxu1 }
  0xf4   : > { %v774_v39 = vadd.f32 %v773_v37, %v723_v26  ;;  %v2508_v40 = vpop.f32.mrb[9].mxu1 }
  0xf5   : > { %v776_v41 = vpop.f32.mrb[10].mxu1 }
  0xf6   : > { %v787_v43 = vadd.f32 %v2389_v38, %v774_v39  ;;  %v777_v44 = vadd.f32 %v776_v41, %v726_v28  ;;  %v2509_v45 = vpop.f32.mrb[11].mxu1 }
  0xf8   : > { %v788_v46 = vadd.f32 %v2389_v38, %v777_v44  ;;  %v789_v47 = vmax.f32 %v787_v43, 0.0 }
  0xfa   : > { %v790_v48 = vmax.f32 %v788_v46, 0.0 }
  0xfc   : > { %v2653_v51 = vpack.i.bf16 %v790_v48, %v789_v47 }
  0xfe   : > { %2654 = vrot.lane.b32.xlu0 %v2653_v51, %s2808_s24 }
 0x102   : > { %2659 = vrot.lane.b32.xlu0 %v2658_v52, %s2809_s25 }
 0x170   : > { %v2655_v53 = vpop.permute.xlu0 %2654 }
 0x171   : > { %v2657_v55 = vunpack.i.h.bf16 %v2655_v53  ;;  %v2656_v56 = vunpack.i.l.bf16 %v2655_v53 }
 0x173   : > { %v810_v62 = vsel %vm566_vm1, %v669_v58, %v2657_v55  ;;  %v809_v63 = vsel %vm566_vm1, %v668_v57, %v2656_v56 }
 0x174   : > { %v2660_v59 = vpop.permute.xlu0 %2659 }
 0x175   : > { %v2662_v60 = vunpack.i.h.bf16 %v2660_v59  ;;  %v2661_v61 = vunpack.i.l.bf16 %v2660_v59 }
 0x177   : > { %v812_v0 = vsel %vm811_vm2, %v809_v63, %v2661_v61  ;;  %v813_v1 = vsel %vm811_vm2, %v810_v62, %v2662_v60 }
 0x178   : > { %v814_v2 = vpack.c.bf16 %v813_v1, %v812_v0 }
 0x17a   : > { %2517 = vmatmul.mubr.msk.bf16.vlgmr.msra.gmra.mrb[4].mxu0 %vm846_vm3, %v814_v2 }
 0x17b   : > { %2522 = vmatprep.mubr.msk.bf16.mxu0 (!%p2395_p4), %vm2811_vm4, %v2810_v11  ;;  %2521 = vmatpush3.bf16.msra.mxu0 (!%p2395_p4), %v3028_v10 }
 0x17c   : > { %2532 = vmatprep.subr.bf16.mxu0 (!%p2395_p4), %v2810_v11 }
 0x182   : > { %2523 = vmatmul.mubr.bf16.vlgmr.msra.gmra.mrb[0].mxu0 (!%p2395_p4), %v2812_v12 }
 0x183   : > { %2533 = vmatpush3.bf16.msra.mxu0 (!%p2395_p4), %v3028_v10  ;;  %2534 = vmatprep.mubr.msk.bf16.mxu0 (!%p2395_p4), %vm2811_vm4, %v2810_v11 }
 0x184   : > { %2544 = vmatprep.subr.bf16.mxu0 (!%p2395_p4), %v2810_v11 }
 0x24a   : > { %898 = sbr.rel (%p2395_p4) target bundleno = 6256 (0x1870), region = 84 }
 0x24d   : > { %v884_v4 = vpop.f32.mrb[4].mxu0 }
 0x24e   : > { %v3021_v5 = vadd.f32 %v2390_v3, %v884_v4  ;;  %v2518_v6 = vpop.f32.mrb[5].mxu0 }
 0x24f   : > { %v887_v7 = vpop.f32.mrb[6].mxu0 }
 0x250   : > { %v3023_v8 = vadd.f32 %v2390_v3, %v887_v7  ;;  %v2519_v9 = vpop.f32.mrb[7].mxu0 }
 0x255   : > { %v942_v13 = vpop.f32.mrb[0].mxu0 }
 0x256   : > { %v948_v14 = vadd.f32 %v942_v13, %v3021_v5  ;;  %v2524_v15 = vpop.f32.mrb[1].mxu0 }
 0x257   : > { %v945_v16 = vpop.f32.mrb[2].mxu0 }
 0x258   : > { %2670 = vtanh.f32 %v948_v14  ;;  %v2525_v19 = vpop.f32.mrb[3].mxu0  ;;  %v2397_v23 = vmul.f32 -1.442695, %v948_v14 }
 0x25a   : > { %2672 = vpow2.f32 %v2397_v23 }
 0x262   : > { %v2671_v22 = vpop.eup %2670 }
 0x263   : > { %958 = vrot.lane.b32.xlu0 %v2671_v22, %s2813_s16 }
 0x264   : > { %v2673_v24 = vpop.eup %2672 }
 0x265   : > { %v952_v25 = vadd.f32 1.0, %v2673_v24 }
 0x267   : > { %2674 = vrcp.f32 %v952_v25 }
 0x271   : > { %v2675_v26 = vpop.eup %2674 }
 0x272   : > { %v956_v29 = vmul.f32 0.0, %v2675_v26 }
 0x2d5   : > { %v959_v27 = vpop.permute.xlu0 %958 }
 0x2d6   : > { %v961_v28 = vmul.f32 %v2675_v26, %v959_v27 }
 0x2d8   : > { %963 = vrot.lane.b32.xlu0 %v961_v28, %s2814_s0 }
 0x34a   : > { %v964_v30 = vpop.permute.xlu0 %963 }
 0x34b   : > { %v966_v31 = vadd.f32 %v964_v30, %v956_v29 }
 0x34d   : > { %2676 = vtanh.f32 %v966_v31  ;;  %v1032_v50 = vrot.slane %v966_v31, 6 }
 0x357   : > { %v2677_v32 = vpop.eup %2676 }
 0x358   : > { %969 = vrot.lane.b32.xlu1 %v2677_v32, %s2814_s0 }
 0x3ca   : > { %v970_v33 = vpop.permute.xlu1 %969 }
 0x3cb   : > { %v3048_v34 = vmul.f32 %v2675_v26, %v970_v33 }
 0x3cd   : > { %v973_v35 = vpack.c.bf16 %v3048_v34, %v3048_v34 }
 0x3cf   : > { %975 = vrot.lane.b32.xlu1 %v973_v35, %s2815_s1 }
 0x441   : > { %v976_v36 = vpop.permute.xlu1 %975 }
 0x442   : > { %2529 = vmatmul.mubr.msk.bf16.vlgmr.msra.gmra.mrb[0].mxu1 %vm566_vm1, %v976_v36 }
 0x443   : > { %2539 = vmatpush3.bf16.msra.mxu1 %v3028_v10  ;;  %2540 = vmatprep.mubr.msk.bf16.mxu1 %vm2811_vm4, %v2810_v11 }
 0x444   : > { %2550 = vmatprep.subr.bf16.mxu1 %v2810_v11 }
 0x515   : > { %v1014_v37 = vpop.f32.mrb[0].mxu1 }
 0x516   : > { %v1021_v38 = vrot.slane %v1014_v37, 6  ;;  %v2530_v39 = vpop.f32.mrb[1].mxu1 }
 0x517   : > { %v1017_v40 = vpop.f32.mrb[2].mxu1 }
 0x518   : > { %v1023_v41 = vadd.f32 %v1021_v38, %v3021_v5  ;;  %v2531_v42 = vpop.f32.mrb[3].mxu1 }
 0x51a   : > { %2678 = vtanh.f32 %v1023_v41  ;;  %v2399_v44 = vmul.f32 -1.442695, %v1023_v41 }
 0x51c   : > { %2680 = vpow2.f32 %v2399_v44 }
 0x524   : > { %v2679_v43 = vpop.eup %2678 }
 0x525   : > { %1036 = vrot.lane.b32.xlu0 %v2679_v43, %s2813_s16 }
 0x526   : > { %v2681_v45 = vpop.eup %2680 }
 0x527   : > { %v1027_v46 = vadd.f32 1.0, %v2681_v45 }
 0x529   : > { %2682 = vrcp.f32 %v1027_v46 }
 0x533   : > { %v2683_v47 = vpop.eup %2682 }
 0x534   : > { %v1034_v51 = vmul.f32 %v2683_v47, %v1032_v50 }
 0x597   : > { %v1037_v48 = vpop.permute.xlu0 %1036 }
 0x598   : > { %v1039_v49 = vmul.f32 %v2683_v47, %v1037_v48 }
 0x59a   : > { %1041 = vrot.lane.b32.xlu1 %v1039_v49, %s2814_s0 }
 0x60c   : > { %v1042_v52 = vpop.permute.xlu1 %1041 }
 0x60d   : > { %v1044_v53 = vadd.f32 %v1042_v52, %v1034_v51 }
 0x60f   : > { %2684 = vtanh.f32 %v1044_v53  ;;  %v1111_v13 = vrot.slane %v1044_v53, 6 }
 0x619   : > { %v2685_v54 = vpop.eup %2684 }
 0x61a   : > { %1047 = vrot.lane.b32.xlu0 %v2685_v54, %s2814_s0 }
 0x68c   : > { %v1048_v55 = vpop.permute.xlu0 %1047 }
 0x68d   : > { %v1050_v56 = vmul.f32 %v2683_v47, %v1048_v55 }
 0x68f   : > { %v1051_v57 = vpack.c.bf16 %v1050_v56, %v1050_v56  ;;  %v1522_v24 = vsel %vm1521_vm5, %v3048_v34, %v1050_v56 }
 0x691   : > { %v1053_v58 = vrot.slane %v1051_v57, 1 }
 0x693   : > { %1054 = vrot.lane.b32.xlu1 %v1053_v58, %s2815_s1 }
 0x705   : > { %v1055_v59 = vpop.permute.xlu1 %1054 }
 0x706   : > { %2535 = vmatmul.mubr.msk.bf16.vlgmr.msra.gmra.mrb[4].mxu0 %vm566_vm1, %v1055_v59 }
 0x707   : > { %2545 = vmatpush3.bf16.msra.mxu0 %v3028_v10  ;;  %2546 = vmatprep.mubr.msk.bf16.mxu0 %vm2811_vm4, %v2810_v11 }
 0x708   : > { %2556 = vmatprep.subr.bf16.mxu0 %v2810_v11 }
 0x7d9   : > { %v1093_v60 = vpop.f32.mrb[4].mxu0 }
 0x7da   : > { %v1100_v61 = vrot.slane %v1093_v60, 4  ;;  %v2536_v62 = vpop.f32.mrb[5].mxu0 }
 0x7db   : > { %v1096_v63 = vpop.f32.mrb[6].mxu0 }
 0x7dc   : > { %v1102_v0 = vadd.f32 %v1100_v61, %v3021_v5  ;;  %v2537_v1 = vpop.f32.mrb[7].mxu0 }
 0x7de   : > { %2686 = vtanh.f32 %v1102_v0  ;;  %v2401_v3 = vmul.f32 -1.442695, %v1102_v0 }
 0x7e0   : > { %2688 = vpow2.f32 %v2401_v3 }
 0x7e8   : > { %v2687_v2 = vpop.eup %2686 }
 0x7e9   : > { %1115 = vrot.lane.b32.xlu0 %v2687_v2, %s2813_s16 }
 0x7ea   : > { %v2689_v4 = vpop.eup %2688 }
 0x7eb   : > { %v1106_v6 = vadd.f32 1.0, %v2689_v4 }
 0x7ed   : > { %2690 = vrcp.f32 %v1106_v6 }
 0x7f7   : > { %v2691_v7 = vpop.eup %2690 }
 0x7f8   : > { %v1113_v14 = vmul.f32 %v2691_v7, %v1111_v13 }
 0x85b   : > { %v1116_v9 = vpop.permute.xlu0 %1115 }
 0x85c   : > { %v1118_v12 = vmul.f32 %v2691_v7, %v1116_v9 }
 0x85e   : > { %1120 = vrot.lane.b32.xlu1 %v1118_v12, %s2814_s0 }
 0x8d0   : > { %v1121_v15 = vpop.permute.xlu1 %1120 }
 0x8d1   : > { %v1123_v16 = vadd.f32 %v1121_v15, %v1113_v14 }
 0x8d3   : > { %2692 = vtanh.f32 %v1123_v16  ;;  %v1190_v42 = vrot.slane %v1123_v16, 6 }
 0x8dd   : > { %v2693_v19 = vpop.eup %2692 }
 0x8de   : > { %1126 = vrot.lane.b32.xlu0 %v2693_v19, %s2814_s0 }
 0x950   : > { %v1127_v22 = vpop.permute.xlu0 %1126 }
 0x951   : > { %v1129_v23 = vmul.f32 %v2691_v7, %v1127_v22 }
 0x953   : > { %v1130_v25 = vpack.c.bf16 %v1129_v23, %v1129_v23  ;;  %v1524_v26 = vsel %vm1523_vm6, %v1522_v24, %v1129_v23 }
 0x955   : > { %v1132_v27 = vrot.slane %v1130_v25, 2 }
 0x957   : > { %1133 = vrot.lane.b32.xlu1 %v1132_v27, %s2815_s1 }
 0x9c9   : > { %v1134_v28 = vpop.permute.xlu1 %1133 }
 0x9ca   : > { %2541 = vmatmul.mubr.msk.bf16.vlgmr.msra.gmra.mrb[4].mxu1 %vm566_vm1, %v1134_v28 }
 0x9cb   : > { %2551 = vmatpush3.bf16.msra.mxu1 %v3028_v10  ;;  %2552 = vmatprep.mubr.msk.bf16.mxu1 %vm2811_vm4, %v2810_v11 }
 0x9cc   : > { %2562 = vmatprep.subr.bf16.mxu1 %v2810_v11 }
 0xa9d   : > { %v1172_v29 = vpop.f32.mrb[4].mxu1 }
 0xa9e   : > { %v1179_v30 = vrot.slane %v1172_v29, 2  ;;  %v2542_v31 = vpop.f32.mrb[5].mxu1 }
 0xa9f   : > { %v1175_v32 = vpop.f32.mrb[6].mxu1 }
 0xaa0   : > { %v1181_v33 = vadd.f32 %v1179_v30, %v3021_v5  ;;  %v2543_v34 = vpop.f32.mrb[7].mxu1 }
 0xaa2   : > { %2694 = vtanh.f32 %v1181_v33  ;;  %v2403_v36 = vmul.f32 -1.442695, %v1181_v33 }
 0xaa4   : > { %2696 = vpow2.f32 %v2403_v36 }
 0xaac   : > { %v2695_v35 = vpop.eup %2694 }
 0xaad   : > { %1194 = vrot.lane.b32.xlu0 %v2695_v35, %s2813_s16 }
 0xaae   : > { %v2697_v37 = vpop.eup %2696 }
 0xaaf   : > { %v1185_v38 = vadd.f32 1.0, %v2697_v37 }
 0xab1   : > { %2698 = vrcp.f32 %v1185_v38 }
 0xabb   : > { %v2699_v39 = vpop.eup %2698 }
 0xabc   : > { %v1192_v43 = vmul.f32 %v2699_v39, %v1190_v42 }
 0xb1f   : > { %v1195_v40 = vpop.permute.xlu0 %1194 }
 0xb20   : > { %v1197_v41 = vmul.f32 %v2699_v39, %v1195_v40 }
 0xb22   : > { %1199 = vrot.lane.b32.xlu1 %v1197_v41, %s2814_s0 }
 0xb94   : > { %v1200_v44 = vpop.permute.xlu1 %1199 }
 0xb95   : > { %v1202_v45 = vadd.f32 %v1200_v44, %v1192_v43 }
 0xb97   : > { %2700 = vtanh.f32 %v1202_v45  ;;  %v1266_v1 = vrot.slane %v1202_v45, 6 }
 0xba1   : > { %v2701_v46 = vpop.eup %2700 }
 0xba2   : > { %1205 = vrot.lane.b32.xlu0 %v2701_v46, %s2814_s0 }
 0xc14   : > { %v1206_v47 = vpop.permute.xlu0 %1205 }
 0xc15   : > { %v1208_v48 = vmul.f32 %v2699_v39, %v1206_v47 }
 0xc17   : > { %v1209_v49 = vpack.c.bf16 %v1208_v48, %v1208_v48  ;;  %v3086_v50 = vsel %vm1525_vm7, %v1524_v26, %v1208_v48 }
 0xc19   : > { %v1211_v51 = vrot.slane %v1209_v49, 3 }
 0xc1b   : > { %1212 = vrot.lane.b32.xlu1 %v1211_v51, %s2815_s1 }
 0xc8d   : > { %v1213_v52 = vpop.permute.xlu1 %1212 }
 0xc8e   : > { %2547 = vmatmul.mubr.msk.bf16.vlgmr.msra.gmra.mrb[8].mxu0 %vm566_vm1, %v1213_v52 }
 0xc8f   : > { %2557 = vmatpush3.bf16.msra.mxu0 %v3028_v10  ;;  %2558 = vmatprep.mubr.msk.bf16.mxu0 %vm2811_vm4, %v2810_v11 }
 0xc90   : > { %2568 = vmatprep.subr.bf16.mxu0 %v2810_v11 }
 0xd61   : > { %v1251_v53 = vpop.f32.mrb[8].mxu0 }
 0xd62   : > { %v1257_v54 = vadd.f32 %v1251_v53, %v3023_v8  ;;  %v2548_v55 = vpop.f32.mrb[9].mxu0 }
 0xd63   : > { %v1254_v56 = vpop.f32.mrb[10].mxu0 }
 0xd64   : > { %2702 = vtanh.f32 %v1257_v54  ;;  %v2549_v57 = vpop.f32.mrb[11].mxu0  ;;  %v2405_v59 = vmul.f32 -1.442695, %v1257_v54 }
 0xd66   : > { %2704 = vpow2.f32 %v2405_v59 }
 0xd6e   : > { %v2703_v58 = vpop.eup %2702 }
 0xd6f   : > { %1270 = vrot.lane.b32.xlu0 %v2703_v58, %s2813_s16 }
 0xd70   : > { %v2705_v60 = vpop.eup %2704 }
 0xd71   : > { %v1261_v61 = vadd.f32 1.0, %v2705_v60 }
 0xd73   : > { %2706 = vrcp.f32 %v1261_v61 }
 0xd7d   : > { %v2707_v62 = vpop.eup %2706 }
 0xd7e   : > { %v1268_v2 = vmul.f32 %v2707_v62, %v1266_v1 }
 0xde1   : > { %v1271_v63 = vpop.permute.xlu0 %1270 }
 0xde2   : > { %v1273_v0 = vmul.f32 %v2707_v62, %v1271_v63 }
 0xde4   : > { %1275 = vrot.lane.b32.xlu1 %v1273_v0, %s2814_s0 }
 0xe56   : > { %v1276_v3 = vpop.permute.xlu1 %1275 }
 0xe57   : > { %v1278_v4 = vadd.f32 %v1276_v3, %v1268_v2 }
 0xe59   : > { %2708 = vtanh.f32 %v1278_v4  ;;  %v1344_v30 = vrot.slane %v1278_v4, 6 }
 0xe63   : > { %v2709_v6 = vpop.eup %2708 }
 0xe64   : > { %1281 = vrot.lane.b32.xlu0 %v2709_v6, %s2814_s0 }
 0xed6   : > { %v1282_v7 = vpop.permute.xlu0 %1281 }
 0xed7   : > { %v3098_v9 = vmul.f32 %v2707_v62, %v1282_v7 }
 0xed9   : > { %v1285_v12 = vpack.c.bf16 %v3098_v9, %v3098_v9 }
 0xedb   : > { %1287 = vrot.lane.b32.xlu1 %v1285_v12, %s2815_s1 }
 0xf4d   : > { %v1288_v13 = vpop.permute.xlu1 %1287 }
 0xf4e   : > { %2553 = vmatmul.mubr.msk.bf16.vlgmr.msra.gmra.mrb[8].mxu1 %vm566_vm1, %v1288_v13 }
 0xf4f   : > { %2563 = vmatpush3.bf16.msra.mxu1 %v3028_v10  ;;  %2564 = vmatprep.mubr.msk.bf16.mxu1 %vm2811_vm4, %v2810_v11 }
0x1021   : > { %v1326_v14 = vpop.f32.mrb[8].mxu1 }
0x1022   : > { %v1333_v15 = vrot.slane %v1326_v14, 6  ;;  %v2554_v16 = vpop.f32.mrb[9].mxu1 }
0x1023   : > { %v1329_v19 = vpop.f32.mrb[10].mxu1 }
0x1024   : > { %v1335_v22 = vadd.f32 %v1333_v15, %v3023_v8  ;;  %v2555_v23 = vpop.f32.mrb[11].mxu1 }
0x1026   : > { %2710 = vtanh.f32 %v1335_v22  ;;  %v2407_v25 = vmul.f32 -1.442695, %v1335_v22 }
0x1028   : > { %2712 = vpow2.f32 %v2407_v25 }
0x1030   : > { %v2711_v24 = vpop.eup %2710 }
0x1031   : > { %1348 = vrot.lane.b32.xlu0 %v2711_v24, %s2813_s16 }
0x1032   : > { %v2713_v26 = vpop.eup %2712 }
0x1033   : > { %v1339_v27 = vadd.f32 1.0, %v2713_v26  ;;  %v2412_v26 = vcombine.low %v2995_v20, %v2997_v21 }
0x1035   : > { %2714 = vrcp.f32 %v1339_v27 }
0x103f   : > { %v2715_v10 = vpop.eup %2714 }
0x1040   : > { %v1346_v31 = vmul.f32 %v2715_v10, %v1344_v30 }
0x10a3   : > { %v1349_v28 = vpop.permute.xlu0 %1348 }
0x10a4   : > { %v1351_v29 = vmul.f32 %v2715_v10, %v1349_v28 }
0x10a6   : > { %1353 = vrot.lane.b32.xlu1 %v1351_v29, %s2814_s0 }
0x1118   : > { %v1354_v32 = vpop.permute.xlu1 %1353 }
0x1119   : > { %v1356_v33 = vadd.f32 %v1354_v32, %v1346_v31 }
0x111b   : > { %2716 = vtanh.f32 %v1356_v33 }
0x1125   : > { %v2717_v34 = vpop.eup %2716 }
0x1126   : > { %1359 = vrot.lane.b32.xlu0 %v2717_v34, %s2814_s0 }
0x1198   : > { %v1360_v35 = vpop.permute.xlu0 %1359 }
0x1199   : > { %v1362_v36 = vmul.f32 %v2715_v10, %v1360_v35 }
0x119b   : > { %v1363_v37 = vpack.c.bf16 %v1362_v36, %v1362_v36  ;;  %v1527_v60 = vsel %vm1521_vm5, %v3098_v9, %v1362_v36 }
0x119d   : > { %v1365_v38 = vrot.slane %v1363_v37, 1 }
0x119f   : > { %1366 = vrot.lane.b32.xlu1 %v1365_v38, %s2815_s1 }
0x1211   : > { %v1367_v39 = vpop.permute.xlu1 %1366 }
0x1212   : > { %2559 = vmatmul.mubr.msk.bf16.vlgmr.msra.gmra.mrb[12].mxu0 %vm566_vm1, %v1367_v39 }
0x1213   : > { %2570 = vmatprep.mubr.msk.bf16.mxu0 %vm2811_vm4, %v2810_v11  ;;  %v1423_v11 = vrot.slane %v1356_v33, 6  ;;  %2569 = vmatpush3.bf16.msra.mxu0 %v2412_v26 }
0x12e5   : > { %v1405_v40 = vpop.f32.mrb[12].mxu0 }
0x12e6   : > { %v1412_v41 = vrot.slane %v1405_v40, 4  ;;  %v2560_v42 = vpop.f32.mrb[13].mxu0 }
0x12e7   : > { %v1408_v43 = vpop.f32.mrb[14].mxu0 }
0x12e8   : > { %v1414_v44 = vadd.f32 %v1412_v41, %v3023_v8  ;;  %v2561_v45 = vpop.f32.mrb[15].mxu0 }
0x12ea   : > { %2718 = vtanh.f32 %v1414_v44  ;;  %v2409_v47 = vmul.f32 -1.442695, %v1414_v44 }
0x12ec   : > { %2720 = vpow2.f32 %v2409_v47 }
0x12f4   : > { %v2719_v46 = vpop.eup %2718 }
0x12f5   : > { %1427 = vrot.lane.b32.xlu0 %v2719_v46, %s2813_s16 }
0x12f6   : > { %v2721_v48 = vpop.eup %2720 }
0x12f7   : > { %v1418_v49 = vadd.f32 1.0, %v2721_v48 }
0x12f9   : > { %2722 = vrcp.f32 %v1418_v49 }
0x1303   : > { %v2723_v51 = vpop.eup %2722 }
0x1304   : > { %v1425_v54 = vmul.f32 %v2723_v51, %v1423_v11 }
0x1367   : > { %v1428_v52 = vpop.permute.xlu0 %1427 }
0x1368   : > { %v1430_v53 = vmul.f32 %v2723_v51, %v1428_v52 }
0x136a   : > { %1432 = vrot.lane.b32.xlu1 %v1430_v53, %s2814_s0 }
0x13dc   : > { %v1433_v55 = vpop.permute.xlu1 %1432 }
0x13dd   : > { %v1435_v56 = vadd.f32 %v1433_v55, %v1425_v54 }
0x13df   : > { %2724 = vtanh.f32 %v1435_v56  ;;  %v1502_v22 = vrot.slane %v1435_v56, 6 }
0x13e9   : > { %v2725_v57 = vpop.eup %2724 }
0x13ea   : > { %1438 = vrot.lane.b32.xlu0 %v2725_v57, %s2814_s0 }
0x145c   : > { %v1439_v58 = vpop.permute.xlu0 %1438 }
0x145d   : > { %v1441_v59 = vmul.f32 %v2723_v51, %v1439_v58 }
0x145f   : > { %v1442_v61 = vpack.c.bf16 %v1441_v59, %v1441_v59  ;;  %v1528_v62 = vsel %vm1523_vm6, %v1527_v60, %v1441_v59 }
0x1461   : > { %v1444_v63 = vrot.slane %v1442_v61, 2 }
0x1463   : > { %1445 = vrot.lane.b32.xlu1 %v1444_v63, %s2815_s1 }
0x14d5   : > { %v1446_v0 = vpop.permute.xlu1 %1445 }
0x14d6   : > { %2565 = vmatmul.mubr.msk.bf16.vlgmr.msra.gmra.mrb[12].mxu1 %vm566_vm1, %v1446_v0 }
0x15a9   : > { %v1484_v1 = vpop.f32.mrb[12].mxu1 }
0x15aa   : > { %v1491_v2 = vrot.slane %v1484_v1, 2  ;;  %v2566_v3 = vpop.f32.mrb[13].mxu1 }
0x15ab   : > { %v1487_v4 = vpop.f32.mrb[14].mxu1 }
0x15ac   : > { %v1493_v6 = vadd.f32 %v1491_v2, %v3023_v8  ;;  %v2567_v7 = vpop.f32.mrb[15].mxu1 }
0x15ae   : > { %2726 = vtanh.f32 %v1493_v6  ;;  %v2411_v9 = vmul.f32 -1.442695, %v1493_v6 }
0x15b0   : > { %2728 = vpow2.f32 %v2411_v9 }
0x15b8   : > { %v2727_v12 = vpop.eup %2726 }
0x15b9   : > { %1506 = vrot.lane.b32.xlu0 %v2727_v12, %s2813_s16 }
0x15ba   : > { %v2729_v13 = vpop.eup %2728 }
0x15bb   : > { %v1497_v14 = vadd.f32 1.0, %v2729_v13 }
0x15bd   : > { %2730 = vrcp.f32 %v1497_v14 }
0x15c7   : > { %v2731_v15 = vpop.eup %2730 }
0x15c8   : > { %v1504_v23 = vmul.f32 %v2731_v15, %v1502_v22 }
0x162b   : > { %v1507_v16 = vpop.permute.xlu0 %1506 }
0x162c   : > { %v1509_v19 = vmul.f32 %v2731_v15, %v1507_v16 }
0x162e   : > { %1511 = vrot.lane.b32.xlu1 %v1509_v19, %s2814_s0 }
0x16a0   : > { %v1512_v24 = vpop.permute.xlu1 %1511 }
0x16a1   : > { %v1514_v25 = vadd.f32 %v1512_v24, %v1504_v23 }
0x16a3   : > { %2732 = vtanh.f32 %v1514_v25 }
0x16ad   : > { %v2733_v27 = vpop.eup %2732 }
0x16ae   : > { %1517 = vrot.lane.b32.xlu0 %v2733_v27, %s2814_s0 }
0x1720   : > { %v1518_v10 = vpop.permute.xlu0 %1517 }
0x1721   : > { %v1520_v28 = vmul.f32 %v2731_v15, %v1518_v10 }
0x1723   : > { %v1529_v29 = vsel %vm1525_vm7, %v1528_v62, %v1520_v28 }
0x1724   : > { %v1530_v30 = vpack.c.bf16 %v1529_v29, %v3086_v50 }
0x1726   : > { %1532 = vrot.lane.b32.xlu1 %v1530_v30, %s2815_s1 }
0x1798   : > { %v1533_v31 = vpop.permute.xlu1 %1532 }
0x1799   : > { %2571 = vmatmul.mubr.msk.bf16.vlgmr.msra.gmra.mrb[16].mxu0 %vm566_vm1, %v1533_v31 }
0x186c   : > { %v1577_v32 = vpop.f32.mrb[16].mxu0 }
0x186d   : > { %1585 = vst.msk [vmem:[%s2992_s21] sm:$0xff] %vm1584_vm8, %v1577_v32  ;;  %v2572_v33 = vpop.f32.mrb[17].mxu0 }
0x186e   : > { %v1580_v34 = vpop.f32.mrb[18].mxu0 }
0x186f   : > { %1586 = vst.msk [vmem:[%s2992_s21 + $0x8] sm:$0xff] %vm1584_vm8, %v1580_v34  ;;  %v2573_v35 = vpop.f32.mrb[19].mxu0 }
0x1870 PF: > { %p2414_p5 = scmp.ne.s32.totalorder %s2908_s19, 1 }
0x1871   : > { %v3139_v36 = vcombine.low (!%p2414_p5), %v2985_v17, %v2987_v18  ;;  %v2816_v50 = vmov (!%p2414_p5), 0.0   ;;  %vm2817_vm9 = vmmov (!%p2414_p5), 0   ;;  %v2818_v17 = vmov (!%p2414_p5), 0   ;;  %s2819_s19 = smov (!%p2414_p5), 80   ;;  %s2820_s17 = smov (!%p2414_p5), 16  }
0x1872   : > { %1590 = sbr.rel (%p2414_p5) target bundleno = 12136 (0x2f68), region = 88  ;;  %2574 = vmatprep.subr.bf16.mxu0 (!%p2414_p5), %v2816_v50  ;;  %2576 = vmatprep.mubr.msk.bf16.mxu0 (!%p2414_p5), %vm2817_vm9, %v2816_v50  ;;  %s2821_s20 = smov (!%p2414_p5), 96   ;;  %vm2214_vm10 = vcmask (!%p2414_p5), 1041408   ;;  %vm2216_vm11 = vcmask (!%p2414_p5), 1043456   ;;  %vm2218_vm12 = vcmask (!%p2414_p5), 1045504   ;;  %vm2277_vm13 = vcmask (!%p2414_p5), 293888  }
0x1873   : > { %2575 = vmatpush3.bf16.msra.mxu0 (!%p2414_p5), %v3139_v36  ;;  %2580 = vmatprep.subr.bf16.mxu1 (!%p2414_p5), %v2816_v50 }
0x1874   : > { %2581 = vmatpush3.bf16.msra.mxu1 (!%p2414_p5), %v3139_v36  ;;  %2582 = vmatprep.mubr.msk.bf16.mxu1 (!%p2414_p5), %vm2817_vm9, %v2816_v50 }
0x1875   : > { %2586 = vmatprep.subr.bf16.mxu0 (!%p2414_p5), %v2816_v50  ;;  %2592 = vmatprep.subr.bf16.mxu1 (!%p2414_p5), %v2816_v50 }
0x1876   : > { %2577 = vmatmul.mubr.bf16.vlgmr.msra.gmra.mrb[0].mxu0 (!%p2414_p5), %v2818_v17 }
0x1877   : > { %2587 = vmatpush3.bf16.msra.mxu0 (!%p2414_p5), %v3139_v36  ;;  %2588 = vmatprep.mubr.msk.bf16.mxu0 (!%p2414_p5), %vm2817_vm9, %v2816_v50 }
0x1878   : > { %2598 = vmatprep.subr.bf16.mxu0 (!%p2414_p5), %v2816_v50 }
0x1949   : > { %v1634_v18 = vpop.f32.mrb[0].mxu0 }
0x194a   : > { %v1641_v37 = vrot.slane %v1634_v18, 2  ;;  %v2578_v38 = vpop.f32.mrb[1].mxu0 }
0x194b   : > { %v1637_v39 = vpop.f32.mrb[2].mxu0 }
0x194c   : > { %v1643_v40 = vadd.f32 %v1641_v37, %v3023_v8  ;;  %v2579_v41 = vpop.f32.mrb[3].mxu0 }
0x194e   : > { %2734 = vtanh.f32 %v1643_v40  ;;  %v2416_v43 = vmul.f32 -1.442695, %v1643_v40 }
0x1950   : > { %2736 = vpow2.f32 %v2416_v43 }
0x1958   : > { %v2735_v42 = vpop.eup %2734 }
0x1959   : > { %1653 = vrot.lane.b32.xlu0 %v2735_v42, %s2819_s19 }
0x195a   : > { %v2737_v44 = vpop.eup %2736 }
0x195b   : > { %v1647_v45 = vadd.f32 1.0, %v2737_v44 }
0x195d   : > { %2738 = vrcp.f32 %v1647_v45 }
0x1967   : > { %v2739_v46 = vpop.eup %2738 }
0x1968   : > { %v1651_v49 = vmul.f32 0.0, %v2739_v46 }
0x19cb   : > { %v1654_v47 = vpop.permute.xlu0 %1653 }
0x19cc   : > { %v1656_v48 = vmul.f32 %v2739_v46, %v1654_v47 }
0x19ce   : > { %1658 = vrot.lane.b32.xlu0 %v1656_v48, %s2820_s17 }
0x1a40   : > { %v1659_v51 = vpop.permute.xlu0 %1658 }
0x1a41   : > { %v1661_v52 = vadd.f32 %v1659_v51, %v1651_v49 }
0x1a43   : > { %2740 = vtanh.f32 %v1661_v52  ;;  %v1728_v12 = vrot.slane %v1661_v52, 2 }
0x1a4d   : > { %v2741_v53 = vpop.eup %2740 }
0x1a4e   : > { %1664 = vrot.lane.b32.xlu1 %v2741_v53, %s2820_s17 }
0x1ac0   : > { %v1665_v11 = vpop.permute.xlu1 %1664 }
0x1ac1   : > { %v3159_v54 = vmul.f32 %v2739_v46, %v1665_v11 }
0x1ac3   : > { %v1668_v55 = vpack.c.bf16 %v3159_v54, %v3159_v54 }
0x1ac5   : > { %v1670_v56 = vrot.slane %v1668_v55, 3 }
0x1ac7   : > { %1671 = vrot.lane.b32.xlu1 %v1670_v56, %s2821_s20 }
0x1b39   : > { %v1672_v57 = vpop.permute.xlu1 %1671 }
0x1b3a   : > { %2583 = vmatmul.mubr.msk.bf16.vlgmr.msra.gmra.mrb[0].mxu1 %vm566_vm1, %v1672_v57 }
0x1b3b   : > { %2593 = vmatpush3.bf16.msra.mxu1 %v3139_v36  ;;  %2594 = vmatprep.mubr.msk.bf16.mxu1 %vm2817_vm9, %v2816_v50 }
0x1b3c   : > { %2604 = vmatprep.subr.bf16.mxu1 %v2816_v50 }
0x1c0d   : > { %v1710_v58 = vpop.f32.mrb[0].mxu1 }
0x1c0e   : > { %v1717_v59 = vrot.slane %v1710_v58, 4  ;;  %v2584_v60 = vpop.f32.mrb[1].mxu1 }
0x1c0f   : > { %v1713_v61 = vpop.f32.mrb[2].mxu1 }
0x1c10   : > { %v1719_v62 = vadd.f32 %v1717_v59, %v3023_v8  ;;  %v2585_v63 = vpop.f32.mrb[3].mxu1 }
0x1c12   : > { %2742 = vtanh.f32 %v1719_v62  ;;  %v2418_v1 = vmul.f32 -1.442695, %v1719_v62 }
0x1c14   : > { %2744 = vpow2.f32 %v2418_v1 }
0x1c1c   : > { %v2743_v0 = vpop.eup %2742 }
0x1c1d   : > { %1732 = vrot.lane.b32.xlu0 %v2743_v0, %s2819_s19 }
0x1c1e   : > { %v2745_v2 = vpop.eup %2744 }
0x1c1f   : > { %v1723_v3 = vadd.f32 1.0, %v2745_v2 }
0x1c21   : > { %2746 = vrcp.f32 %v1723_v3 }
0x1c2b   : > { %v2747_v4 = vpop.eup %2746 }
0x1c2c   : > { %v1730_v9 = vmul.f32 %v2747_v4, %v1728_v12 }
0x1c8f   : > { %v1733_v6 = vpop.permute.xlu0 %1732 }
0x1c90   : > { %v1735_v7 = vmul.f32 %v2747_v4, %v1733_v6 }
0x1c92   : > { %1737 = vrot.lane.b32.xlu1 %v1735_v7, %s2820_s17 }
0x1d04   : > { %v1738_v13 = vpop.permute.xlu1 %1737 }
0x1d05   : > { %v1740_v14 = vadd.f32 %v1738_v13, %v1730_v9 }
0x1d07   : > { %2748 = vtanh.f32 %v1740_v14  ;;  %v1807_v18 = vrot.slane %v1740_v14, 2 }
0x1d11   : > { %v2749_v15 = vpop.eup %2748 }
0x1d12   : > { %1743 = vrot.lane.b32.xlu0 %v2749_v15, %s2820_s17 }
0x1d84   : > { %v1744_v16 = vpop.permute.xlu0 %1743 }
0x1d85   : > { %v3173_v19 = vmul.f32 %v2747_v4, %v1744_v16 }
0x1d87   : > { %v1747_v22 = vpack.c.bf16 %v3173_v19, %v3173_v19 }
0x1d89   : > { %v1749_v23 = vrot.slane %v1747_v22, 2 }
0x1d8b   : > { %1750 = vrot.lane.b32.xlu1 %v1749_v23, %s2821_s20 }
0x1dfd   : > { %v1751_v24 = vpop.permute.xlu1 %1750 }
0x1dfe   : > { %2589 = vmatmul.mubr.msk.bf16.vlgmr.msra.gmra.mrb[4].mxu0 %vm566_vm1, %v1751_v24 }
0x1dff   : > { %2599 = vmatpush3.bf16.msra.mxu0 %v3139_v36  ;;  %2600 = vmatprep.mubr.msk.bf16.mxu0 %vm2817_vm9, %v2816_v50 }
0x1e00   : > { %2610 = vmatprep.subr.bf16.mxu0 %v2816_v50 }
0x1ed1   : > { %v1789_v25 = vpop.f32.mrb[4].mxu0 }
0x1ed2   : > { %v1796_v26 = vrot.slane %v1789_v25, 6  ;;  %v2590_v27 = vpop.f32.mrb[5].mxu0 }
0x1ed3   : > { %v1792_v10 = vpop.f32.mrb[6].mxu0 }
0x1ed4   : > { %v1798_v28 = vadd.f32 %v1796_v26, %v3023_v8  ;;  %v2591_v29 = vpop.f32.mrb[7].mxu0 }
0x1ed6   : > { %2750 = vtanh.f32 %v1798_v28  ;;  %v2420_v31 = vmul.f32 -1.442695, %v1798_v28 }
0x1ed8   : > { %2752 = vpow2.f32 %v2420_v31 }
0x1ee0   : > { %v2751_v30 = vpop.eup %2750 }
0x1ee1   : > { %1811 = vrot.lane.b32.xlu0 %v2751_v30, %s2819_s19 }
0x1ee2   : > { %v2753_v32 = vpop.eup %2752 }
0x1ee3   : > { %v1802_v33 = vadd.f32 1.0, %v2753_v32 }
0x1ee5   : > { %2754 = vrcp.f32 %v1802_v33 }
0x1eef   : > { %v2755_v34 = vpop.eup %2754 }
0x1ef0   : > { %v1809_v37 = vmul.f32 %v2755_v34, %v1807_v18 }
0x1f53   : > { %v1812_v35 = vpop.permute.xlu0 %1811 }
0x1f54   : > { %v1814_v17 = vmul.f32 %v2755_v34, %v1812_v35 }
0x1f56   : > { %1816 = vrot.lane.b32.xlu1 %v1814_v17, %s2820_s17 }
0x1fc8   : > { %v1817_v38 = vpop.permute.xlu1 %1816 }
0x1fc9   : > { %v1819_v39 = vadd.f32 %v1817_v38, %v1809_v37 }
0x1fcb   : > { %2756 = vtanh.f32 %v1819_v39  ;;  %v1883_v59 = vrot.slane %v1819_v39, 2 }
0x1fd5   : > { %v2757_v40 = vpop.eup %2756 }
0x1fd6   : > { %1822 = vrot.lane.b32.xlu0 %v2757_v40, %s2820_s17 }
0x2048   : > { %v1823_v41 = vpop.permute.xlu0 %1822 }
0x2049   : > { %v3187_v42 = vmul.f32 %v2755_v34, %v1823_v41 }
0x204b   : > { %v1826_v43 = vpack.c.bf16 %v3187_v42, %v3187_v42 }
0x204d   : > { %v1828_v44 = vrot.slane %v1826_v43, 1 }
0x204f   : > { %1829 = vrot.lane.b32.xlu1 %v1828_v44, %s2821_s20 }
0x20c1   : > { %v1830_v45 = vpop.permute.xlu1 %1829 }
0x20c2   : > { %2595 = vmatmul.mubr.msk.bf16.vlgmr.msra.gmra.mrb[4].mxu1 %vm566_vm1, %v1830_v45 }
0x20c3   : > { %2605 = vmatpush3.bf16.msra.mxu1 %v3139_v36  ;;  %2606 = vmatprep.mubr.msk.bf16.mxu1 %vm2817_vm9, %v2816_v50 }
0x20c4   : > { %2616 = vmatprep.subr.bf16.mxu1 %v2816_v50 }
0x2195   : > { %v1868_v46 = vpop.f32.mrb[4].mxu1 }
0x2196   : > { %v1874_v47 = vadd.f32 %v1868_v46, %v3023_v8  ;;  %v2596_v48 = vpop.f32.mrb[5].mxu1 }
0x2197   : > { %v1871_v49 = vpop.f32.mrb[6].mxu1 }
0x2198   : > { %2758 = vtanh.f32 %v1874_v47  ;;  %v2597_v51 = vpop.f32.mrb[7].mxu1  ;;  %v2422_v53 = vmul.f32 -1.442695, %v1874_v47 }
0x219a   : > { %2760 = vpow2.f32 %v2422_v53 }
0x21a2   : > { %v2759_v52 = vpop.eup %2758 }
0x21a3   : > { %1887 = vrot.lane.b32.xlu0 %v2759_v52, %s2819_s19 }
0x21a4   : > { %v2761_v11 = vpop.eup %2760 }
0x21a5   : > { %v1878_v55 = vadd.f32 1.0, %v2761_v11 }
0x21a7   : > { %2762 = vrcp.f32 %v1878_v55 }
0x21b1   : > { %v2763_v56 = vpop.eup %2762 }
0x21b2   : > { %v1885_v60 = vmul.f32 %v2763_v56, %v1883_v59 }
0x2215   : > { %v1888_v57 = vpop.permute.xlu0 %1887 }
0x2216   : > { %v1890_v58 = vmul.f32 %v2763_v56, %v1888_v57 }
0x2218   : > { %1892 = vrot.lane.b32.xlu1 %v1890_v58, %s2820_s17 }
0x228a   : > { %v1893_v8 = vpop.permute.xlu1 %1892 }
0x228b   : > { %v1895_v61 = vadd.f32 %v1893_v8, %v1885_v60 }
0x228d   : > { %2764 = vtanh.f32 %v1895_v61  ;;  %v1961_v25 = vrot.slane %v1895_v61, 2 }
0x2297   : > { %v2765_v62 = vpop.eup %2764 }
0x2298   : > { %1898 = vrot.lane.b32.xlu0 %v2765_v62, %s2820_s17 }
0x230a   : > { %v1899_v63 = vpop.permute.xlu0 %1898 }
0x230b   : > { %v3201_v0 = vmul.f32 %v2763_v56, %v1899_v63 }
0x230d   : > { %v1902_v1 = vpack.c.bf16 %v3201_v0, %v3201_v0 }
0x230f   : > { %1904 = vrot.lane.b32.xlu1 %v1902_v1, %s2821_s20 }
0x2381   : > { %v1905_v2 = vpop.permute.xlu1 %1904 }
0x2382   : > { %2601 = vmatmul.mubr.msk.bf16.vlgmr.msra.gmra.mrb[8].mxu0 %vm566_vm1, %v1905_v2 }
0x2383   : > { %2611 = vmatpush3.bf16.msra.mxu0 %v3139_v36  ;;  %2612 = vmatprep.mubr.msk.bf16.mxu0 %vm2817_vm9, %v2816_v50 }
0x2384   : > { %2622 = vmatprep.subr.bf16.mxu0 %v2816_v50 }
0x2455   : > { %v1943_v3 = vpop.f32.mrb[8].mxu0 }
0x2456   : > { %v1950_v4 = vrot.slane %v1943_v3, 2  ;;  %v2602_v6 = vpop.f32.mrb[9].mxu0 }
0x2457   : > { %v1946_v7 = vpop.f32.mrb[10].mxu0 }
0x2458   : > { %v1952_v12 = vadd.f32 %v1950_v4, %v3021_v5  ;;  %v2603_v9 = vpop.f32.mrb[11].mxu0 }
0x245a   : > { %2766 = vtanh.f32 %v1952_v12  ;;  %v2424_v14 = vmul.f32 -1.442695, %v1952_v12 }
0x245c   : > { %2768 = vpow2.f32 %v2424_v14 }
0x2464   : > { %v2767_v13 = vpop.eup %2766 }
0x2465   : > { %1965 = vrot.lane.b32.xlu0 %v2767_v13, %s2819_s19 }
0x2466   : > { %v2769_v15 = vpop.eup %2768 }
0x2467   : > { %v1956_v16 = vadd.f32 1.0, %v2769_v15 }
0x2469   : > { %2770 = vrcp.f32 %v1956_v16 }
0x2473   : > { %v2771_v22 = vpop.eup %2770 }
0x2474   : > { %v1963_v26 = vmul.f32 %v2771_v22, %v1961_v25 }
0x24d7   : > { %v1966_v23 = vpop.permute.xlu0 %1965 }
0x24d8   : > { %v1968_v24 = vmul.f32 %v2771_v22, %v1966_v23 }
0x24da   : > { %1970 = vrot.lane.b32.xlu1 %v1968_v24, %s2820_s17 }
0x254c   : > { %v1971_v27 = vpop.permute.xlu1 %1970 }
0x254d   : > { %v1973_v10 = vadd.f32 %v1971_v27, %v1963_v26 }
0x254f   : > { %2772 = vtanh.f32 %v1973_v10  ;;  %v2040_v46 = vrot.slane %v1973_v10, 2 }
0x2559   : > { %v2773_v28 = vpop.eup %2772 }
0x255a   : > { %1976 = vrot.lane.b32.xlu0 %v2773_v28, %s2820_s17 }
0x25cc   : > { %v1977_v29 = vpop.permute.xlu0 %1976 }
0x25cd   : > { %v3215_v30 = vmul.f32 %v2771_v22, %v1977_v29 }
0x25cf   : > { %v1980_v31 = vpack.c.bf16 %v3215_v30, %v3215_v30 }
0x25d1   : > { %v1982_v32 = vrot.slane %v1980_v31, 3 }
0x25d3   : > { %1983 = vrot.lane.b32.xlu1 %v1982_v32, %s2821_s20 }
0x2645   : > { %v1984_v33 = vpop.permute.xlu1 %1983 }
0x2646   : > { %2607 = vmatmul.mubr.msk.bf16.vlgmr.msra.gmra.mrb[8].mxu1 %vm566_vm1, %v1984_v33 }
0x2647   : > { %2617 = vmatpush3.bf16.msra.mxu1 %v3139_v36  ;;  %2618 = vmatprep.mubr.msk.bf16.mxu1 %vm2817_vm9, %v2816_v50 }
0x2719   : > { %v2022_v34 = vpop.f32.mrb[8].mxu1 }
0x271a   : > { %v2029_v35 = vrot.slane %v2022_v34, 4  ;;  %v2608_v17 = vpop.f32.mrb[9].mxu1 }
0x271b   : > { %v2025_v18 = vpop.f32.mrb[10].mxu1 }
0x271c   : > { %v2031_v37 = vadd.f32 %v2029_v35, %v3021_v5  ;;  %v2609_v38 = vpop.f32.mrb[11].mxu1 }
0x271d   : > { %v2431_v38 = vcombine.low %v2995_v20, %v2997_v21 }
0x271e   : > { %2774 = vtanh.f32 %v2031_v37  ;;  %v2426_v40 = vmul.f32 -1.442695, %v2031_v37 }
0x2720   : > { %2776 = vpow2.f32 %v2426_v40  ;;  %v2220_v40 = vsel %vm2214_vm10, %v3201_v0, %v3187_v42 }
0x2728   : > { %v2775_v39 = vpop.eup %2774 }
0x2729   : > { %2044 = vrot.lane.b32.xlu0 %v2775_v39, %s2819_s19 }
0x272a   : > { %v2777_v41 = vpop.eup %2776 }
0x272b   : > { %v2035_v43 = vadd.f32 1.0, %v2777_v41 }
0x272d   : > { %2778 = vrcp.f32 %v2035_v43 }
0x2737   : > { %v2779_v36 = vpop.eup %2778 }
0x2738   : > { %v2042_v47 = vmul.f32 %v2779_v36, %v2040_v46 }
0x279b   : > { %v2045_v44 = vpop.permute.xlu0 %2044 }
0x279c   : > { %v2047_v45 = vmul.f32 %v2779_v36, %v2045_v44 }
0x279e   : > { %2049 = vrot.lane.b32.xlu1 %v2047_v45, %s2820_s17 }
0x2810   : > { %v2050_v48 = vpop.permute.xlu1 %2049 }
0x2811   : > { %v2052_v49 = vadd.f32 %v2050_v48, %v2042_v47 }
0x2813   : > { %2780 = vtanh.f32 %v2052_v49 }
0x281d   : > { %v2781_v51 = vpop.eup %2780 }
0x281e   : > { %2055 = vrot.lane.b32.xlu0 %v2781_v51, %s2820_s17 }
0x2890   : > { %v2056_v52 = vpop.permute.xlu0 %2055 }
0x2891   : > { %v3228_v53 = vmul.f32 %v2779_v36, %v2056_v52  ;;  %v2221_v36 = vsel %vm2216_vm11, %v2220_v40, %v3173_v19 }
0x2892   : > { %v2222_v21 = vsel %vm2218_vm12, %v2221_v36, %v3159_v54 }
0x2893   : > { %v2059_v11 = vpack.c.bf16 %v3228_v53, %v3228_v53 }
0x2895   : > { %v2061_v55 = vrot.slane %v2059_v11, 2 }
0x2897   : > { %2062 = vrot.lane.b32.xlu1 %v2061_v55, %s2821_s20 }
0x2909   : > { %v2063_v56 = vpop.permute.xlu1 %2062 }
0x290a   : > { %2613 = vmatmul.mubr.msk.bf16.vlgmr.msra.gmra.mrb[12].mxu0 %vm566_vm1, %v2063_v56 }
0x290b   : > { %2624 = vmatprep.mubr.msk.bf16.mxu0 %vm2817_vm9, %v2816_v50  ;;  %v2119_v50 = vrot.slane %v2052_v49, 2  ;;  %2623 = vmatpush3.bf16.msra.mxu0 %v2431_v38 }
0x29dd   : > { %v2101_v57 = vpop.f32.mrb[12].mxu0 }
0x29de   : > { %v2108_v58 = vrot.slane %v2101_v57, 6  ;;  %v2614_v59 = vpop.f32.mrb[13].mxu0 }
0x29df   : > { %v2104_v60 = vpop.f32.mrb[14].mxu0 }
0x29e0   : > { %v2110_v8 = vadd.f32 %v2108_v58, %v3021_v5  ;;  %v2615_v61 = vpop.f32.mrb[15].mxu0 }
0x29e2   : > { %2782 = vtanh.f32 %v2110_v8  ;;  %v2428_v63 = vmul.f32 -1.442695, %v2110_v8 }
0x29e4   : > { %2784 = vpow2.f32 %v2428_v63 }
0x29ec   : > { %v2783_v62 = vpop.eup %2782 }
0x29ed   : > { %2123 = vrot.lane.b32.xlu0 %v2783_v62, %s2819_s19 }
0x29ee   : > { %v2785_v1 = vpop.eup %2784 }
0x29ef   : > { %v2114_v2 = vadd.f32 1.0, %v2785_v1 }
0x29f1   : > { %2786 = vrcp.f32 %v2114_v2 }
0x29fb   : > { %v2787_v3 = vpop.eup %2786 }
0x29fc   : > { %v2121_v7 = vmul.f32 %v2787_v3, %v2119_v50 }
0x2a5f   : > { %v2124_v4 = vpop.permute.xlu0 %2123 }
0x2a60   : > { %v2126_v6 = vmul.f32 %v2787_v3, %v2124_v4 }
0x2a62   : > { %2128 = vrot.lane.b32.xlu1 %v2126_v6, %s2820_s17 }
0x2ad4   : > { %v2129_v12 = vpop.permute.xlu1 %2128 }
0x2ad5   : > { %v2131_v9 = vadd.f32 %v2129_v12, %v2121_v7 }
0x2ad7   : > { %2788 = vtanh.f32 %v2131_v9  ;;  %v2195_v17 = vrot.slane %v2131_v9, 2 }
0x2ae1   : > { %v2789_v13 = vpop.eup %2788 }
0x2ae2   : > { %2134 = vrot.lane.b32.xlu0 %v2789_v13, %s2820_s17 }
0x2b54   : > { %v2135_v14 = vpop.permute.xlu0 %2134 }
0x2b55   : > { %v2137_v15 = vmul.f32 %v2787_v3, %v2135_v14 }
0x2b57   : > { %v2138_v16 = vpack.c.bf16 %v2137_v15, %v2137_v15 }
0x2b59   : > { %v2140_v22 = vrot.slane %v2138_v16, 1 }
0x2b5b   : > { %2141 = vrot.lane.b32.xlu1 %v2140_v22, %s2821_s20 }
0x2bcd   : > { %v2142_v23 = vpop.permute.xlu1 %2141 }
0x2bce   : > { %2619 = vmatmul.mubr.msk.bf16.vlgmr.msra.gmra.mrb[12].mxu1 %vm566_vm1, %v2142_v23 }
0x2ca1   : > { %v2180_v24 = vpop.f32.mrb[12].mxu1 }
0x2ca2   : > { %v2186_v25 = vadd.f32 %v2180_v24, %v3021_v5  ;;  %v2620_v26 = vpop.f32.mrb[13].mxu1 }
0x2ca3   : > { %v2183_v27 = vpop.f32.mrb[14].mxu1 }
0x2ca4   : > { %2790 = vtanh.f32 %v2186_v25  ;;  %v2621_v10 = vpop.f32.mrb[15].mxu1  ;;  %v2430_v29 = vmul.f32 -1.442695, %v2186_v25 }
0x2ca6   : > { %2792 = vpow2.f32 %v2430_v29 }
0x2cae   : > { %v2791_v28 = vpop.eup %2790 }
0x2caf   : > { %2199 = vrot.lane.b32.xlu0 %v2791_v28, %s2819_s19 }
0x2cb0   : > { %v2793_v31 = vpop.eup %2792 }
0x2cb1   : > { %v2190_v32 = vadd.f32 1.0, %v2793_v31 }
0x2cb3   : > { %2794 = vrcp.f32 %v2190_v32 }
0x2cbd   : > { %v2795_v33 = vpop.eup %2794 }
0x2cbe   : > { %v2197_v18 = vmul.f32 %v2795_v33, %v2195_v17 }
0x2d21   : > { %v2200_v34 = vpop.permute.xlu0 %2199 }
0x2d22   : > { %v2202_v35 = vmul.f32 %v2795_v33, %v2200_v34 }
0x2d24   : > { %2204 = vrot.lane.b32.xlu1 %v2202_v35, %s2820_s17 }
0x2d96   : > { %v2205_v5 = vpop.permute.xlu1 %2204 }
0x2d97   : > { %v2207_v37 = vadd.f32 %v2205_v5, %v2197_v18 }
0x2d99   : > { %2796 = vtanh.f32 %v2207_v37 }
0x2da3   : > { %v2797_v39 = vpop.eup %2796 }
0x2da4   : > { %2210 = vrot.lane.b32.xlu0 %v2797_v39, %s2820_s17 }
0x2e16   : > { %v2211_v41 = vpop.permute.xlu0 %2210 }
0x2e17   : > { %v2213_v43 = vmul.f32 %v2795_v33, %v2211_v41 }
0x2e19   : > { %v2215_v44 = vsel %vm2214_vm10, %v2213_v43, %v2137_v15 }
0x2e1a   : > { %v2217_v45 = vsel %vm2216_vm11, %v2215_v44, %v3228_v53 }
0x2e1b   : > { %v2219_v20 = vsel %vm2218_vm12, %v2217_v45, %v3215_v30 }
0x2e1c   : > { %v2223_v46 = vpack.c.bf16 %v2222_v21, %v2219_v20 }
0x2e1e   : > { %2225 = vrot.lane.b32.xlu1 %v2223_v46, %s2821_s20 }
0x2e90   : > { %v2226_v47 = vpop.permute.xlu1 %2225 }
0x2e91   : > { %2625 = vmatmul.mubr.msk.bf16.vlgmr.msra.gmra.mrb[16].mxu0 %vm566_vm1, %v2226_v47 }
0x2f64   : > { %v2270_v42 = vpop.f32.mrb[16].mxu0 }
0x2f65   : > { %2278 = vst.msk [vmem:[%s2992_s21] sm:$0xff] %vm2277_vm13, %v2270_v42  ;;  %v2626_v0 = vpop.f32.mrb[17].mxu0 }
0x2f66   : > { %v2273_v48 = vpop.f32.mrb[18].mxu0 }
0x2f67   : > { %2279 = vst.msk [vmem:[%s2992_s21 + $0x8] sm:$0xff] %vm2277_vm13, %v2273_v48  ;;  %v2627_v19 = vpop.f32.mrb[19].mxu0 }
0x2f68 PF: > { %s25_s18 = sadd.s32 1, %s2804_s18  }
0x2f69   : > { %p22_p6 = scmp.ge.s32.totalorder %s25_s18, 4  }
0x2f6b   :  { %24 = sbr.rel (!%p22_p6) target bundleno = 3 (0x3), region = 127 }

</bundles_post_ra>
